<compile_context>
chip_gen: v7x
topology: tpu7x:2x2x1
jax: 0.10.0
libtpu: 0.0.40
codegen_flags: <defaults>
</compile_context>

<pallas_src>
import functools

import jax
import jax.numpy as jnp
from jax.experimental import pallas as pl
from jax.experimental.pallas import tpu as pltpu

LANE = 128


def _round_up(a, m):
    return (a + m - 1) // m * m


# ----------------------------- Pallas kernels ------------------------------ #

def _conv_slab_kernel(x_ref, w_ref, b_ref, o_ref, acc_ref, *,
                      k, win, ho, wo, apply_silu):
    """One image of a VALID, stride-1 k x k conv as k*k accumulated GEMMs.

    x_ref  : (1, Hin*Win, Kin)   bf16   flattened (row-major spatial) input image
    w_ref  : (k*k, Kin, Coutp)   bf16   per-tap weight matrices (VMEM resident)
    b_ref  : (1, Coutp)          f32
    o_ref  : (1, ho, wo, Coutp)  bf16   lane-dense (Coutp = multiple of 128)
    acc_ref: (L, Coutp)          f32    scratch, L = (ho-1)*Win + wo

    For tap (di, dj) the contiguous slab x_flat[di*Win+dj : di*Win+dj+L] is a
    valid im2col block for every output position (r, c) at flat row r*Win + c
    (c < wo); the extra rows (c >= wo) are wrap-around garbage that is never
    stored.  This keeps all in-kernel accesses contiguous 2-D slices (no HBM
    im2col, no strided loads, no in-kernel reshapes).
    """
    L = (ho - 1) * win + wo
    for di in range(k):
        for dj in range(k):
            t = di * k + dj
            off = di * win + dj
            xs = x_ref[0, pl.ds(off, L), :]                       # (L, Kin) bf16
            part = jnp.dot(xs, w_ref[t], preferred_element_type=jnp.float32)
            if t == 0:
                acc_ref[...] = part
            else:
                acc_ref[...] += part
    y = acc_ref[...] + b_ref[...]                                 # (L, Coutp) f32
    if apply_silu:
        y = y * jax.nn.sigmoid(y)
    y = y.astype(o_ref.dtype)
    for r in range(ho):                                           # lane-dense stores
        o_ref[0, r, :, :] = y[r * win:r * win + wo, :]


def _gn_silu_proj_kernel(x_ref, gamma_ref, beta_ref, agg_ref, wz_ref, bz_ref,
                         o_ref, *, eps, inv_count):
    """GroupNorm + SiLU + fused final 1x1 conv, one image per grid step.

    x_ref     : (1, P, Cp)  bf16   P = H*W
    gamma/beta: (1, Cp)     f32
    agg_ref   : (Cp, Cp)    f32    0/1 same-group indicator matrix
    wz_ref    : (Cp, Zp)    bf16   1x1-conv weight (channels-in x channels-out)
    bz_ref    : (1, Zp)     f32
    o_ref     : (1, P, Zp)  f32
    """
    x = x_ref[0].astype(jnp.float32)                              # (P, Cp)
    s1 = jnp.sum(x, axis=0, keepdims=True)                        # (1, Cp)
    s2 = jnp.sum(x * x, axis=0, keepdims=True)                    # (1, Cp)
    gsum = jnp.dot(s1, agg_ref[...], preferred_element_type=jnp.float32)
    gsq = jnp.dot(s2, agg_ref[...], preferred_element_type=jnp.float32)
    mean = gsum * inv_count
    var = jnp.maximum(gsq * inv_count - mean * mean, 0.0)         # clamp (one-pass var)
    inv = jax.lax.rsqrt(var + eps)
    y = (x - mean) * inv * gamma_ref[...] + beta_ref[...]
    y = y * jax.nn.sigmoid(y)                                     # SiLU
    z = jnp.dot(y.astype(jnp.bfloat16), wz_ref[...],
                preferred_element_type=jnp.float32) + bz_ref[...]
    o_ref[0, :, :] = z.astype(o_ref.dtype)


# ------------------------------ pallas wrappers ----------------------------- #

_COMPILER_PARAMS = pltpu.CompilerParams(
    dimension_semantics=("parallel",),      # batch grid -> both v7x TensorCores
    vmem_limit_bytes=32 * 1024 * 1024,      # safe under v7x's 64 MiB VMEM
)


def _conv_layer_pallas(x_flat, w_taps, bias_row, *, k, win, ho, wo, apply_silu):
    n, pin, kin = x_flat.shape
    taps, _, coutp = w_taps.shape
    L = (ho - 1) * win + wo
    kernel = functools.partial(_conv_slab_kernel, k=k, win=win, ho=ho, wo=wo,
                               apply_silu=apply_silu)
    return pl.pallas_call(
        kernel,
        out_shape=jax.ShapeDtypeStruct((n, ho, wo, coutp), jnp.bfloat16),
        grid_spec=pltpu.PrefetchScalarGridSpec(
            num_scalar_prefetch=0,
            grid=(n,),
            in_specs=[
                pl.BlockSpec((1, pin, kin), lambda b: (b, 0, 0)),
                pl.BlockSpec((taps, kin, coutp), lambda b: (0, 0, 0)),  # resident
                pl.BlockSpec((1, coutp), lambda b: (0, 0)),             # resident
            ],
            out_specs=pl.BlockSpec((1, ho, wo, coutp), lambda b: (b, 0, 0, 0)),
            scratch_shapes=[pltpu.VMEM((L, coutp), jnp.float32)],
        ),
        compiler_params=_COMPILER_PARAMS,
    )(x_flat, w_taps, bias_row)


def _gn_silu_proj_pallas(x_flat, gamma_row, beta_row, agg, wz, bz_row, *,
                         eps, inv_count):
    n, p, cp = x_flat.shape
    zp = wz.shape[1]
    kernel = functools.partial(_gn_silu_proj_kernel, eps=eps, inv_count=inv_count)
    return pl.pallas_call(
        kernel,
        out_shape=jax.ShapeDtypeStruct((n, p, zp), jnp.float32),
        grid_spec=pltpu.PrefetchScalarGridSpec(
            num_scalar_prefetch=0,
            grid=(n,),
            in_specs=[
                pl.BlockSpec((1, p, cp), lambda b: (b, 0, 0)),
                pl.BlockSpec((1, cp), lambda b: (0, 0)),
                pl.BlockSpec((1, cp), lambda b: (0, 0)),
                pl.BlockSpec((cp, cp), lambda b: (0, 0)),
                pl.BlockSpec((cp, zp), lambda b: (0, 0)),
                pl.BlockSpec((1, zp), lambda b: (0, 0)),
            ],
            out_specs=pl.BlockSpec((1, p, zp), lambda b: (b, 0, 0)),
        ),
        compiler_params=_COMPILER_PARAMS,
    )(x_flat, gamma_row, beta_row, agg, wz, bz_row)


# --------------------------- Encoder construction --------------------------- #

def init_encoder_params(key, inp_ch, num_layers=5, base_width=48, z_ch=4,
                        max_width=512, group_norm=True):
    """Deterministic synthetic parameters matching the PyTorch module's shapes."""
    params = []
    c = inp_ch
    for i in range(num_layers):
        out_ch = min(2 ** i * base_width, max_width)
        k = 4 if i <= 1 else 3
        s = 2 if i <= 1 else 1
        has_bias = not (group_norm and i == num_layers - 1)
        key, kw, kb = jax.random.split(key, 3)
        fan_in = c * k * k
        weight = jax.random.normal(kw, (out_ch, c, k, k), jnp.float32) / jnp.sqrt(
            jnp.float32(fan_in))
        bias = (jax.random.normal(kb, (out_ch,), jnp.float32) * 0.1
                if has_bias else None)
        gn = None
        if not has_bias:
            # PyTorch GroupNorm default init: weight=1, bias=0.
            gn = (jnp.ones((out_ch,), jnp.float32), jnp.zeros((out_ch,), jnp.float32))
        params.append(dict(w=weight, b=bias, k=k, s=s, gn=gn))
        c = out_ch

    key, kw, kb = jax.random.split(key, 3)
    weight = jax.random.normal(kw, (z_ch, c, 1, 1), jnp.float32) / jnp.sqrt(
        jnp.float32(c))
    bias = jax.random.normal(kb, (z_ch,), jnp.float32) * 0.1
    params.append(dict(w=weight, b=bias, k=1, s=1, gn=None))
    return params


def prepare_pallas_params(params, num_groups=32, eps=1e-6):
    """One-time rearrangement/padding of PyTorch-layout parameters into the
    TPU layout consumed by the kernels (bf16 per-tap weight matrices, 128-lane
    padded channels, space-to-depth weight remap for stride-2 layers, GN group
    matrix, fused 1x1 projection)."""
    conv_layers, final = params[:-1], params[-1]
    assert conv_layers[-1]["gn"] is not None, \
        "prepare_pallas_params expects GroupNorm on the last conv layer"

    prepped = []
    cin_rt = int(conv_layers[0]["w"].shape[1])      # runtime input channels (true)
    for layer in conv_layers:
        w, b, k, s = layer["w"], layer["b"], layer["k"], layer["s"]
        cout, cin_true = int(w.shape[0]), int(w.shape[1])
        cout_p = _round_up(cout, LANE)
        if s == 2:
            assert k == 4, "stride-2 layers are 4x4 in this encoder"
            keff = 2
            kin_raw = 4 * cin_rt
            # di = 2*ai + ri, dj = 2*aj + rj  ->  tap (ai,aj), channel (ri,rj,ci)
            w6 = w.reshape(cout, cin_true, 2, 2, 2, 2)           # (co,ci,ai,ri,aj,rj)
            wt = jnp.transpose(w6, (2, 4, 3, 5, 1, 0))           # (ai,aj,ri,rj,ci,co)
            full = jnp.zeros((2, 2, 2, 2, cin_rt, cout_p), jnp.float32)
            full = full.at[..., :cin_true, :cout].set(wt)
            w_taps = full.reshape(4, kin_raw, cout_p)
        else:
            assert s == 1
            keff = k
            kin_raw = cin_rt
            wt = jnp.transpose(w, (2, 3, 1, 0))                  # (kh,kw,ci,co)
            full = jnp.zeros((k, k, cin_rt, cout_p), jnp.float32)
            full = full.at[..., :cin_true, :cout].set(wt)
            w_taps = full.reshape(k * k, kin_raw, cout_p)
        kin = _round_up(kin_raw, 8)
        if kin != kin_raw:
            w_taps = jnp.zeros((keff * keff, kin, cout_p), jnp.float32
                               ).at[:, :kin_raw, :].set(w_taps)
        bias_row = jnp.zeros((1, cout_p), jnp.float32)
        if b is not None:
            bias_row = bias_row.at[0, :cout].set(b)
        prepped.append(dict(s2d=(s == 2), k=keff, kin=int(kin),
                            w=w_taps.astype(jnp.bfloat16), b=bias_row,
                            apply_silu=(b is not None)))
        cin_rt = cout_p

    # Fused GroupNorm + SiLU + final 1x1 projection head.
    c_gn = int(conv_layers[-1]["w"].shape[0])
    cp = _round_up(c_gn, LANE)
    gamma, beta = conv_layers[-1]["gn"]
    gamma_row = jnp.zeros((1, cp), jnp.float32).at[0, :c_gn].set(gamma)
    beta_row = jnp.zeros((1, cp), jnp.float32).at[0, :c_gn].set(beta)
    cg = c_gn // num_groups
    agg = jnp.zeros((cp, cp), jnp.float32)
    agg = agg.at[:c_gn, :c_gn].set(
        jnp.kron(jnp.eye(num_groups, dtype=jnp.float32),
                 jnp.ones((cg, cg), jnp.float32)))
    wz, bz = final["w"], final["b"]                              # (z,c,1,1), (z,)
    z_ch = int(wz.shape[0])
    zp = _round_up(z_ch, LANE)
    wz_mat = jnp.zeros((cp, zp), jnp.float32).at[:c_gn, :z_ch].set(
        jnp.transpose(wz[:, :, 0, 0], (1, 0)))
    bz_row = jnp.zeros((1, zp), jnp.float32).at[0, :z_ch].set(bz)
    head = dict(gamma=gamma_row, beta=beta_row, agg=agg,
                wz=wz_mat.astype(jnp.bfloat16), bz=bz_row,
                cg=cg, eps=float(eps), z_ch=z_ch)
    return prepped, head


def encoder_forward_pallas(x_nchw, prepped, head):
    """Pallas-backed forward pass.  Input/output NCHW (PyTorch convention)."""
    x = jnp.transpose(x_nchw, (0, 2, 3, 1)).astype(jnp.bfloat16)  # NHWC bf16
    for layer in prepped:
        n, h, w, c = x.shape
        if layer["s2d"]:
            # 4x4 stride-2 conv -> space-to-depth + 2x2 stride-1 conv.
            ho, wo = (h - 4) // 2 + 1, (w - 4) // 2 + 1
            phases = [x[:, ri::2, rj::2, :][:, :ho + 1, :wo + 1, :]
                      for ri in range(2) for rj in range(2)]
            x = jnp.concatenate(phases, axis=-1)
        else:
            k = layer["k"]
            ho, wo = h - k + 1, w - k + 1
        n, hin, win, cin = x.shape
        if cin < layer["kin"]:
            x = jnp.pad(x, ((0, 0), (0, 0), (0, 0), (0, layer["kin"] - cin)))
        x_flat = x.reshape(n, hin * win, layer["kin"])            # free (bitcast)
        x = _conv_layer_pallas(x_flat, layer["w"], layer["b"],
                               k=layer["k"], win=win, ho=ho, wo=wo,
                               apply_silu=layer["apply_silu"])

    # Fused GroupNorm + SiLU + final 1x1 conv.
    n, h, w, cp = x.shape
    inv_count = 1.0 / float(head["cg"] * h * w)
    x_flat = x.reshape(n, h * w, cp)
    z = _gn_silu_proj_pallas(x_flat, head["gamma"], head["beta"], head["agg"],
                             head["wz"], head["bz"],
                             eps=head["eps"], inv_count=inv_count)
    z = z.reshape(n, h, w, -1)[..., :head["z_ch"]]
    return jnp.transpose(z, (0, 3, 1, 2))                         # NCHW f32


# ------------------------------ pure-JAX reference --------------------------- #

def encoder_reference(x_nchw, params, num_groups=32, eps=1e-6):
    x = x_nchw.astype(jnp.float32)
    n_layers = len(params)
    for idx, layer in enumerate(params):
        w, b, s, gn = layer["w"], layer["b"], layer["s"], layer["gn"]
        x = jax.lax.conv_general_dilated(
            x, w, (s, s), "VALID", dimension_numbers=("NCHW", "OIHW", "NCHW"))
        if b is not None:
            x = x + b[None, :, None, None]
        if gn is not None:
            gamma, beta = gn
            n, c, h, ww = x.shape
            xg = x.reshape(n, num_groups, c // num_groups, h, ww)
            mean = xg.mean(axis=(2, 3, 4), keepdims=True)
            var = ((xg - mean) ** 2).mean(axis=(2, 3, 4), keepdims=True)
            xg = (xg - mean) * jax.lax.rsqrt(var + eps)
            x = (xg.reshape(n, c, h, ww) * gamma[None, :, None, None]
                 + beta[None, :, None, None])
        if idx < n_layers - 1:
            x = x * jax.nn.sigmoid(x)
    return x


# ----------------------------------- main ----------------------------------- #

if __name__ == "__main__":
    key = jax.random.PRNGKey(0)
    k_params, k_x = jax.random.split(key)

    # Small-but-consistent config: 5 conv layers, GroupNorm(32) on the last one,
    # final 1x1 projection.  Channel widths: 8 -> 16 -> 32 -> 64 -> 64 -> 4.
    INP_CH, NUM_LAYERS, BASE_W, Z_CH, MAX_W = 4, 5, 8, 4, 64
    params = init_encoder_params(k_params, INP_CH, num_layers=NUM_LAYERS,
                                 base_width=BASE_W, z_ch=Z_CH, max_width=MAX_W,
                                 group_norm=True)
    prepped, head = prepare_pallas_params(params, num_groups=32, eps=1e-6)

    # NCHW input (PyTorch convention). 48x48 so every VALID conv stays >= 1.
    x = jax.random.normal(k_x, (2, INP_CH, 48, 48), jnp.float32)

    out = jax.block_until_ready(encoder_forward_pallas(x, prepped, head))
    ref = jax.block_until_ready(encoder_reference(x, params, num_groups=32,
                                                  eps=1e-6))
    assert out.shape == ref.shape, (out.shape, ref.shape)
    # bf16 operands + bf16 inter-layer activations -> allow bf16-level error.
    max_err = float(jnp.max(jnp.abs(out - ref)))
    if max_err > 1e-1:
        raise AssertionError(f"mismatch vs reference, max abs err = {max_err}")

    print("KERNEL_OK")
</pallas_src>

<mosaic_0001>
module attributes {stable_mosaic.version = 11 : i64} {
  func.func @_conv_slab_kernel(%arg0: i32, %arg1: memref<1x576x16xbf16, #tpu.memory_space<vmem>>, %arg2: memref<4x16x128xbf16, #tpu.memory_space<vmem>>, %arg3: memref<1x128xf32, #tpu.memory_space<vmem>>, %arg4: memref<1x23x23x128xbf16, #tpu.memory_space<vmem>>, %arg5: memref<551x128xf32, #tpu.memory_space<vmem>>) attributes {dimension_semantics = [#tpu.dimension_semantics<parallel>], iteration_bounds = array<i64: 2>, scalar_prefetch = 0 : i64, scratch_operands = 1 : i64, tpu.core_type = #tpu.core_type<tc>, window_params = [{transform_indices = @transform_0, window_bounds = array<i64: 1, 576, 16>}, {pipeline_mode = #tpu.pipeline_mode<synchronous>, transform_indices = @transform_1, window_bounds = array<i64: 4, 16, 128>}, {pipeline_mode = #tpu.pipeline_mode<synchronous>, transform_indices = @transform_2, window_bounds = array<i64: 1, 128>}, {transform_indices = @transform_3, window_bounds = array<i64: 1, 23, 23, 128>}]} {
    %c0 = arith.constant 0 : index
    %c0_0 = arith.constant 0 : index
    %c0_1 = arith.constant 0 : index
    %0 = vector.load %arg1[%c0, %c0_0, %c0_1] : memref<1x576x16xbf16, #tpu.memory_space<vmem>>, vector<1x551x16xbf16>
    %1 = vector.shape_cast %0 : vector<1x551x16xbf16> to vector<551x16xbf16>
    %c0_2 = arith.constant 0 : index
    %c0_3 = arith.constant 0 : index
    %c0_4 = arith.constant 0 : index
    %2 = vector.load %arg2[%c0_2, %c0_3, %c0_4] : memref<4x16x128xbf16, #tpu.memory_space<vmem>>, vector<1x16x128xbf16>
    %3 = vector.shape_cast %2 : vector<1x16x128xbf16> to vector<16x128xbf16>
    %cst = arith.constant dense<0.000000e+00> : vector<551x128xf32>
    %4 = tpu.matmul %1, %3, %cst {dimension_numbers = #tpu.dot_dimension_numbers<[1], [0], [0], [1], [0, 0, 1, 1], [], []>} : vector<551x16xbf16>, vector<16x128xbf16>, vector<551x128xf32> -> vector<551x128xf32>
    %c0_5 = arith.constant 0 : index
    %c0_6 = arith.constant 0 : index
    %5 = vector.load %arg5[%c0_5, %c0_6] : memref<551x128xf32, #tpu.memory_space<vmem>>, vector<551x128xf32>
    tpu.vector_store %arg5[%c0_5, %c0_6], %4 {strides = array<i32>} : memref<551x128xf32, #tpu.memory_space<vmem>>, vector<551x128xf32>,
    %c0_7 = arith.constant 0 : index
    %c1 = arith.constant 1 : index
    %c0_8 = arith.constant 0 : index
    %6 = vector.load %arg1[%c0_7, %c1, %c0_8] : memref<1x576x16xbf16, #tpu.memory_space<vmem>>, vector<1x551x16xbf16>
    %7 = vector.shape_cast %6 : vector<1x551x16xbf16> to vector<551x16xbf16>
    %c1_9 = arith.constant 1 : index
    %c0_10 = arith.constant 0 : index
    %c0_11 = arith.constant 0 : index
    %8 = vector.load %arg2[%c1_9, %c0_10, %c0_11] : memref<4x16x128xbf16, #tpu.memory_space<vmem>>, vector<1x16x128xbf16>
    %9 = vector.shape_cast %8 : vector<1x16x128xbf16> to vector<16x128xbf16>
    %cst_12 = arith.constant dense<0.000000e+00> : vector<551x128xf32>
    %10 = tpu.matmul %7, %9, %cst_12 {dimension_numbers = #tpu.dot_dimension_numbers<[1], [0], [0], [1], [0, 0, 1, 1], [], []>} : vector<551x16xbf16>, vector<16x128xbf16>, vector<551x128xf32> -> vector<551x128xf32>
    %c0_13 = arith.constant 0 : index
    %c0_14 = arith.constant 0 : index
    %11 = vector.load %arg5[%c0_13, %c0_14] : memref<551x128xf32, #tpu.memory_space<vmem>>, vector<551x128xf32>
    %12 = arith.addf %11, %10 : vector<551x128xf32>
    %c0_15 = arith.constant 0 : index
    %c0_16 = arith.constant 0 : index
    %13 = vector.load %arg5[%c0_15, %c0_16] : memref<551x128xf32, #tpu.memory_space<vmem>>, vector<551x128xf32>
    tpu.vector_store %arg5[%c0_15, %c0_16], %12 {strides = array<i32>} : memref<551x128xf32, #tpu.memory_space<vmem>>, vector<551x128xf32>,
    %c0_17 = arith.constant 0 : index
    %c24 = arith.constant 24 : index
    %c0_18 = arith.constant 0 : index
    %14 = vector.load %arg1[%c0_17, %c24, %c0_18] : memref<1x576x16xbf16, #tpu.memory_space<vmem>>, vector<1x551x16xbf16>
    %15 = vector.shape_cast %14 : vector<1x551x16xbf16> to vector<551x16xbf16>
    %c2 = arith.constant 2 : index
    %c0_19 = arith.constant 0 : index
    %c0_20 = arith.constant 0 : index
    %16 = vector.load %arg2[%c2, %c0_19, %c0_20] : memref<4x16x128xbf16, #tpu.memory_space<vmem>>, vector<1x16x128xbf16>
    %17 = vector.shape_cast %16 : vector<1x16x128xbf16> to vector<16x128xbf16>
    %cst_21 = arith.constant dense<0.000000e+00> : vector<551x128xf32>
    %18 = tpu.matmul %15, %17, %cst_21 {dimension_numbers = #tpu.dot_dimension_numbers<[1], [0], [0], [1], [0, 0, 1, 1], [], []>} : vector<551x16xbf16>, vector<16x128xbf16>, vector<551x128xf32> -> vector<551x128xf32>
    %c0_22 = arith.constant 0 : index
    %c0_23 = arith.constant 0 : index
    %19 = vector.load %arg5[%c0_22, %c0_23] : memref<551x128xf32, #tpu.memory_space<vmem>>, vector<551x128xf32>
    %20 = arith.addf %19, %18 : vector<551x128xf32>
    %c0_24 = arith.constant 0 : index
    %c0_25 = arith.constant 0 : index
    %21 = vector.load %arg5[%c0_24, %c0_25] : memref<551x128xf32, #tpu.memory_space<vmem>>, vector<551x128xf32>
    tpu.vector_store %arg5[%c0_24, %c0_25], %20 {strides = array<i32>} : memref<551x128xf32, #tpu.memory_space<vmem>>, vector<551x128xf32>,
    %c0_26 = arith.constant 0 : index
    %c25 = arith.constant 25 : index
    %c0_27 = arith.constant 0 : index
    %22 = vector.load %arg1[%c0_26, %c25, %c0_27] : memref<1x576x16xbf16, #tpu.memory_space<vmem>>, vector<1x551x16xbf16>
    %23 = vector.shape_cast %22 : vector<1x551x16xbf16> to vector<551x16xbf16>
    %c3 = arith.constant 3 : index
    %c0_28 = arith.constant 0 : index
    %c0_29 = arith.constant 0 : index
    %24 = vector.load %arg2[%c3, %c0_28, %c0_29] : memref<4x16x128xbf16, #tpu.memory_space<vmem>>, vector<1x16x128xbf16>
    %25 = vector.shape_cast %24 : vector<1x16x128xbf16> to vector<16x128xbf16>
    %cst_30 = arith.constant dense<0.000000e+00> : vector<551x128xf32>
    %26 = tpu.matmul %23, %25, %cst_30 {dimension_numbers = #tpu.dot_dimension_numbers<[1], [0], [0], [1], [0, 0, 1, 1], [], []>} : vector<551x16xbf16>, vector<16x128xbf16>, vector<551x128xf32> -> vector<551x128xf32>
    %c0_31 = arith.constant 0 : index
    %c0_32 = arith.constant 0 : index
    %27 = vector.load %arg5[%c0_31, %c0_32] : memref<551x128xf32, #tpu.memory_space<vmem>>, vector<551x128xf32>
    %28 = arith.addf %27, %26 : vector<551x128xf32>
    %c0_33 = arith.constant 0 : index
    %c0_34 = arith.constant 0 : index
    %29 = vector.load %arg5[%c0_33, %c0_34] : memref<551x128xf32, #tpu.memory_space<vmem>>, vector<551x128xf32>
    tpu.vector_store %arg5[%c0_33, %c0_34], %28 {strides = array<i32>} : memref<551x128xf32, #tpu.memory_space<vmem>>, vector<551x128xf32>,
    %c0_35 = arith.constant 0 : index
    %c0_36 = arith.constant 0 : index
    %30 = vector.load %arg5[%c0_35, %c0_36] : memref<551x128xf32, #tpu.memory_space<vmem>>, vector<551x128xf32>
    %c0_37 = arith.constant 0 : index
    %c0_38 = arith.constant 0 : index
    %31 = vector.load %arg3[%c0_37, %c0_38] : memref<1x128xf32, #tpu.memory_space<vmem>>, vector<1x128xf32>
    %32 = vector.broadcast %31 : vector<1x128xf32> to vector<551x128xf32>
    %33 = arith.addf %30, %32 : vector<551x128xf32>
    %34 = arith.negf %33 : vector<551x128xf32>
    %35 = math.exp %34 : vector<551x128xf32>
    %cst_39 = arith.constant 1.000000e+00 : f32
    %36 = vector.broadcast %cst_39 : f32 to vector<551x128xf32>
    %37 = arith.addf %36, %35 : vector<551x128xf32>
    %38 = arith.divf %36, %37 : vector<551x128xf32>
    %39 = arith.mulf %33, %38 : vector<551x128xf32>
    %40 = arith.truncf %39 : vector<551x128xf32> to vector<551x128xbf16>
    %41 = vector.extract_strided_slice %40 {offsets = [0, 0], sizes = [23, 128], strides = [1, 1]} : vector<551x128xbf16> to vector<23x128xbf16>
    %c0_40 = arith.constant 0 : index
    %c0_41 = arith.constant 0 : index
    %c0_42 = arith.constant 0 : index
    %c0_43 = arith.constant 0 : index
    %42 = vector.load %arg4[%c0_40, %c0_41, %c0_42, %c0_43] : memref<1x23x23x128xbf16, #tpu.memory_space<vmem>>, vector<1x1x23x128xbf16>
    %43 = vector.shape_cast %42 : vector<1x1x23x128xbf16> to vector<23x128xbf16>
    %44 = vector.shape_cast %41 : vector<23x128xbf16> to vector<1x1x23x128xbf16>
    tpu.vector_store %arg4[%c0_40, %c0_41, %c0_42, %c0_43], %44 {strides = array<i32>} : memref<1x23x23x128xbf16, #tpu.memory_space<vmem>>, vector<1x1x23x128xbf16>,
    %45 = vector.extract_strided_slice %40 {offsets = [24, 0], sizes = [23, 128], strides = [1, 1]} : vector<551x128xbf16> to vector<23x128xbf16>
    %c0_44 = arith.constant 0 : index
    %c1_45 = arith.constant 1 : index
    %c0_46 = arith.constant 0 : index
    %c0_47 = arith.constant 0 : index
    %46 = vector.load %arg4[%c0_44, %c1_45, %c0_46, %c0_47] : memref<1x23x23x128xbf16, #tpu.memory_space<vmem>>, vector<1x1x23x128xbf16>
    %47 = vector.shape_cast %46 : vector<1x1x23x128xbf16> to vector<23x128xbf16>
    %48 = vector.shape_cast %45 : vector<23x128xbf16> to vector<1x1x23x128xbf16>
    tpu.vector_store %arg4[%c0_44, %c1_45, %c0_46, %c0_47], %48 {strides = array<i32>} : memref<1x23x23x128xbf16, #tpu.memory_space<vmem>>, vector<1x1x23x128xbf16>,
    %49 = vector.extract_strided_slice %40 {offsets = [48, 0], sizes = [23, 128], strides = [1, 1]} : vector<551x128xbf16> to vector<23x128xbf16>
    %c0_48 = arith.constant 0 : index
    %c2_49 = arith.constant 2 : index
    %c0_50 = arith.constant 0 : index
    %c0_51 = arith.constant 0 : index
    %50 = vector.load %arg4[%c0_48, %c2_49, %c0_50, %c0_51] : memref<1x23x23x128xbf16, #tpu.memory_space<vmem>>, vector<1x1x23x128xbf16>
    %51 = vector.shape_cast %50 : vector<1x1x23x128xbf16> to vector<23x128xbf16>
    %52 = vector.shape_cast %49 : vector<23x128xbf16> to vector<1x1x23x128xbf16>
    tpu.vector_store %arg4[%c0_48, %c2_49, %c0_50, %c0_51], %52 {strides = array<i32>} : memref<1x23x23x128xbf16, #tpu.memory_space<vmem>>, vector<1x1x23x128xbf16>,
    %53 = vector.extract_strided_slice %40 {offsets = [72, 0], sizes = [23, 128], strides = [1, 1]} : vector<551x128xbf16> to vector<23x128xbf16>
    %c0_52 = arith.constant 0 : index
    %c3_53 = arith.constant 3 : index
    %c0_54 = arith.constant 0 : index
    %c0_55 = arith.constant 0 : index
    %54 = vector.load %arg4[%c0_52, %c3_53, %c0_54, %c0_55] : memref<1x23x23x128xbf16, #tpu.memory_space<vmem>>, vector<1x1x23x128xbf16>
    %55 = vector.shape_cast %54 : vector<1x1x23x128xbf16> to vector<23x128xbf16>
    %56 = vector.shape_cast %53 : vector<23x128xbf16> to vector<1x1x23x128xbf16>
    tpu.vector_store %arg4[%c0_52, %c3_53, %c0_54, %c0_55], %56 {strides = array<i32>} : memref<1x23x23x128xbf16, #tpu.memory_space<vmem>>, vector<1x1x23x128xbf16>,
    %57 = vector.extract_strided_slice %40 {offsets = [96, 0], sizes = [23, 128], strides = [1, 1]} : vector<551x128xbf16> to vector<23x128xbf16>
    %c0_56 = arith.constant 0 : index
    %c4 = arith.constant 4 : index
    %c0_57 = arith.constant 0 : index
    %c0_58 = arith.constant 0 : index
    %58 = vector.load %arg4[%c0_56, %c4, %c0_57, %c0_58] : memref<1x23x23x128xbf16, #tpu.memory_space<vmem>>, vector<1x1x23x128xbf16>
    %59 = vector.shape_cast %58 : vector<1x1x23x128xbf16> to vector<23x128xbf16>
    %60 = vector.shape_cast %57 : vector<23x128xbf16> to vector<1x1x23x128xbf16>
    tpu.vector_store %arg4[%c0_56, %c4, %c0_57, %c0_58], %60 {strides = array<i32>} : memref<1x23x23x128xbf16, #tpu.memory_space<vmem>>, vector<1x1x23x128xbf16>,
    %61 = vector.extract_strided_slice %40 {offsets = [120, 0], sizes = [23, 128], strides = [1, 1]} : vector<551x128xbf16> to vector<23x128xbf16>
    %c0_59 = arith.constant 0 : index
    %c5 = arith.constant 5 : index
    %c0_60 = arith.constant 0 : index
    %c0_61 = arith.constant 0 : index
    %62 = vector.load %arg4[%c0_59, %c5, %c0_60, %c0_61] : memref<1x23x23x128xbf16, #tpu.memory_space<vmem>>, vector<1x1x23x128xbf16>
    %63 = vector.shape_cast %62 : vector<1x1x23x128xbf16> to vector<23x128xbf16>
    %64 = vector.shape_cast %61 : vector<23x128xbf16> to vector<1x1x23x128xbf16>
    tpu.vector_store %arg4[%c0_59, %c5, %c0_60, %c0_61], %64 {strides = array<i32>} : memref<1x23x23x128xbf16, #tpu.memory_space<vmem>>, vector<1x1x23x128xbf16>,
    %65 = vector.extract_strided_slice %40 {offsets = [144, 0], sizes = [23, 128], strides = [1, 1]} : vector<551x128xbf16> to vector<23x128xbf16>
    %c0_62 = arith.constant 0 : index
    %c6 = arith.constant 6 : index
    %c0_63 = arith.constant 0 : index
    %c0_64 = arith.constant 0 : index
    %66 = vector.load %arg4[%c0_62, %c6, %c0_63, %c0_64] : memref<1x23x23x128xbf16, #tpu.memory_space<vmem>>, vector<1x1x23x128xbf16>
    %67 = vector.shape_cast %66 : vector<1x1x23x128xbf16> to vector<23x128xbf16>
    %68 = vector.shape_cast %65 : vector<23x128xbf16> to vector<1x1x23x128xbf16>
    tpu.vector_store %arg4[%c0_62, %c6, %c0_63, %c0_64], %68 {strides = array<i32>} : memref<1x23x23x128xbf16, #tpu.memory_space<vmem>>, vector<1x1x23x128xbf16>,
    %69 = vector.extract_strided_slice %40 {offsets = [168, 0], sizes = [23, 128], strides = [1, 1]} : vector<551x128xbf16> to vector<23x128xbf16>
    %c0_65 = arith.constant 0 : index
    %c7 = arith.constant 7 : index
    %c0_66 = arith.constant 0 : index
    %c0_67 = arith.constant 0 : index
    %70 = vector.load %arg4[%c0_65, %c7, %c0_66, %c0_67] : memref<1x23x23x128xbf16, #tpu.memory_space<vmem>>, vector<1x1x23x128xbf16>
    %71 = vector.shape_cast %70 : vector<1x1x23x128xbf16> to vector<23x128xbf16>
    %72 = vector.shape_cast %69 : vector<23x128xbf16> to vector<1x1x23x128xbf16>
    tpu.vector_store %arg4[%c0_65, %c7, %c0_66, %c0_67], %72 {strides = array<i32>} : memref<1x23x23x128xbf16, #tpu.memory_space<vmem>>, vector<1x1x23x128xbf16>,
    %73 = vector.extract_strided_slice %40 {offsets = [192, 0], sizes = [23, 128], strides = [1, 1]} : vector<551x128xbf16> to vector<23x128xbf16>
    %c0_68 = arith.constant 0 : index
    %c8 = arith.constant 8 : index
    %c0_69 = arith.constant 0 : index
    %c0_70 = arith.constant 0 : index
    %74 = vector.load %arg4[%c0_68, %c8, %c0_69, %c0_70] : memref<1x23x23x128xbf16, #tpu.memory_space<vmem>>, vector<1x1x23x128xbf16>
    %75 = vector.shape_cast %74 : vector<1x1x23x128xbf16> to vector<23x128xbf16>
    %76 = vector.shape_cast %73 : vector<23x128xbf16> to vector<1x1x23x128xbf16>
    tpu.vector_store %arg4[%c0_68, %c8, %c0_69, %c0_70], %76 {strides = array<i32>} : memref<1x23x23x128xbf16, #tpu.memory_space<vmem>>, vector<1x1x23x128xbf16>,
    %77 = vector.extract_strided_slice %40 {offsets = [216, 0], sizes = [23, 128], strides = [1, 1]} : vector<551x128xbf16> to vector<23x128xbf16>
    %c0_71 = arith.constant 0 : index
    %c9 = arith.constant 9 : index
    %c0_72 = arith.constant 0 : index
    %c0_73 = arith.constant 0 : index
    %78 = vector.load %arg4[%c0_71, %c9, %c0_72, %c0_73] : memref<1x23x23x128xbf16, #tpu.memory_space<vmem>>, vector<1x1x23x128xbf16>
    %79 = vector.shape_cast %78 : vector<1x1x23x128xbf16> to vector<23x128xbf16>
    %80 = vector.shape_cast %77 : vector<23x128xbf16> to vector<1x1x23x128xbf16>
    tpu.vector_store %arg4[%c0_71, %c9, %c0_72, %c0_73], %80 {strides = array<i32>} : memref<1x23x23x128xbf16, #tpu.memory_space<vmem>>, vector<1x1x23x128xbf16>,
    %81 = vector.extract_strided_slice %40 {offsets = [240, 0], sizes = [23, 128], strides = [1, 1]} : vector<551x128xbf16> to vector<23x128xbf16>
    %c0_74 = arith.constant 0 : index
    %c10 = arith.constant 10 : index
    %c0_75 = arith.constant 0 : index
    %c0_76 = arith.constant 0 : index
    %82 = vector.load %arg4[%c0_74, %c10, %c0_75, %c0_76] : memref<1x23x23x128xbf16, #tpu.memory_space<vmem>>, vector<1x1x23x128xbf16>
    %83 = vector.shape_cast %82 : vector<1x1x23x128xbf16> to vector<23x128xbf16>
    %84 = vector.shape_cast %81 : vector<23x128xbf16> to vector<1x1x23x128xbf16>
    tpu.vector_store %arg4[%c0_74, %c10, %c0_75, %c0_76], %84 {strides = array<i32>} : memref<1x23x23x128xbf16, #tpu.memory_space<vmem>>, vector<1x1x23x128xbf16>,
    %85 = vector.extract_strided_slice %40 {offsets = [264, 0], sizes = [23, 128], strides = [1, 1]} : vector<551x128xbf16> to vector<23x128xbf16>
    %c0_77 = arith.constant 0 : index
    %c11 = arith.constant 11 : index
    %c0_78 = arith.constant 0 : index
    %c0_79 = arith.constant 0 : index
    %86 = vector.load %arg4[%c0_77, %c11, %c0_78, %c0_79] : memref<1x23x23x128xbf16, #tpu.memory_space<vmem>>, vector<1x1x23x128xbf16>
    %87 = vector.shape_cast %86 : vector<1x1x23x128xbf16> to vector<23x128xbf16>
    %88 = vector.shape_cast %85 : vector<23x128xbf16> to vector<1x1x23x128xbf16>
    tpu.vector_store %arg4[%c0_77, %c11, %c0_78, %c0_79], %88 {strides = array<i32>} : memref<1x23x23x128xbf16, #tpu.memory_space<vmem>>, vector<1x1x23x128xbf16>,
    %89 = vector.extract_strided_slice %40 {offsets = [288, 0], sizes = [23, 128], strides = [1, 1]} : vector<551x128xbf16> to vector<23x128xbf16>
    %c0_80 = arith.constant 0 : index
    %c12 = arith.constant 12 : index
    %c0_81 = arith.constant 0 : index
    %c0_82 = arith.constant 0 : index
    %90 = vector.load %arg4[%c0_80, %c12, %c0_81, %c0_82] : memref<1x23x23x128xbf16, #tpu.memory_space<vmem>>, vector<1x1x23x128xbf16>
    %91 = vector.shape_cast %90 : vector<1x1x23x128xbf16> to vector<23x128xbf16>
    %92 = vector.shape_cast %89 : vector<23x128xbf16> to vector<1x1x23x128xbf16>
    tpu.vector_store %arg4[%c0_80, %c12, %c0_81, %c0_82], %92 {strides = array<i32>} : memref<1x23x23x128xbf16, #tpu.memory_space<vmem>>, vector<1x1x23x128xbf16>,
    %93 = vector.extract_strided_slice %40 {offsets = [312, 0], sizes = [23, 128], strides = [1, 1]} : vector<551x128xbf16> to vector<23x128xbf16>
    %c0_83 = arith.constant 0 : index
    %c13 = arith.constant 13 : index
    %c0_84 = arith.constant 0 : index
    %c0_85 = arith.constant 0 : index
    %94 = vector.load %arg4[%c0_83, %c13, %c0_84, %c0_85] : memref<1x23x23x128xbf16, #tpu.memory_space<vmem>>, vector<1x1x23x128xbf16>
    %95 = vector.shape_cast %94 : vector<1x1x23x128xbf16> to vector<23x128xbf16>
    %96 = vector.shape_cast %93 : vector<23x128xbf16> to vector<1x1x23x128xbf16>
    tpu.vector_store %arg4[%c0_83, %c13, %c0_84, %c0_85], %96 {strides = array<i32>} : memref<1x23x23x128xbf16, #tpu.memory_space<vmem>>, vector<1x1x23x128xbf16>,
    %97 = vector.extract_strided_slice %40 {offsets = [336, 0], sizes = [23, 128], strides = [1, 1]} : vector<551x128xbf16> to vector<23x128xbf16>
    %c0_86 = arith.constant 0 : index
    %c14 = arith.constant 14 : index
    %c0_87 = arith.constant 0 : index
    %c0_88 = arith.constant 0 : index
    %98 = vector.load %arg4[%c0_86, %c14, %c0_87, %c0_88] : memref<1x23x23x128xbf16, #tpu.memory_space<vmem>>, vector<1x1x23x128xbf16>
    %99 = vector.shape_cast %98 : vector<1x1x23x128xbf16> to vector<23x128xbf16>
    %100 = vector.shape_cast %97 : vector<23x128xbf16> to vector<1x1x23x128xbf16>
    tpu.vector_store %arg4[%c0_86, %c14, %c0_87, %c0_88], %100 {strides = array<i32>} : memref<1x23x23x128xbf16, #tpu.memory_space<vmem>>, vector<1x1x23x128xbf16>,
    %101 = vector.extract_strided_slice %40 {offsets = [360, 0], sizes = [23, 128], strides = [1, 1]} : vector<551x128xbf16> to vector<23x128xbf16>
    %c0_89 = arith.constant 0 : index
    %c15 = arith.constant 15 : index
    %c0_90 = arith.constant 0 : index
    %c0_91 = arith.constant 0 : index
    %102 = vector.load %arg4[%c0_89, %c15, %c0_90, %c0_91] : memref<1x23x23x128xbf16, #tpu.memory_space<vmem>>, vector<1x1x23x128xbf16>
    %103 = vector.shape_cast %102 : vector<1x1x23x128xbf16> to vector<23x128xbf16>
    %104 = vector.shape_cast %101 : vector<23x128xbf16> to vector<1x1x23x128xbf16>
    tpu.vector_store %arg4[%c0_89, %c15, %c0_90, %c0_91], %104 {strides = array<i32>} : memref<1x23x23x128xbf16, #tpu.memory_space<vmem>>, vector<1x1x23x128xbf16>,
    %105 = vector.extract_strided_slice %40 {offsets = [384, 0], sizes = [23, 128], strides = [1, 1]} : vector<551x128xbf16> to vector<23x128xbf16>
    %c0_92 = arith.constant 0 : index
    %c16 = arith.constant 16 : index
    %c0_93 = arith.constant 0 : index
    %c0_94 = arith.constant 0 : index
    %106 = vector.load %arg4[%c0_92, %c16, %c0_93, %c0_94] : memref<1x23x23x128xbf16, #tpu.memory_space<vmem>>, vector<1x1x23x128xbf16>
    %107 = vector.shape_cast %106 : vector<1x1x23x128xbf16> to vector<23x128xbf16>
    %108 = vector.shape_cast %105 : vector<23x128xbf16> to vector<1x1x23x128xbf16>
    tpu.vector_store %arg4[%c0_92, %c16, %c0_93, %c0_94], %108 {strides = array<i32>} : memref<1x23x23x128xbf16, #tpu.memory_space<vmem>>, vector<1x1x23x128xbf16>,
    %109 = vector.extract_strided_slice %40 {offsets = [408, 0], sizes = [23, 128], strides = [1, 1]} : vector<551x128xbf16> to vector<23x128xbf16>
    %c0_95 = arith.constant 0 : index
    %c17 = arith.constant 17 : index
    %c0_96 = arith.constant 0 : index
    %c0_97 = arith.constant 0 : index
    %110 = vector.load %arg4[%c0_95, %c17, %c0_96, %c0_97] : memref<1x23x23x128xbf16, #tpu.memory_space<vmem>>, vector<1x1x23x128xbf16>
    %111 = vector.shape_cast %110 : vector<1x1x23x128xbf16> to vector<23x128xbf16>
    %112 = vector.shape_cast %109 : vector<23x128xbf16> to vector<1x1x23x128xbf16>
    tpu.vector_store %arg4[%c0_95, %c17, %c0_96, %c0_97], %112 {strides = array<i32>} : memref<1x23x23x128xbf16, #tpu.memory_space<vmem>>, vector<1x1x23x128xbf16>,
    %113 = vector.extract_strided_slice %40 {offsets = [432, 0], sizes = [23, 128], strides = [1, 1]} : vector<551x128xbf16> to vector<23x128xbf16>
    %c0_98 = arith.constant 0 : index
    %c18 = arith.constant 18 : index
    %c0_99 = arith.constant 0 : index
    %c0_100 = arith.constant 0 : index
    %114 = vector.load %arg4[%c0_98, %c18, %c0_99, %c0_100] : memref<1x23x23x128xbf16, #tpu.memory_space<vmem>>, vector<1x1x23x128xbf16>
    %115 = vector.shape_cast %114 : vector<1x1x23x128xbf16> to vector<23x128xbf16>
    %116 = vector.shape_cast %113 : vector<23x128xbf16> to vector<1x1x23x128xbf16>
    tpu.vector_store %arg4[%c0_98, %c18, %c0_99, %c0_100], %116 {strides = array<i32>} : memref<1x23x23x128xbf16, #tpu.memory_space<vmem>>, vector<1x1x23x128xbf16>,
    %117 = vector.extract_strided_slice %40 {offsets = [456, 0], sizes = [23, 128], strides = [1, 1]} : vector<551x128xbf16> to vector<23x128xbf16>
    %c0_101 = arith.constant 0 : index
    %c19 = arith.constant 19 : index
    %c0_102 = arith.constant 0 : index
    %c0_103 = arith.constant 0 : index
    %118 = vector.load %arg4[%c0_101, %c19, %c0_102, %c0_103] : memref<1x23x23x128xbf16, #tpu.memory_space<vmem>>, vector<1x1x23x128xbf16>
    %119 = vector.shape_cast %118 : vector<1x1x23x128xbf16> to vector<23x128xbf16>
    %120 = vector.shape_cast %117 : vector<23x128xbf16> to vector<1x1x23x128xbf16>
    tpu.vector_store %arg4[%c0_101, %c19, %c0_102, %c0_103], %120 {strides = array<i32>} : memref<1x23x23x128xbf16, #tpu.memory_space<vmem>>, vector<1x1x23x128xbf16>,
    %121 = vector.extract_strided_slice %40 {offsets = [480, 0], sizes = [23, 128], strides = [1, 1]} : vector<551x128xbf16> to vector<23x128xbf16>
    %c0_104 = arith.constant 0 : index
    %c20 = arith.constant 20 : index
    %c0_105 = arith.constant 0 : index
    %c0_106 = arith.constant 0 : index
    %122 = vector.load %arg4[%c0_104, %c20, %c0_105, %c0_106] : memref<1x23x23x128xbf16, #tpu.memory_space<vmem>>, vector<1x1x23x128xbf16>
    %123 = vector.shape_cast %122 : vector<1x1x23x128xbf16> to vector<23x128xbf16>
    %124 = vector.shape_cast %121 : vector<23x128xbf16> to vector<1x1x23x128xbf16>
    tpu.vector_store %arg4[%c0_104, %c20, %c0_105, %c0_106], %124 {strides = array<i32>} : memref<1x23x23x128xbf16, #tpu.memory_space<vmem>>, vector<1x1x23x128xbf16>,
    %125 = vector.extract_strided_slice %40 {offsets = [504, 0], sizes = [23, 128], strides = [1, 1]} : vector<551x128xbf16> to vector<23x128xbf16>
    %c0_107 = arith.constant 0 : index
    %c21 = arith.constant 21 : index
    %c0_108 = arith.constant 0 : index
    %c0_109 = arith.constant 0 : index
    %126 = vector.load %arg4[%c0_107, %c21, %c0_108, %c0_109] : memref<1x23x23x128xbf16, #tpu.memory_space<vmem>>, vector<1x1x23x128xbf16>
    %127 = vector.shape_cast %126 : vector<1x1x23x128xbf16> to vector<23x128xbf16>
    %128 = vector.shape_cast %125 : vector<23x128xbf16> to vector<1x1x23x128xbf16>
    tpu.vector_store %arg4[%c0_107, %c21, %c0_108, %c0_109], %128 {strides = array<i32>} : memref<1x23x23x128xbf16, #tpu.memory_space<vmem>>, vector<1x1x23x128xbf16>,
    %129 = vector.extract_strided_slice %40 {offsets = [528, 0], sizes = [23, 128], strides = [1, 1]} : vector<551x128xbf16> to vector<23x128xbf16>
    %c0_110 = arith.constant 0 : index
    %c22 = arith.constant 22 : index
    %c0_111 = arith.constant 0 : index
    %c0_112 = arith.constant 0 : index
    %130 = vector.load %arg4[%c0_110, %c22, %c0_111, %c0_112] : memref<1x23x23x128xbf16, #tpu.memory_space<vmem>>, vector<1x1x23x128xbf16>
    %131 = vector.shape_cast %130 : vector<1x1x23x128xbf16> to vector<23x128xbf16>
    %132 = vector.shape_cast %129 : vector<23x128xbf16> to vector<1x1x23x128xbf16>
    tpu.vector_store %arg4[%c0_110, %c22, %c0_111, %c0_112], %132 {strides = array<i32>} : memref<1x23x23x128xbf16, #tpu.memory_space<vmem>>, vector<1x1x23x128xbf16>,
    return
  }
  func.func @transform_0(%arg0: i32) -> (i32, i32, i32) {
    %c0_i32 = arith.constant 0 : i32
    %c0_i32_0 = arith.constant 0 : i32
    %c0_i32_1 = arith.constant 0 : i32
    return %arg0, %c0_i32, %c0_i32_0 : i32, i32, i32
  }
  func.func @transform_1(%arg0: i32) -> (i32, i32, i32) {
    %c0_i32 = arith.constant 0 : i32
    %c0_i32_0 = arith.constant 0 : i32
    %c0_i32_1 = arith.constant 0 : i32
    %c0_i32_2 = arith.constant 0 : i32
    return %c0_i32, %c0_i32_0, %c0_i32_1 : i32, i32, i32
  }
  func.func @transform_2(%arg0: i32) -> (i32, i32) {
    %c0_i32 = arith.constant 0 : i32
    %c0_i32_0 = arith.constant 0 : i32
    %c0_i32_1 = arith.constant 0 : i32
    return %c0_i32, %c0_i32_0 : i32, i32
  }
  func.func @transform_3(%arg0: i32) -> (i32, i32, i32, i32) {
    %c0_i32 = arith.constant 0 : i32
    %c0_i32_0 = arith.constant 0 : i32
    %c0_i32_1 = arith.constant 0 : i32
    %c0_i32_2 = arith.constant 0 : i32
    return %arg0, %c0_i32, %c0_i32_0, %c0_i32_1 : i32, i32, i32, i32
  }
}

</mosaic_0001>

<bundles_post_ra>
// kernel: tpu_custom_call.1
= control target key start
LH: loop header
LB: loop body
LE: loop exit
PB: predicated region body
PF: predicated region fallthrough
CT: control target
= control target key end

     0   :  { %s7035_s12 = smov 0   ;;  %s8208_s0 = inlined_call_operand.vmem [shape: bf16[2,576,16], index: 0, kind: input, shape index: {}]   ;;  %s8209_s1 = inlined_call_operand.vmem [shape: bf16[4,16,128], index: 1, kind: input, shape index: {}]   ;;  %s8210_s2 = inlined_call_operand.vmem [shape: f32[1,128], index: 2, kind: input, shape index: {}]   ;;  %s8211_s3 = inlined_call_operand.vmem [shape: bf16[2,23,23,128], index: 3, kind: output, shape index: {}]  }
   0x1 LB: > { %s5193_s13 = sadd.s32 4294967295, %s7011_s12   ;;  %p5197_p0 = scmp.ge.s32.totalorder %s7011_s12, 1  ;;  %s7011_s12 = sphi %s7035_s12, %s13_s12  }
   0x2   : > { %p137_p1 = scmp.lt.s32.totalorder %s7011_s12, 3 }
   0x4   : > { %p138_p2 = pnand %p5197_p0, %p137_p1 }
   0x5   : > { %v6583_v0 = vld [vmem:[%s8209_s1] sm:$0xff] (!%p138_p2)   ;;  %v7013_v1 = vmov (!%p138_p2), 0.0   ;;  %p161_p3 = scmp.lt.s32.totalorder (!%p138_p2), %s5193_s13, 1  ;;  %vm7014_vm0 = vmmov (!%p138_p2), 0   ;;  %v6586_v2 = vld [vmem:[%s8209_s1 + $0x8] sm:$0xff] (!%p138_p2)   ;;  %vm422_vm1 = vcmask (!%p138_p2), 130048  }
   0x6   : > { %141 = sbr.rel (%p138_p2) target bundleno = 836 (0x344), region = 32  ;;  %6003 = vmatprep.subr.bf16.mxu0 (!%p138_p2), %v7013_v1  ;;  %6145 = vmatprep.subr.bf16.mxu1 (!%p138_p2), %v7013_v1  ;;  %v6585_v3 = vld [vmem:[%s8209_s1 + $0x10] sm:$0xff] (!%p138_p2)   ;;  %vm1154_vm2 = vsmask.f32 (!%p138_p2), 7424  ;;  %v6590_v14 = vld [vmem:[%s8209_s1 + $0x18] sm:$0xff] (!%p138_p2)   ;;  %vm4769_vm3 = vcmask (!%p138_p2), 1043456  }
   0x7   : > { %6004 = vmatpush3.bf16.msra.mxu0 (!%p138_p2), %v6583_v0  ;;  %6005 = vmatprep.mubr.msk.bf16.mxu0 (!%p138_p2), %vm7014_vm0, %v7013_v1  ;;  %vm4770_vm4 = vsmask.f32 (!%p138_p2), 3328 }
   0x8   : > { %6287 = vmatprep.subr.bf16.mxu0 (!%p138_p2), %v7013_v1  ;;  %6147 = vmatprep.mubr.msk.bf16.mxu1 (!%p138_p2), %vm7014_vm0, %v7013_v1  ;;  %vm7754_vm5 = vmand (!%p138_p2), %vm4769_vm3, %vm4770_vm4 }
   0x9   : > { %6146 = vmatpush3.bf16.msra.mxu1 (!%p138_p2), %v6586_v2 }
   0xa   : > { %6429 = vmatprep.subr.bf16.mxu1 (!%p138_p2), %v7013_v1 }
   0xd   : > { %s8215_s13 = smov (!%p161_p3, %s5193_s13), 1 }
   0xe   : > { %s6571_s18 = smul.u32 288, %s8215_s13 }
   0xf   : > { %s6572_s28 = smul.u32 276, %s8215_s13 }
  0x10   : > { %s7063_s21 = scalar_lea.vmem %s8208_s0, %s6571_s18 }
  0x11   : > { %v6584_v4 = vld [vmem:[%s7063_s21] sm:$0xff]   ;;  %v6588_v6 = vld [vmem:[%s7063_s21 + $0x8] sm:$0xff]   ;;  %v6591_v10 = vld [vmem:[%s7063_s21 + $0x10] sm:$0xff]   ;;  %s7728_s4 = scalar_lea.vmem %s8211_s3, %s6572_s28 }
  0x12   : > { %6006 = vmatmul.mubr.msk.bf16.vlgmr.msra.gmra.mrb[0].mxu0 %vm422_vm1, %v6584_v4  ;;  %v6587_v5 = vld [vmem:[%s7063_s21] sm:$0xff]   ;;  %v1163_v9 = vshll.u32 %v6588_v6, 16  ;;  %v6589_v13 = vld [vmem:[%s7063_s21 + $0x8] sm:$0xff]   ;;  %v1167_v16 = vshrl.u32 %v6588_v6, 16  ;;  %v1171_v17 = vshll.u32 %v6591_v10, 16  ;;  %v6593_v21 = vld [vmem:[%s7063_s21 + $0x18] sm:$0xff]  }
  0x13   : > { %6288 = vmatpush3.bf16.msra.mxu0 %v6585_v3  ;;  %6009 = vmatprep.mubr.msk.bf16.mxu0 %vm7014_vm0, %v7013_v1  ;;  %v1156_v7 = vshrl.u32 %v6587_v5, 16  ;;  %v1158_v8 = vshll.u32 %v6587_v5, 16  ;;  %v6592_v22 = vld [vmem:[%s7063_s21 + $0x10] sm:$0xff]   ;;  %v1175_v24 = vshrl.u32 %v6591_v10, 16  ;;  %v1179_v25 = vshll.u32 %v6593_v21, 16  ;;  %v6595_v26 = vld [vmem:[%s7063_s21 + $0x20] sm:$0xff]  }
  0x14   : > { %v1165_v12 = vrot.slane %v1163_v9, 1  ;;  %v1173_v20 = vrot.slane %v1171_v17, 1  ;;  %v6594_v29 = vld [vmem:[%s7063_s21 + $0x18] sm:$0xff]   ;;  %v1187_v30 = vshll.u32 %v6595_v26, 16  ;;  %v1183_v32 = vshrl.u32 %v6593_v21, 16  ;;  %v6597_v34 = vld [vmem:[%s7063_s21 + $0x28] sm:$0xff]  }
  0x15   : > { %v1160_v11 = vrot.slane %v1158_v8, 1  ;;  %v1181_v28 = vrot.slane %v1179_v25, 1  ;;  %v6596_v36 = vld [vmem:[%s7063_s21 + $0x20] sm:$0xff]   ;;  %v1191_v38 = vshrl.u32 %v6595_v26, 16  ;;  %v1195_v39 = vshll.u32 %v6597_v34, 16  ;;  %v6599_v42 = vld [vmem:[%s7063_s21 + $0x30] sm:$0xff]  }
  0x16   : > { %v1169_v19 = vor.u32 %v1167_v16, %v1165_v12  ;;  %v1177_v27 = vor.u32 %v1175_v24, %v1173_v20  ;;  %v1189_v33 = vrot.slane %v1187_v30, 1  ;;  %v6598_v43 = vld [vmem:[%s7063_s21 + $0x28] sm:$0xff]   ;;  %v1199_v45 = vshrl.u32 %v6597_v34, 16  ;;  %v6601_v47 = vld [vmem:[%s7063_s21 + $0x38] sm:$0xff]   ;;  %v6600_v50 = vld [vmem:[%s7063_s21 + $0x30] sm:$0xff]  }
  0x17   : > { %v1161_v15 = vor.u32 %v1160_v11, %v1156_v7  ;;  %v1185_v35 = vor.u32 %v1183_v32, %v1181_v28  ;;  %v1197_v41 = vrot.slane %v1195_v39, 1  ;;  %v1203_v46 = vshll.u32 %v6599_v42, 16  ;;  %v6603_v56 = vld [vmem:[%s7063_s21 + $0x40] sm:$0xff]   ;;  %v6602_v57 = vld [vmem:[%s7063_s21 + $0x38] sm:$0xff]   ;;  %v6605_v63 = vld [vmem:[%s7063_s21 + $0x48] sm:$0xff]  }
  0x18   : > { %v1174_v23 = vsel %vm1154_vm2, %v1169_v19, %v1173_v20  ;;  %v1182_v31 = vsel %vm1154_vm2, %v1177_v27, %v1181_v28  ;;  %v1193_v40 = vor.u32 %v1191_v38, %v1189_v33  ;;  %v1207_v51 = vshrl.u32 %v6599_v42, 16  ;;  %v6604_v0 = vld [vmem:[%s7063_s21 + $0x40] sm:$0xff]   ;;  %v6607_v7 = vld [vmem:[%s7063_s21 + $0x50] sm:$0xff]   ;;  %v6606_v8 = vld [vmem:[%s7063_s21 + $0x48] sm:$0xff]  }
  0x19   : > { %v1166_v18 = vsel %vm1154_vm2, %v1161_v15, %v1165_v12  ;;  %v1190_v37 = vsel %vm1154_vm2, %v1185_v35, %v1189_v33  ;;  %v1201_v48 = vor.u32 %v1199_v45, %v1197_v41  ;;  %v1205_v49 = vrot.slane %v1203_v46, 1  ;;  %v6608_v15 = vld [vmem:[%s7063_s21 + $0x50] sm:$0xff]   ;;  %v6611_v21 = vld [vmem:[%s7063_s21 + $0x60] sm:$0xff]   ;;  %v6613_v28 = vld [vmem:[%s7063_s21 + $0x68] sm:$0xff]  }
  0x1a   : > { %6010 = vmatmul.mubr.msk.bf16.gmra.mrb[4].mxu0 %vm422_vm1, %v6589_v13  ;;  %6148 = vmatmul.mubr.msk.bf16.vlgmr.msra.gmra.mrb[0].mxu1 %vm422_vm1, %v1166_v18  ;;  %v1198_v44 = vsel %vm1154_vm2, %v1193_v40, %v1197_v41  ;;  %v1211_v52 = vshll.u32 %v6601_v47, 16  ;;  %v1215_v59 = vshrl.u32 %v6601_v47, 16  ;;  %v1219_v60 = vshll.u32 %v6603_v56, 16  ;;  %v6615_v35 = vld [vmem:[%s7063_s21 + $0x70] sm:$0xff]   ;;  %v6617_v42 = vld [vmem:[%s7063_s21 + $0x78] sm:$0xff]  }
  0x1b   : > { %6013 = vmatprep.mubr.msk.bf16.mxu0 %vm7014_vm0, %v7013_v1  ;;  %6430 = vmatpush3.bf16.msra.mxu1 %v6590_v14  ;;  %v1206_v53 = vsel %vm1154_vm2, %v1201_v48, %v1205_v49  ;;  %v1209_v54 = vor.u32 %v1207_v51, %v1205_v49  ;;  %v1223_v3 = vshrl.u32 %v6603_v56, 16  ;;  %v1227_v4 = vshll.u32 %v6605_v63, 16  ;;  %v6609_v14 = vld [vmem:[%s7063_s21 + $0x58] sm:$0xff]   ;;  %v6619_v49 = vld [vmem:[%s7063_s21 + $0x80] sm:$0xff]   ;;  %v6621_v56 = vld [vmem:[%s7063_s21 + $0x88] sm:$0xff]  }
  0x1c   : > { %6151 = vmatprep.mubr.msk.bf16.mxu1 %vm7014_vm0, %v7013_v1  ;;  %v1213_v55 = vrot.slane %v1211_v52, 1  ;;  %v1221_v62 = vrot.slane %v1219_v60, 1  ;;  %v1231_v10 = vshrl.u32 %v6605_v63, 16  ;;  %v1235_v11 = vshll.u32 %v6607_v7, 16  ;;  %v6623_v63 = vld [vmem:[%s7063_s21 + $0x90] sm:$0xff]  }
  0x1d   : > { %v1229_v6 = vrot.slane %v1227_v4, 1  ;;  %v1239_v17 = vshrl.u32 %v6607_v7, 16  ;;  %v1243_v18 = vshll.u32 %v6609_v14, 16  ;;  %v1247_v24 = vshrl.u32 %v6609_v14, 16  ;;  %v6625_v7 = vld [vmem:[%s7063_s21 + $0x98] sm:$0xff]   ;;  %v6627_v14 = vld [vmem:[%s7063_s21 + $0xa0] sm:$0xff]  }
  0x1e   : > { %v1214_v58 = vsel %vm1154_vm2, %v1209_v54, %v1213_v55  ;;  %v1217_v61 = vor.u32 %v1215_v59, %v1213_v55  ;;  %v1225_v5 = vor.u32 %v1223_v3, %v1221_v62  ;;  %v1237_v13 = vrot.slane %v1235_v11, 1 }
  0x1f   : > { %v1233_v12 = vor.u32 %v1231_v10, %v1229_v6  ;;  %v1245_v20 = vrot.slane %v1243_v18, 1  ;;  %v1251_v25 = vshll.u32 %v6611_v21, 16  ;;  %v1259_v32 = vshll.u32 %v6613_v28, 16 }
  0x20   : > { %v1222_v2 = vsel %vm1154_vm2, %v1217_v61, %v1221_v62  ;;  %v1230_v9 = vsel %vm1154_vm2, %v1225_v5, %v1229_v6  ;;  %v1241_v19 = vor.u32 %v1239_v17, %v1237_v13  ;;  %v1263_v38 = vshrl.u32 %v6613_v28, 16  ;;  %v6631_v28 = vld [vmem:[%s7063_s21 + $0xb0] sm:$0xff]  }
  0x21   : > { %v1238_v16 = vsel %vm1154_vm2, %v1233_v12, %v1237_v13  ;;  %v1249_v26 = vor.u32 %v1247_v24, %v1245_v20  ;;  %v1253_v27 = vrot.slane %v1251_v25, 1  ;;  %v1261_v34 = vrot.slane %v1259_v32, 1 }
  0x22   : > { %6014 = vmatmul.mubr.msk.bf16.gmra.mrb[8].mxu0 %vm422_vm1, %v6592_v22  ;;  %6152 = vmatmul.mubr.msk.bf16.gmra.mrb[4].mxu1 %vm422_vm1, %v1174_v23  ;;  %v6610_v22 = vld [vmem:[%s7063_s21 + $0x58] sm:$0xff]   ;;  %v1246_v23 = vsel %vm1154_vm2, %v1241_v19, %v1245_v20  ;;  %v1267_v39 = vshll.u32 %v6615_v35, 16  ;;  %v1271_v45 = vshrl.u32 %v6615_v35, 16  ;;  %v1275_v46 = vshll.u32 %v6617_v42, 16 }
  0x23   : > { %6017 = vmatprep.mubr.msk.bf16.mxu0 %vm7014_vm0, %v7013_v1  ;;  %6155 = vmatprep.mubr.msk.bf16.mxu1 %vm7014_vm0, %v7013_v1  ;;  %v1254_v30 = vsel %vm1154_vm2, %v1249_v26, %v1253_v27  ;;  %v1265_v40 = vor.u32 %v1263_v38, %v1261_v34  ;;  %v1279_v52 = vshrl.u32 %v6617_v42, 16  ;;  %v1287_v59 = vshrl.u32 %v6619_v49, 16  ;;  %v6633_v35 = vld [vmem:[%s7063_s21 + $0xb8] sm:$0xff]   ;;  %v6635_v42 = vld [vmem:[%s7063_s21 + $0xc0] sm:$0xff]  }
  0x24   : > { %v1269_v41 = vrot.slane %v1267_v39, 1  ;;  %v1277_v48 = vrot.slane %v1275_v46, 1  ;;  %v1291_v60 = vshll.u32 %v6621_v56, 16  ;;  %v1295_v3 = vshrl.u32 %v6621_v56, 16  ;;  %v6639_v56 = vld [vmem:[%s7063_s21 + $0xd0] sm:$0xff]  }
  0x25   : > { %v1299_v4 = vshll.u32 %v6623_v63, 16  ;;  %v1303_v10 = vshrl.u32 %v6623_v63, 16  ;;  %v1307_v11 = vshll.u32 %v6625_v7, 16  ;;  %v1311_v17 = vshrl.u32 %v6625_v7, 16  ;;  %v6641_v63 = vld [vmem:[%s7063_s21 + $0xd8] sm:$0xff]   ;;  %v6643_v7 = vld [vmem:[%s7063_s21 + $0xe0] sm:$0xff]  }
  0x26   : > { %v1273_v47 = vor.u32 %v1271_v45, %v1269_v41  ;;  %v1281_v54 = vor.u32 %v1279_v52, %v1277_v48  ;;  %v1293_v62 = vrot.slane %v1291_v60, 1  ;;  %v1315_v18 = vshll.u32 %v6627_v14, 16 }
  0x27   : > { %v1301_v6 = vrot.slane %v1299_v4, 1  ;;  %v1309_v13 = vrot.slane %v1307_v11, 1  ;;  %v1319_v24 = vshrl.u32 %v6627_v14, 16  ;;  %v1331_v32 = vshll.u32 %v6631_v28, 16 }
  0x28   : > { %v1278_v51 = vsel %vm1154_vm2, %v1273_v47, %v1277_v48  ;;  %v1297_v5 = vor.u32 %v1295_v3, %v1293_v62  ;;  %v1317_v20 = vrot.slane %v1315_v18, 1  ;;  %v1335_v38 = vshrl.u32 %v6631_v28, 16  ;;  %v6645_v18 = vld [vmem:[%s7063_s21 + $0xe8] sm:$0xff]  }
  0x29   : > { %v1305_v12 = vor.u32 %v1303_v10, %v1301_v6  ;;  %v1313_v19 = vor.u32 %v1311_v17, %v1309_v13  ;;  %v1339_v39 = vshll.u32 %v6633_v35, 16  ;;  %v1343_v45 = vshrl.u32 %v6633_v35, 16  ;;  %v6642_v10 = vld [vmem:[%s7063_s21 + $0xd8] sm:$0xff]   ;;  %v6647_v35 = vld [vmem:[%s7063_s21 + $0xf0] sm:$0xff]  }
  0x2a   : > { %6018 = vmatmul.mubr.msk.bf16.gmra.mrb[12].mxu0 %vm422_vm1, %v6594_v29  ;;  %6156 = vmatmul.mubr.msk.bf16.gmra.mrb[8].mxu1 %vm422_vm1, %v1182_v31  ;;  %v6612_v29 = vld [vmem:[%s7063_s21 + $0x60] sm:$0xff]   ;;  %v1255_v31 = vshrl.u32 %v6611_v21, 16  ;;  %v6629_v21 = vld [vmem:[%s7063_s21 + $0xa8] sm:$0xff]   ;;  %v1321_v26 = vor.u32 %v1319_v24, %v1317_v20  ;;  %v1347_v46 = vshll.u32 %v6635_v42, 16  ;;  %v1351_v52 = vshrl.u32 %v6635_v42, 16 }
  0x2b   : > { %6021 = vmatprep.mubr.msk.bf16.mxu0 %vm7014_vm0, %v7013_v1  ;;  %6159 = vmatprep.mubr.msk.bf16.mxu1 %vm7014_vm0, %v7013_v1  ;;  %v1323_v25 = vshll.u32 %v6629_v21, 16  ;;  %v1363_v60 = vshll.u32 %v6639_v56, 16  ;;  %v1367_v3 = vshrl.u32 %v6639_v56, 16  ;;  %v1371_v4 = vshll.u32 %v6641_v63, 16  ;;  %v6648_v56 = vld [vmem:[%s7063_s21 + $0xf0] sm:$0xff]  }
  0x2c   : > { %v1257_v33 = vor.u32 %v1255_v31, %v1253_v27  ;;  %v1327_v31 = vshrl.u32 %v6629_v21, 16  ;;  %v1349_v48 = vrot.slane %v1347_v46, 1  ;;  %v1375_v14 = vshrl.u32 %v6641_v63, 16 }
  0x2d   : > { %v1325_v27 = vrot.slane %v1323_v25, 1  ;;  %v1391_v46 = vshrl.u32 %v6645_v18, 16  ;;  %v1399_v63 = vshrl.u32 %v6647_v35, 16 }
  0x32   : > { %6022 = vmatmul.mubr.msk.bf16.gmra.mrb[16].mxu0 %vm422_vm1, %v6596_v36  ;;  %6160 = vmatmul.mubr.msk.bf16.gmra.mrb[12].mxu1 %vm422_vm1, %v1190_v37  ;;  %v6614_v36 = vld [vmem:[%s7063_s21 + $0x68] sm:$0xff]   ;;  %v1262_v37 = vsel %vm1154_vm2, %v1257_v33, %v1261_v34  ;;  %v1329_v33 = vor.u32 %v1327_v31, %v1325_v27  ;;  %v1333_v34 = vrot.slane %v1331_v32, 1 }
  0x33   : > { %6025 = vmatprep.mubr.msk.bf16.mxu0 %vm7014_vm0, %v7013_v1  ;;  %6163 = vmatprep.mubr.msk.bf16.mxu1 %vm7014_vm0, %v7013_v1 }
  0x3a   : > { %6026 = vmatmul.mubr.msk.bf16.gmra.mrb[20].mxu0 %vm422_vm1, %v6598_v43  ;;  %6164 = vmatmul.mubr.msk.bf16.gmra.mrb[16].mxu1 %vm422_vm1, %v1198_v44  ;;  %v6616_v43 = vld [vmem:[%s7063_s21 + $0x70] sm:$0xff]   ;;  %v1270_v44 = vsel %vm1154_vm2, %v1265_v40, %v1269_v41  ;;  %v1337_v40 = vor.u32 %v1335_v38, %v1333_v34  ;;  %v1341_v41 = vrot.slane %v1339_v39, 1  ;;  %v6646_v39 = vld [vmem:[%s7063_s21 + $0xe8] sm:$0xff]  }
  0x3b   : > { %6029 = vmatprep.mubr.msk.bf16.mxu0 %vm7014_vm0, %v7013_v1  ;;  %6167 = vmatprep.mubr.msk.bf16.mxu1 %vm7014_vm0, %v7013_v1 }
  0x3c   : > { %v1345_v47 = vor.u32 %v1343_v45, %v1341_v41 }
  0x42   : > { %6030 = vmatmul.mubr.msk.bf16.gmra.mrb[24].mxu0 %vm422_vm1, %v6600_v50  ;;  %6168 = vmatmul.mubr.msk.bf16.gmra.mrb[20].mxu1 %vm422_vm1, %v1206_v53  ;;  %v6618_v50 = vld [vmem:[%s7063_s21 + $0x78] sm:$0xff]   ;;  %v1283_v53 = vshll.u32 %v6619_v49, 16  ;;  %v6637_v49 = vld [vmem:[%s7063_s21 + $0xc8] sm:$0xff]  }
  0x43   : > { %6033 = vmatprep.mubr.msk.bf16.mxu0 %vm7014_vm0, %v7013_v1  ;;  %6171 = vmatprep.mubr.msk.bf16.mxu1 %vm7014_vm0, %v7013_v1 }
  0x44   : > { %v1285_v55 = vrot.slane %v1283_v53, 1  ;;  %v1355_v53 = vshll.u32 %v6637_v49, 16 }
  0x46   : > { %v1289_v61 = vor.u32 %v1287_v59, %v1285_v55  ;;  %v1359_v59 = vshrl.u32 %v6637_v49, 16 }
  0x4a   : > { %6034 = vmatmul.mubr.msk.bf16.gmra.mrb[28].mxu0 %vm422_vm1, %v6602_v57  ;;  %6172 = vmatmul.mubr.msk.bf16.gmra.mrb[24].mxu1 %vm422_vm1, %v1214_v58  ;;  %v6620_v57 = vld [vmem:[%s7063_s21 + $0x80] sm:$0xff]   ;;  %v1286_v58 = vsel %vm1154_vm2, %v1281_v54, %v1285_v55  ;;  %v1353_v54 = vor.u32 %v1351_v52, %v1349_v48  ;;  %v1357_v55 = vrot.slane %v1355_v53, 1  ;;  %v6649_v52 = vld [vmem:[%s7063_s21 + $0xf8] sm:$0xff]  }
  0x4b   : > { %6037 = vmatprep.mubr.msk.bf16.mxu0 %vm7014_vm0, %v7013_v1  ;;  %6175 = vmatprep.mubr.msk.bf16.mxu1 %vm7014_vm0, %v7013_v1 }
  0x52   : > { %6038 = vmatmul.mubr.msk.bf16.gmra.mrb[32].mxu0 %vm422_vm1, %v6604_v0  ;;  %6176 = vmatmul.mubr.msk.bf16.gmra.mrb[28].mxu1 %vm422_vm1, %v1222_v2  ;;  %v6622_v0 = vld [vmem:[%s7063_s21 + $0x88] sm:$0xff]   ;;  %v1294_v2 = vsel %vm1154_vm2, %v1289_v61, %v1293_v62  ;;  %v1361_v61 = vor.u32 %v1359_v59, %v1357_v55  ;;  %v1365_v62 = vrot.slane %v1363_v60, 1 }
  0x53   : > { %6041 = vmatprep.mubr.msk.bf16.mxu0 %vm7014_vm0, %v7013_v1  ;;  %6179 = vmatprep.mubr.msk.bf16.mxu1 %vm7014_vm0, %v7013_v1 }
  0x5a   : > { %6042 = vmatmul.mubr.msk.bf16.gmra.mrb[36].mxu0 %vm422_vm1, %v6606_v8  ;;  %6180 = vmatmul.mubr.msk.bf16.gmra.mrb[32].mxu1 %vm422_vm1, %v1230_v9  ;;  %v6624_v8 = vld [vmem:[%s7063_s21 + $0x90] sm:$0xff]   ;;  %v1302_v9 = vsel %vm1154_vm2, %v1297_v5, %v1301_v6  ;;  %v1369_v5 = vor.u32 %v1367_v3, %v1365_v62  ;;  %v1373_v6 = vrot.slane %v1371_v4, 1 }
  0x5b   : > { %6045 = vmatprep.mubr.msk.bf16.mxu0 %vm7014_vm0, %v7013_v1  ;;  %6183 = vmatprep.mubr.msk.bf16.mxu1 %vm7014_vm0, %v7013_v1 }
  0x62   : > { %6046 = vmatmul.mubr.msk.bf16.gmra.mrb[40].mxu0 %vm422_vm1, %v6608_v15  ;;  %6184 = vmatmul.mubr.msk.bf16.gmra.mrb[36].mxu1 %vm422_vm1, %v1238_v16  ;;  %v6626_v15 = vld [vmem:[%s7063_s21 + $0x98] sm:$0xff]   ;;  %v1310_v16 = vsel %vm1154_vm2, %v1305_v12, %v1309_v13  ;;  %v1374_v13 = vsel %vm1154_vm2, %v1369_v5, %v1373_v6 }
  0x63   : > { %6049 = vmatprep.mubr.msk.bf16.mxu0 %vm7014_vm0, %v7013_v1  ;;  %6187 = vmatprep.mubr.msk.bf16.mxu1 %vm7014_vm0, %v7013_v1 }
  0x6a   : > { %6050 = vmatmul.mubr.msk.bf16.gmra.mrb[44].mxu0 %vm422_vm1, %v6610_v22  ;;  %6188 = vmatmul.mubr.msk.bf16.gmra.mrb[40].mxu1 %vm422_vm1, %v1246_v23  ;;  %v6628_v22 = vld [vmem:[%s7063_s21 + $0xa0] sm:$0xff]   ;;  %v1318_v23 = vsel %vm1154_vm2, %v1313_v19, %v1317_v20 }
  0x6b   : > { %6053 = vmatprep.mubr.msk.bf16.mxu0 %vm7014_vm0, %v7013_v1  ;;  %6191 = vmatprep.mubr.msk.bf16.mxu1 %vm7014_vm0, %v7013_v1 }
  0x72   : > { %6054 = vmatmul.mubr.msk.bf16.gmra.mrb[48].mxu0 %vm422_vm1, %v6612_v29  ;;  %6192 = vmatmul.mubr.msk.bf16.gmra.mrb[44].mxu1 %vm422_vm1, %v1254_v30  ;;  %v6630_v29 = vld [vmem:[%s7063_s21 + $0xa8] sm:$0xff]   ;;  %v1326_v30 = vsel %vm1154_vm2, %v1321_v26, %v1325_v27 }
  0x73   : > { %6057 = vmatprep.mubr.msk.bf16.mxu0 %vm7014_vm0, %v7013_v1  ;;  %6195 = vmatprep.mubr.msk.bf16.mxu1 %vm7014_vm0, %v7013_v1 }
  0x7a   : > { %6058 = vmatmul.mubr.msk.bf16.gmra.mrb[52].mxu0 %vm422_vm1, %v6614_v36  ;;  %6196 = vmatmul.mubr.msk.bf16.gmra.mrb[48].mxu1 %vm422_vm1, %v1262_v37  ;;  %v6632_v36 = vld [vmem:[%s7063_s21 + $0xb0] sm:$0xff]   ;;  %v1334_v37 = vsel %vm1154_vm2, %v1329_v33, %v1333_v34 }
  0x7b   : > { %6061 = vmatprep.mubr.msk.bf16.mxu0 %vm7014_vm0, %v7013_v1  ;;  %6199 = vmatprep.mubr.msk.bf16.mxu1 %vm7014_vm0, %v7013_v1 }
  0x82   : > { %6062 = vmatmul.mubr.msk.bf16.gmra.mrb[56].mxu0 %vm422_vm1, %v6616_v43  ;;  %6200 = vmatmul.mubr.msk.bf16.gmra.mrb[52].mxu1 %vm422_vm1, %v1270_v44  ;;  %v6634_v43 = vld [vmem:[%s7063_s21 + $0xb8] sm:$0xff]   ;;  %v1342_v44 = vsel %vm1154_vm2, %v1337_v40, %v1341_v41 }
  0x83   : > { %6065 = vmatprep.mubr.msk.bf16.mxu0 %vm7014_vm0, %v7013_v1  ;;  %6203 = vmatprep.mubr.msk.bf16.mxu1 %vm7014_vm0, %v7013_v1 }
  0x8a   : > { %6066 = vmatmul.mubr.msk.bf16.gmra.mrb[60].mxu0 %vm422_vm1, %v6618_v50  ;;  %6204 = vmatmul.mubr.msk.bf16.gmra.mrb[56].mxu1 %vm422_vm1, %v1278_v51  ;;  %v6636_v50 = vld [vmem:[%s7063_s21 + $0xc0] sm:$0xff]   ;;  %v1350_v51 = vsel %vm1154_vm2, %v1345_v47, %v1349_v48  ;;  %v1395_v47 = vshll.u32 %v6647_v35, 16 }
  0x8b   : > { %6069 = vmatprep.mubr.msk.bf16.mxu0 %vm7014_vm0, %v7013_v1  ;;  %6207 = vmatprep.mubr.msk.bf16.mxu1 %vm7014_vm0, %v7013_v1 }
  0x92   : > { %6070 = vmatmul.mubr.msk.bf16.gmra.mrb[64].mxu0 %vm422_vm1, %v6620_v57  ;;  %6208 = vmatmul.mubr.msk.bf16.gmra.mrb[60].mxu1 %vm422_vm1, %v1286_v58  ;;  %v6638_v57 = vld [vmem:[%s7063_s21 + $0xc8] sm:$0xff]   ;;  %v1358_v58 = vsel %vm1154_vm2, %v1353_v54, %v1357_v55 }
  0x93   : > { %6073 = vmatprep.mubr.msk.bf16.mxu0 %vm7014_vm0, %v7013_v1  ;;  %6211 = vmatprep.mubr.msk.bf16.mxu1 %vm7014_vm0, %v7013_v1 }
  0x9a   : > { %6074 = vmatmul.mubr.msk.bf16.gmra.mrb[68].mxu0 %vm422_vm1, %v6622_v0  ;;  %6212 = vmatmul.mubr.msk.bf16.gmra.mrb[64].mxu1 %vm422_vm1, %v1294_v2  ;;  %v6640_v0 = vld [vmem:[%s7063_s21 + $0xd0] sm:$0xff]   ;;  %v1366_v2 = vsel %vm1154_vm2, %v1361_v61, %v1365_v62 }
  0x9b   : > { %6077 = vmatprep.mubr.msk.bf16.mxu0 %vm7014_vm0, %v7013_v1  ;;  %6215 = vmatprep.mubr.msk.bf16.mxu1 %vm7014_vm0, %v7013_v1 }
  0xa2   : > { %6078 = vmatmul.mubr.msk.bf16.gmra.mrb[72].mxu0 %vm422_vm1, %v6624_v8  ;;  %6216 = vmatmul.mubr.msk.bf16.gmra.mrb[68].mxu1 %vm422_vm1, %v1302_v9 }
  0xa3   : > { %6081 = vmatprep.mubr.msk.bf16.mxu0 %vm7014_vm0, %v7013_v1  ;;  %6219 = vmatprep.mubr.msk.bf16.mxu1 %vm7014_vm0, %v7013_v1 }
  0xaa   : > { %6082 = vmatmul.mubr.msk.bf16.gmra.mrb[76].mxu0 %vm422_vm1, %v6626_v15  ;;  %6220 = vmatmul.mubr.msk.bf16.gmra.mrb[72].mxu1 %vm422_vm1, %v1310_v16  ;;  %v1379_v15 = vshll.u32 %v6643_v7, 16  ;;  %v1377_v16 = vor.u32 %v1375_v14, %v1373_v6  ;;  %v6651_v6 = vld [vmem:[%s7063_s21 + $0x100] sm:$0xff]  }
  0xab   : > { %6085 = vmatprep.mubr.msk.bf16.mxu0 %vm7014_vm0, %v7013_v1  ;;  %6223 = vmatprep.mubr.msk.bf16.mxu1 %vm7014_vm0, %v7013_v1 }
  0xac   : > { %v1381_v17 = vrot.slane %v1379_v15, 1 }
  0xae   : > { %v1382_v28 = vsel %vm1154_vm2, %v1377_v16, %v1381_v17 }
  0xb2   : > { %6086 = vmatmul.mubr.msk.bf16.gmra.mrb[80].mxu0 %vm422_vm1, %v6628_v22  ;;  %6224 = vmatmul.mubr.msk.bf16.gmra.mrb[76].mxu1 %vm422_vm1, %v1318_v23  ;;  %v6644_v22 = vld [vmem:[%s7063_s21 + $0xe0] sm:$0xff]  }
  0xb3   : > { %6089 = vmatprep.mubr.msk.bf16.mxu0 %vm7014_vm0, %v7013_v1  ;;  %6227 = vmatprep.mubr.msk.bf16.mxu1 %vm7014_vm0, %v7013_v1 }
  0xba   : > { %6090 = vmatmul.mubr.msk.bf16.gmra.mrb[84].mxu0 %vm422_vm1, %v6630_v29  ;;  %6228 = vmatmul.mubr.msk.bf16.gmra.mrb[80].mxu1 %vm422_vm1, %v1326_v30  ;;  %v1383_v29 = vshrl.u32 %v6643_v7, 16  ;;  %v1387_v30 = vshll.u32 %v6645_v18, 16  ;;  %v1411_v18 = vshll.u32 %v6651_v6, 16 }
  0xbb   : > { %6093 = vmatprep.mubr.msk.bf16.mxu0 %vm7014_vm0, %v7013_v1  ;;  %6231 = vmatprep.mubr.msk.bf16.mxu1 %vm7014_vm0, %v7013_v1 }
  0xbc   : > { %v1385_v33 = vor.u32 %v1383_v29, %v1381_v17  ;;  %v1389_v34 = vrot.slane %v1387_v30, 1  ;;  %v1407_v17 = vshrl.u32 %v6649_v52, 16 }
  0xbe   : > { %v1390_v45 = vsel %vm1154_vm2, %v1385_v33, %v1389_v34 }
  0xc2   : > { %6094 = vmatmul.mubr.msk.bf16.gmra.mrb[88].mxu0 %vm422_vm1, %v6632_v36  ;;  %6232 = vmatmul.mubr.msk.bf16.gmra.mrb[84].mxu1 %vm422_vm1, %v1334_v37 }
  0xc3   : > { %6097 = vmatprep.mubr.msk.bf16.mxu0 %vm7014_vm0, %v7013_v1  ;;  %6235 = vmatprep.mubr.msk.bf16.mxu1 %vm7014_vm0, %v7013_v1 }
  0xca   : > { %6098 = vmatmul.mubr.msk.bf16.gmra.mrb[92].mxu0 %vm422_vm1, %v6634_v43  ;;  %6236 = vmatmul.mubr.msk.bf16.gmra.mrb[88].mxu1 %vm422_vm1, %v1342_v44 }
  0xcb   : > { %6101 = vmatprep.mubr.msk.bf16.mxu0 %vm7014_vm0, %v7013_v1  ;;  %6239 = vmatprep.mubr.msk.bf16.mxu1 %vm7014_vm0, %v7013_v1 }
  0xd2   : > { %6102 = vmatmul.mubr.msk.bf16.gmra.mrb[96].mxu0 %vm422_vm1, %v6636_v50  ;;  %6240 = vmatmul.mubr.msk.bf16.gmra.mrb[92].mxu1 %vm422_vm1, %v1350_v51  ;;  %v1393_v50 = vor.u32 %v1391_v46, %v1389_v34  ;;  %v1397_v51 = vrot.slane %v1395_v47, 1  ;;  %v1415_v34 = vshrl.u32 %v6651_v6, 16 }
  0xd3   : > { %6105 = vmatprep.mubr.msk.bf16.mxu0 %vm7014_vm0, %v7013_v1  ;;  %6243 = vmatprep.mubr.msk.bf16.mxu1 %vm7014_vm0, %v7013_v1 }
  0xd4   : > { %v1398_v62 = vsel %vm1154_vm2, %v1393_v50, %v1397_v51  ;;  %v1401_v4 = vor.u32 %v1399_v63, %v1397_v51 }
  0xda   : > { %6106 = vmatmul.mubr.msk.bf16.gmra.mrb[100].mxu0 %vm422_vm1, %v6638_v57  ;;  %6244 = vmatmul.mubr.msk.bf16.gmra.mrb[96].mxu1 %vm422_vm1, %v1358_v58 }
  0xdb   : > { %6109 = vmatprep.mubr.msk.bf16.mxu0 %vm7014_vm0, %v7013_v1  ;;  %6247 = vmatprep.mubr.msk.bf16.mxu1 %vm7014_vm0, %v7013_v1 }
  0xe2   : > { %6110 = vmatmul.mubr.msk.bf16.gmra.mrb[104].mxu0 %vm422_vm1, %v6640_v0  ;;  %6248 = vmatmul.mubr.msk.bf16.gmra.mrb[100].mxu1 %vm422_vm1, %v1366_v2  ;;  %v1403_v0 = vshll.u32 %v6649_v52, 16 }
  0xe3   : > { %6113 = vmatprep.mubr.msk.bf16.mxu0 %vm7014_vm0, %v7013_v1  ;;  %6251 = vmatprep.mubr.msk.bf16.mxu1 %vm7014_vm0, %v7013_v1 }
  0xe4   : > { %v1405_v5 = vrot.slane %v1403_v0, 1 }
  0xe5   : > { %v562_v8 = vpop.f32.mrb[0].mxu0 }
  0xe6   : > { %v6007_v9 = vpop.f32.mrb[1].mxu0  ;;  %v1406_v16 = vsel %vm1154_vm2, %v1401_v4, %v1405_v5  ;;  %v6658_v4 = vld [vmem:[%s7063_s21 + $0xc] sm:$0xff]  }
  0xe7   : > { %v565_v11 = vpop.f32.mrb[2].mxu0 }
  0xe8   : > { %v6008_v12 = vpop.f32.mrb[3].mxu0 }
  0xea   : > { %6114 = vmatmul.mubr.msk.bf16.gmra.mrb[108].mxu0 %vm422_vm1, %v6642_v10  ;;  %6252 = vmatmul.mubr.msk.bf16.gmra.mrb[104].mxu1 %vm422_vm1, %v1374_v13  ;;  %v6650_v10 = vld [vmem:[%s7063_s21 + $0xf8] sm:$0xff]  }
  0xeb   : > { %6117 = vmatprep.mubr.msk.bf16.mxu0 %vm7014_vm0, %v7013_v1  ;;  %6255 = vmatprep.mubr.msk.bf16.mxu1 %vm7014_vm0, %v7013_v1 }
  0xed   : > { %v570_v19 = vpop.f32.mrb[4].mxu0  ;;  %v1579_v20 = vpop.f32.mrb[0].mxu1 }
  0xee   : > { %v6011_v21 = vpop.f32.mrb[5].mxu0  ;;  %v1926_v23 = vadd.f32 %v1579_v20, %v562_v8  ;;  %v6149_v24 = vpop.f32.mrb[1].mxu1 }
  0xef   : > { %v573_v25 = vpop.f32.mrb[6].mxu0  ;;  %v1582_v26 = vpop.f32.mrb[2].mxu1  ;;  %v1409_v21 = vor.u32 %v1407_v17, %v1405_v5 }
  0xf0   : > { %v6012_v27 = vpop.f32.mrb[7].mxu0  ;;  %1995 = vst [vmem:[#allocation2] sm:$0xff] %v1926_v23  ;;  %v1927_v31 = vadd.f32 %v1582_v26, %v565_v11  ;;  %v6150_v32 = vpop.f32.mrb[3].mxu1  ;;  %v6653_v23 = vld [vmem:[%s7063_s21 + $0x108] sm:$0xff]  }
  0xf1   : > { %v6652_v27 = vld [vmem:[%s7063_s21 + $0x100] sm:$0xff]   ;;  %v1419_v35 = vshll.u32 %v6653_v23, 16  ;;  %v1423_v51 = vshrl.u32 %v6653_v23, 16 }
  0xf2   : > { %6118 = vmatmul.mubr.msk.bf16.gmra.mrb[112].mxu0 %vm422_vm1, %v6644_v22  ;;  %1996 = vst [vmem:[#allocation2 + $0x8] sm:$0xff] %v1927_v31  ;;  %6256 = vmatmul.mubr.msk.bf16.gmra.mrb[108].mxu1 %vm422_vm1, %v1382_v28  ;;  %v1413_v22 = vrot.slane %v1411_v18, 1 }
  0xf3   : > { %6121 = vmatprep.mubr.msk.bf16.mxu0 %vm7014_vm0, %v7013_v1  ;;  %6259 = vmatprep.mubr.msk.bf16.mxu1 %vm7014_vm0, %v7013_v1 }
  0xf4   : > { %v1414_v33 = vsel %vm1154_vm2, %v1409_v21, %v1413_v22 }
  0xf5   : > { %v578_v36 = vpop.f32.mrb[8].mxu0  ;;  %v1587_v37 = vpop.f32.mrb[4].mxu1 }
  0xf6   : > { %v6015_v38 = vpop.f32.mrb[9].mxu0  ;;  %v1928_v40 = vadd.f32 %v1587_v37, %v570_v19  ;;  %v6153_v41 = vpop.f32.mrb[5].mxu1 }
  0xf7   : > { %v581_v42 = vpop.f32.mrb[10].mxu0  ;;  %v1590_v43 = vpop.f32.mrb[6].mxu1  ;;  %v1417_v38 = vor.u32 %v1415_v34, %v1413_v22 }
  0xf8   : > { %v6016_v44 = vpop.f32.mrb[11].mxu0  ;;  %1997 = vst [vmem:[#allocation2 + $0x10] sm:$0xff] %v1928_v40  ;;  %v1929_v48 = vadd.f32 %v1590_v43, %v573_v25  ;;  %v6154_v49 = vpop.f32.mrb[7].mxu1  ;;  %v6655_v40 = vld [vmem:[%s7063_s21 + $0x110] ss:$0 sps:$4 sm:$0xff]  }
  0xf9   : > { %v6654_v44 = vld [vmem:[%s7063_s21 + $0x108] sm:$0xff]   ;;  %v1427_v52 = vshll.u32 %v6655_v40, 16 }
  0xfa   : > { %6122 = vmatmul.mubr.msk.bf16.gmra.mrb[116].mxu0 %vm422_vm1, %v6646_v39  ;;  %1998 = vst [vmem:[#allocation2 + $0x18] sm:$0xff] %v1929_v48  ;;  %6260 = vmatmul.mubr.msk.bf16.gmra.mrb[112].mxu1 %vm422_vm1, %v1390_v45  ;;  %v1421_v39 = vrot.slane %v1419_v35, 1 }
  0xfb   : > { %6125 = vmatprep.mubr.msk.bf16.mxu0 %vm7014_vm0, %v7013_v1  ;;  %6263 = vmatprep.mubr.msk.bf16.mxu1 %vm7014_vm0, %v7013_v1 }
  0xfc   : > { %v1422_v50 = vsel %vm1154_vm2, %v1417_v38, %v1421_v39 }
  0xfd   : > { %v586_v53 = vpop.f32.mrb[12].mxu0  ;;  %v1595_v54 = vpop.f32.mrb[8].mxu1 }
  0xfe   : > { %v6019_v55 = vpop.f32.mrb[13].mxu0  ;;  %v1930_v57 = vadd.f32 %v1595_v54, %v578_v36  ;;  %v6157_v58 = vpop.f32.mrb[9].mxu1 }
  0xff   : > { %v589_v59 = vpop.f32.mrb[14].mxu0  ;;  %v1598_v60 = vpop.f32.mrb[10].mxu1  ;;  %v1425_v55 = vor.u32 %v1423_v51, %v1421_v39 }
 0x100   : > { %v6020_v61 = vpop.f32.mrb[15].mxu0  ;;  %1999 = vst [vmem:[#allocation2 + $0x20] sm:$0xff] %v1930_v57  ;;  %v1931_v2 = vadd.f32 %v1598_v60, %v581_v42  ;;  %v6158_v3 = vpop.f32.mrb[11].mxu1  ;;  %v6656_v60 = vld [vmem:[%s7063_s21 + $0x110] ss:$0 sps:$4 sm:$0xff]  }
 0x102   : > { %6126 = vmatmul.mubr.msk.bf16.gmra.mrb[120].mxu0 %vm422_vm1, %v6648_v56  ;;  %2000 = vst [vmem:[#allocation2 + $0x28] sm:$0xff] %v1931_v2  ;;  %6264 = vmatmul.mubr.msk.bf16.gmra.mrb[116].mxu1 %vm422_vm1, %v1398_v62  ;;  %v1429_v56 = vrot.slane %v1427_v52, 1 }
 0x103   : > { %6129 = vmatprep.mubr.msk.bf16.mxu0 %vm7014_vm0, %v7013_v1  ;;  %6267 = vmatprep.mubr.msk.bf16.mxu1 %vm7014_vm0, %v7013_v1 }
 0x104   : > { %v1430_v3 = vsel %vm1154_vm2, %v1425_v55, %v1429_v56 }
 0x105   : > { %v594_v7 = vpop.f32.mrb[16].mxu0  ;;  %v1603_v8 = vpop.f32.mrb[12].mxu1 }
 0x106   : > { %v6023_v9 = vpop.f32.mrb[17].mxu0  ;;  %v1932_v11 = vadd.f32 %v1603_v8, %v586_v53  ;;  %v6161_v12 = vpop.f32.mrb[13].mxu1  ;;  %v6659_v8 = vld [vmem:[%s7063_s21 + $0x14] sm:$0xff]  }
 0x107   : > { %v597_v13 = vpop.f32.mrb[18].mxu0  ;;  %v1606_v14 = vpop.f32.mrb[14].mxu1  ;;  %v3187_v9 = vshll.u32 %v6658_v4, 16  ;;  %v3192_v22 = vshll.u32 %v6659_v8, 16  ;;  %v3196_v38 = vshrl.u32 %v6659_v8, 16 }
 0x108   : > { %v6024_v15 = vpop.f32.mrb[19].mxu0  ;;  %2001 = vst [vmem:[#allocation2 + $0x30] sm:$0xff] %v1932_v11  ;;  %v1933_v19 = vadd.f32 %v1606_v14, %v589_v59  ;;  %v6162_v20 = vpop.f32.mrb[15].mxu1 }
 0x109   : > { %v3185_v20 = vshrl.u32 %v6658_v4, 16  ;;  %v3189_v21 = vrot.slane %v3187_v9, 1 }
 0x10a   : > { %6130 = vmatmul.mubr.msk.bf16.gmra.mrb[124].mxu0 %vm422_vm1, %v6650_v10  ;;  %2002 = vst [vmem:[#allocation2 + $0x38] sm:$0xff] %v1933_v19  ;;  %6268 = vmatmul.mubr.msk.bf16.gmra.mrb[120].mxu1 %vm422_vm1, %v1406_v16 }
 0x10b   : > { %6133 = vmatprep.mubr.msk.bf16.mxu0 %vm7014_vm0, %v7013_v1  ;;  %6271 = vmatprep.mubr.msk.bf16.mxu1 %vm7014_vm0, %v7013_v1 }
 0x10d   : > { %v602_v24 = vpop.f32.mrb[20].mxu0  ;;  %v1611_v25 = vpop.f32.mrb[16].mxu1 }
 0x10e   : > { %v6027_v26 = vpop.f32.mrb[21].mxu0  ;;  %v1934_v28 = vadd.f32 %v1611_v25, %v594_v7  ;;  %v6165_v29 = vpop.f32.mrb[17].mxu1  ;;  %v1431_v7 = vshrl.u32 %v6655_v40, 16  ;;  %v3190_v25 = vor.u32 %v3189_v21, %v3185_v20 }
 0x10f   : > { %v605_v30 = vpop.f32.mrb[22].mxu0  ;;  %v1614_v31 = vpop.f32.mrb[18].mxu1  ;;  %v3194_v26 = vrot.slane %v3192_v22, 1 }
 0x110   : > { %v6028_v32 = vpop.f32.mrb[23].mxu0  ;;  %2003 = vst [vmem:[#allocation2 + $0x40] sm:$0xff] %v1934_v28  ;;  %v1935_v36 = vadd.f32 %v1614_v31, %v597_v13  ;;  %v6166_v37 = vpop.f32.mrb[19].mxu1  ;;  %v6657_v13 = vld [vmem:[%s7063_s21 + $0xc] sm:$0xff]   ;;  %v1433_v17 = vor.u32 %v1431_v7, %v1429_v56  ;;  %v6660_v31 = vld [vmem:[%s7063_s21 + $0x14] sm:$0xff]  }
 0x111   : > { %v3195_v37 = vsel %vm1154_vm2, %v3190_v25, %v3194_v26 }
 0x112   : > { %6134 = vmatmul.mubr.msk.bf16.gmra.mrb[128].mxu0 %vm422_vm1, %v6652_v27  ;;  %2004 = vst [vmem:[#allocation2 + $0x48] sm:$0xff] %v1935_v36  ;;  %6272 = vmatmul.mubr.msk.bf16.gmra.mrb[124].mxu1 %vm422_vm1, %v1414_v33  ;;  %v6661_v27 = vld [vmem:[%s7063_s21 + $0x1c] sm:$0xff]  }
 0x113   : > { %6137 = vmatprep.mubr.msk.bf16.mxu0 %vm7014_vm0, %v7013_v1  ;;  %6275 = vmatprep.mubr.msk.bf16.mxu1 %vm7014_vm0, %v7013_v1  ;;  %v3200_v39 = vshll.u32 %v6661_v27, 16  ;;  %v3204_v55 = vshrl.u32 %v6661_v27, 16 }
 0x115   : > { %v610_v41 = vpop.f32.mrb[24].mxu0  ;;  %v1619_v42 = vpop.f32.mrb[20].mxu1 }
 0x116   : > { %v6031_v43 = vpop.f32.mrb[25].mxu0  ;;  %v1936_v45 = vadd.f32 %v1619_v42, %v602_v24  ;;  %v6169_v46 = vpop.f32.mrb[21].mxu1  ;;  %v3198_v42 = vor.u32 %v3196_v38, %v3194_v26 }
 0x117   : > { %v613_v47 = vpop.f32.mrb[26].mxu0  ;;  %v1622_v48 = vpop.f32.mrb[22].mxu1  ;;  %v3202_v43 = vrot.slane %v3200_v39, 1 }
 0x118   : > { %v6032_v49 = vpop.f32.mrb[27].mxu0  ;;  %2005 = vst [vmem:[#allocation2 + $0x50] sm:$0xff] %v1936_v45  ;;  %v1937_v53 = vadd.f32 %v1622_v48, %v605_v30  ;;  %v6170_v54 = vpop.f32.mrb[23].mxu1  ;;  %v6662_v48 = vld [vmem:[%s7063_s21 + $0x1c] sm:$0xff]  }
 0x119   : > { %v3203_v54 = vsel %vm1154_vm2, %v3198_v42, %v3202_v43 }
 0x11a   : > { %6138 = vmatmul.mubr.msk.bf16.gmra.mrb[132].mxu0 %vm422_vm1, %v6654_v44  ;;  %2006 = vst [vmem:[#allocation2 + $0x58] sm:$0xff] %v1937_v53  ;;  %6276 = vmatmul.mubr.msk.bf16.gmra.mrb[128].mxu1 %vm422_vm1, %v1422_v50  ;;  %v6663_v44 = vld [vmem:[%s7063_s21 + $0x24] sm:$0xff]  }
 0x11b   : > { %6141 = vmatprep.mubr.msk.bf16.mxu0 %vm7014_vm0, %v7013_v1  ;;  %6279 = vmatprep.mubr.msk.bf16.mxu1 %vm7014_vm0, %v7013_v1  ;;  %v3208_v56 = vshll.u32 %v6663_v44, 16  ;;  %v3212_v9 = vshrl.u32 %v6663_v44, 16 }
 0x11d   : > { %v618_v57 = vpop.f32.mrb[28].mxu0  ;;  %v1627_v58 = vpop.f32.mrb[24].mxu1 }
 0x11e   : > { %v6035_v59 = vpop.f32.mrb[29].mxu0  ;;  %v1938_v61 = vadd.f32 %v1627_v58, %v610_v41  ;;  %v6173_v62 = vpop.f32.mrb[25].mxu1 }
 0x11f   : > { %v621_v63 = vpop.f32.mrb[30].mxu0  ;;  %v1630_v0 = vpop.f32.mrb[26].mxu1  ;;  %v3206_v59 = vor.u32 %v3204_v55, %v3202_v43 }
 0x120   : > { %v6036_v2 = vpop.f32.mrb[31].mxu0  ;;  %2007 = vst [vmem:[#allocation2 + $0x60] sm:$0xff] %v1938_v61  ;;  %v1939_v5 = vadd.f32 %v1630_v0, %v613_v47  ;;  %v6174_v6 = vpop.f32.mrb[27].mxu1  ;;  %v6665_v61 = vld [vmem:[%s7063_s21 + $0x2c] sm:$0xff]  }
 0x121   : > { %v6664_v2 = vld [vmem:[%s7063_s21 + $0x24] sm:$0xff]   ;;  %v3220_v26 = vshrl.u32 %v6665_v61, 16 }
 0x122   : > { %6142 = vmatmul.mubr.msk.bf16.gmra.mrb[136].mxu0 %vm422_vm1, %v6656_v60  ;;  %2008 = vst [vmem:[#allocation2 + $0x68] sm:$0xff] %v1939_v5  ;;  %6280 = vmatmul.mubr.msk.bf16.gmra.mrb[132].mxu1 %vm422_vm1, %v1430_v3  ;;  %v3210_v60 = vrot.slane %v3208_v56, 1 }
 0x123   : > { %6289 = vmatprep.mubr.msk.bf16.mxu0 %vm7014_vm0, %v7013_v1  ;;  %6283 = vmatprep.mubr.msk.bf16.mxu1 %vm7014_vm0, %v7013_v1 }
 0x124   : > { %v3211_v8 = vsel %vm1154_vm2, %v3206_v59, %v3210_v60 }
 0x125   : > { %v626_v10 = vpop.f32.mrb[32].mxu0  ;;  %v1635_v11 = vpop.f32.mrb[28].mxu1 }
 0x126   : > { %v6039_v12 = vpop.f32.mrb[33].mxu0  ;;  %v1940_v14 = vadd.f32 %v1635_v11, %v618_v57  ;;  %v6177_v15 = vpop.f32.mrb[29].mxu1 }
 0x127   : > { %v629_v16 = vpop.f32.mrb[34].mxu0  ;;  %v1638_v18 = vpop.f32.mrb[30].mxu1  ;;  %v6667_v15 = vld [vmem:[%s7063_s21 + $0x34] sm:$0xff]  }
 0x128   : > { %v6040_v19 = vpop.f32.mrb[35].mxu0  ;;  %2009 = vst [vmem:[#allocation2 + $0x70] sm:$0xff] %v1940_v14  ;;  %v1941_v23 = vadd.f32 %v1638_v18, %v621_v63  ;;  %v6178_v24 = vpop.f32.mrb[31].mxu1  ;;  %v3224_v27 = vshll.u32 %v6667_v15, 16  ;;  %v3228_v43 = vshrl.u32 %v6667_v15, 16 }
 0x129   : > { %v6666_v19 = vld [vmem:[%s7063_s21 + $0x2c] sm:$0xff]  }
 0x12a   : > { %6290 = vmatmul.mubr.msk.bf16.vlgmr.msra.gmra.mrb[140].mxu0 %vm422_vm1, %v6657_v13  ;;  %2010 = vst [vmem:[#allocation2 + $0x78] sm:$0xff] %v1941_v23  ;;  %6284 = vmatmul.mubr.msk.bf16.gmra.mrb[136].mxu1 %vm422_vm1, %v1433_v17  ;;  %v3214_v13 = vor.u32 %v3212_v9, %v3210_v60 }
 0x12b   : > { %6293 = vmatprep.mubr.msk.bf16.mxu0 %vm7014_vm0, %v7013_v1  ;;  %6431 = vmatprep.mubr.msk.bf16.mxu1 %vm7014_vm0, %v7013_v1 }
 0x12d   : > { %v634_v28 = vpop.f32.mrb[36].mxu0  ;;  %v1643_v29 = vpop.f32.mrb[32].mxu1 }
 0x12e   : > { %v6043_v30 = vpop.f32.mrb[37].mxu0  ;;  %v1942_v32 = vadd.f32 %v1643_v29, %v626_v10  ;;  %v6181_v33 = vpop.f32.mrb[33].mxu1  ;;  %v3216_v10 = vshll.u32 %v6665_v61, 16 }
 0x12f   : > { %v637_v34 = vpop.f32.mrb[38].mxu0  ;;  %v1646_v35 = vpop.f32.mrb[34].mxu1 }
 0x130   : > { %v6044_v36 = vpop.f32.mrb[39].mxu0  ;;  %2011 = vst [vmem:[#allocation2 + $0x80] sm:$0xff] %v1942_v32  ;;  %v1943_v40 = vadd.f32 %v1646_v35, %v629_v16  ;;  %v6182_v41 = vpop.f32.mrb[35].mxu1  ;;  %v3218_v14 = vrot.slane %v3216_v10, 1  ;;  %v6669_v32 = vld [vmem:[%s7063_s21 + $0x3c] sm:$0xff]  }
 0x131   : > { %v6668_v36 = vld [vmem:[%s7063_s21 + $0x34] sm:$0xff]   ;;  %v3232_v44 = vshll.u32 %v6669_v32, 16  ;;  %v3236_v60 = vshrl.u32 %v6669_v32, 16 }
 0x132   : > { %6294 = vmatmul.mubr.msk.bf16.gmra.mrb[144].mxu0 %vm422_vm1, %v6660_v31  ;;  %2012 = vst [vmem:[#allocation2 + $0x88] sm:$0xff] %v1943_v40  ;;  %6432 = vmatmul.mubr.msk.bf16.vlgmr.msra.gmra.mrb[140].mxu1 %vm422_vm1, %v3195_v37  ;;  %v3219_v25 = vsel %vm1154_vm2, %v3214_v13, %v3218_v14  ;;  %v3222_v30 = vor.u32 %v3220_v26, %v3218_v14  ;;  %v3226_v31 = vrot.slane %v3224_v27, 1 }
 0x133   : > { %6297 = vmatprep.mubr.msk.bf16.mxu0 %vm7014_vm0, %v7013_v1  ;;  %6435 = vmatprep.mubr.msk.bf16.mxu1 %vm7014_vm0, %v7013_v1 }
 0x134   : > { %v3227_v42 = vsel %vm1154_vm2, %v3222_v30, %v3226_v31 }
 0x135   : > { %v642_v45 = vpop.f32.mrb[40].mxu0  ;;  %v1651_v46 = vpop.f32.mrb[36].mxu1 }
 0x136   : > { %v6047_v47 = vpop.f32.mrb[41].mxu0  ;;  %v1944_v49 = vadd.f32 %v1651_v46, %v634_v28  ;;  %v6185_v50 = vpop.f32.mrb[37].mxu1 }
 0x137   : > { %v645_v51 = vpop.f32.mrb[42].mxu0  ;;  %v1654_v52 = vpop.f32.mrb[38].mxu1  ;;  %v3230_v47 = vor.u32 %v3228_v43, %v3226_v31 }
 0x138   : > { %v6048_v53 = vpop.f32.mrb[43].mxu0  ;;  %2013 = vst [vmem:[#allocation2 + $0x90] sm:$0xff] %v1944_v49  ;;  %v1945_v57 = vadd.f32 %v1654_v52, %v637_v34  ;;  %v6186_v58 = vpop.f32.mrb[39].mxu1  ;;  %v6671_v49 = vld [vmem:[%s7063_s21 + $0x44] sm:$0xff]  }
 0x139   : > { %v6670_v53 = vld [vmem:[%s7063_s21 + $0x3c] sm:$0xff]   ;;  %v3240_v61 = vshll.u32 %v6671_v49, 16  ;;  %v3244_v14 = vshrl.u32 %v6671_v49, 16 }
 0x13a   : > { %6298 = vmatmul.mubr.msk.bf16.gmra.mrb[148].mxu0 %vm422_vm1, %v6662_v48  ;;  %2014 = vst [vmem:[#allocation2 + $0x98] sm:$0xff] %v1945_v57  ;;  %6436 = vmatmul.mubr.msk.bf16.gmra.mrb[144].mxu1 %vm422_vm1, %v3203_v54  ;;  %v3234_v48 = vrot.slane %v3232_v44, 1 }
 0x13b   : > { %6301 = vmatprep.mubr.msk.bf16.mxu0 %vm7014_vm0, %v7013_v1  ;;  %6439 = vmatprep.mubr.msk.bf16.mxu1 %vm7014_vm0, %v7013_v1 }
 0x13c   : > { %v3235_v59 = vsel %vm1154_vm2, %v3230_v47, %v3234_v48 }
 0x13d   : > { %v650_v62 = vpop.f32.mrb[44].mxu0  ;;  %v1659_v63 = vpop.f32.mrb[40].mxu1 }
 0x13e   : > { %v6051_v0 = vpop.f32.mrb[45].mxu0  ;;  %v1946_v3 = vadd.f32 %v1659_v63, %v642_v45  ;;  %v6189_v4 = vpop.f32.mrb[41].mxu1 }
 0x13f   : > { %v653_v5 = vpop.f32.mrb[46].mxu0  ;;  %v1662_v6 = vpop.f32.mrb[42].mxu1  ;;  %v3238_v0 = vor.u32 %v3236_v60, %v3234_v48 }
 0x140   : > { %v6052_v7 = vpop.f32.mrb[47].mxu0  ;;  %2015 = vst [vmem:[#allocation2 + $0xa0] sm:$0xff] %v1946_v3  ;;  %v1947_v11 = vadd.f32 %v1662_v6, %v645_v51  ;;  %v6190_v12 = vpop.f32.mrb[43].mxu1  ;;  %v6673_v3 = vld [vmem:[%s7063_s21 + $0x4c] sm:$0xff]  }
 0x141   : > { %v6672_v7 = vld [vmem:[%s7063_s21 + $0x44] sm:$0xff]   ;;  %v3248_v15 = vshll.u32 %v6673_v3, 16  ;;  %v3252_v31 = vshrl.u32 %v6673_v3, 16 }
 0x142   : > { %6302 = vmatmul.mubr.msk.bf16.gmra.mrb[152].mxu0 %vm422_vm1, %v6664_v2  ;;  %2016 = vst [vmem:[#allocation2 + $0xa8] sm:$0xff] %v1947_v11  ;;  %6440 = vmatmul.mubr.msk.bf16.gmra.mrb[148].mxu1 %vm422_vm1, %v3211_v8  ;;  %v3242_v2 = vrot.slane %v3240_v61, 1 }
 0x143   : > { %6305 = vmatprep.mubr.msk.bf16.mxu0 %vm7014_vm0, %v7013_v1  ;;  %6443 = vmatprep.mubr.msk.bf16.mxu1 %vm7014_vm0, %v7013_v1 }
 0x144   : > { %v3243_v13 = vsel %vm1154_vm2, %v3238_v0, %v3242_v2 }
 0x145   : > { %v658_v16 = vpop.f32.mrb[48].mxu0  ;;  %v1667_v17 = vpop.f32.mrb[44].mxu1 }
 0x146   : > { %v6055_v18 = vpop.f32.mrb[49].mxu0  ;;  %v1948_v20 = vadd.f32 %v1667_v17, %v650_v62  ;;  %v6193_v21 = vpop.f32.mrb[45].mxu1 }
 0x147   : > { %v661_v22 = vpop.f32.mrb[50].mxu0  ;;  %v1670_v23 = vpop.f32.mrb[46].mxu1  ;;  %v3246_v18 = vor.u32 %v3244_v14, %v3242_v2 }
 0x148   : > { %v6056_v24 = vpop.f32.mrb[51].mxu0  ;;  %2017 = vst [vmem:[#allocation2 + $0xb0] sm:$0xff] %v1948_v20  ;;  %v1949_v28 = vadd.f32 %v1670_v23, %v653_v5  ;;  %v6194_v29 = vpop.f32.mrb[47].mxu1  ;;  %v6675_v20 = vld [vmem:[%s7063_s21 + $0x54] sm:$0xff]  }
 0x149   : > { %v6674_v24 = vld [vmem:[%s7063_s21 + $0x4c] sm:$0xff]   ;;  %v3256_v32 = vshll.u32 %v6675_v20, 16  ;;  %v3260_v48 = vshrl.u32 %v6675_v20, 16 }
 0x14a   : > { %6306 = vmatmul.mubr.msk.bf16.gmra.mrb[156].mxu0 %vm422_vm1, %v6666_v19  ;;  %2018 = vst [vmem:[#allocation2 + $0xb8] sm:$0xff] %v1949_v28  ;;  %6444 = vmatmul.mubr.msk.bf16.gmra.mrb[152].mxu1 %vm422_vm1, %v3219_v25  ;;  %v3250_v19 = vrot.slane %v3248_v15, 1 }
 0x14b   : > { %6309 = vmatprep.mubr.msk.bf16.mxu0 %vm7014_vm0, %v7013_v1  ;;  %6447 = vmatprep.mubr.msk.bf16.mxu1 %vm7014_vm0, %v7013_v1 }
 0x14c   : > { %v3251_v30 = vsel %vm1154_vm2, %v3246_v18, %v3250_v19 }
 0x14d   : > { %v666_v33 = vpop.f32.mrb[52].mxu0  ;;  %v1675_v34 = vpop.f32.mrb[48].mxu1 }
 0x14e   : > { %v6059_v35 = vpop.f32.mrb[53].mxu0  ;;  %v1950_v37 = vadd.f32 %v1675_v34, %v658_v16  ;;  %v6197_v38 = vpop.f32.mrb[49].mxu1 }
 0x14f   : > { %v669_v39 = vpop.f32.mrb[54].mxu0  ;;  %v1678_v40 = vpop.f32.mrb[50].mxu1  ;;  %v3254_v35 = vor.u32 %v3252_v31, %v3250_v19 }
 0x150   : > { %v6060_v41 = vpop.f32.mrb[55].mxu0  ;;  %2019 = vst [vmem:[#allocation2 + $0xc0] sm:$0xff] %v1950_v37  ;;  %v1951_v45 = vadd.f32 %v1678_v40, %v661_v22  ;;  %v6198_v46 = vpop.f32.mrb[51].mxu1  ;;  %v6677_v37 = vld [vmem:[%s7063_s21 + $0x5c] sm:$0xff]  }
 0x151   : > { %v6676_v41 = vld [vmem:[%s7063_s21 + $0x54] sm:$0xff]   ;;  %v3264_v49 = vshll.u32 %v6677_v37, 16  ;;  %v3268_v2 = vshrl.u32 %v6677_v37, 16 }
 0x152   : > { %6310 = vmatmul.mubr.msk.bf16.gmra.mrb[160].mxu0 %vm422_vm1, %v6668_v36  ;;  %2020 = vst [vmem:[#allocation2 + $0xc8] sm:$0xff] %v1951_v45  ;;  %6448 = vmatmul.mubr.msk.bf16.gmra.mrb[156].mxu1 %vm422_vm1, %v3227_v42  ;;  %v3258_v36 = vrot.slane %v3256_v32, 1 }
 0x153   : > { %6313 = vmatprep.mubr.msk.bf16.mxu0 %vm7014_vm0, %v7013_v1  ;;  %6451 = vmatprep.mubr.msk.bf16.mxu1 %vm7014_vm0, %v7013_v1 }
 0x154   : > { %v3259_v47 = vsel %vm1154_vm2, %v3254_v35, %v3258_v36 }
 0x155   : > { %v674_v50 = vpop.f32.mrb[56].mxu0  ;;  %v1683_v51 = vpop.f32.mrb[52].mxu1 }
 0x156   : > { %v6063_v52 = vpop.f32.mrb[57].mxu0  ;;  %v1952_v54 = vadd.f32 %v1683_v51, %v666_v33  ;;  %v6201_v55 = vpop.f32.mrb[53].mxu1 }
 0x157   : > { %v677_v56 = vpop.f32.mrb[58].mxu0  ;;  %v1686_v57 = vpop.f32.mrb[54].mxu1  ;;  %v3262_v52 = vor.u32 %v3260_v48, %v3258_v36 }
 0x158   : > { %v6064_v58 = vpop.f32.mrb[59].mxu0  ;;  %2021 = vst [vmem:[#allocation2 + $0xd0] sm:$0xff] %v1952_v54  ;;  %v1953_v62 = vadd.f32 %v1686_v57, %v669_v39  ;;  %v6202_v63 = vpop.f32.mrb[55].mxu1  ;;  %v6679_v54 = vld [vmem:[%s7063_s21 + $0x64] sm:$0xff]  }
 0x159   : > { %v6678_v58 = vld [vmem:[%s7063_s21 + $0x5c] sm:$0xff]   ;;  %v3272_v3 = vshll.u32 %v6679_v54, 16  ;;  %v3276_v19 = vshrl.u32 %v6679_v54, 16 }
 0x15a   : > { %6314 = vmatmul.mubr.msk.bf16.gmra.mrb[164].mxu0 %vm422_vm1, %v6670_v53  ;;  %2022 = vst [vmem:[#allocation2 + $0xd8] sm:$0xff] %v1953_v62  ;;  %6452 = vmatmul.mubr.msk.bf16.gmra.mrb[160].mxu1 %vm422_vm1, %v3235_v59  ;;  %v3266_v53 = vrot.slane %v3264_v49, 1 }
 0x15b   : > { %6317 = vmatprep.mubr.msk.bf16.mxu0 %vm7014_vm0, %v7013_v1  ;;  %6455 = vmatprep.mubr.msk.bf16.mxu1 %vm7014_vm0, %v7013_v1 }
 0x15c   : > { %v3267_v0 = vsel %vm1154_vm2, %v3262_v52, %v3266_v53 }
 0x15d   : > { %v682_v4 = vpop.f32.mrb[60].mxu0  ;;  %v1691_v5 = vpop.f32.mrb[56].mxu1 }
 0x15e   : > { %v6067_v6 = vpop.f32.mrb[61].mxu0  ;;  %v1954_v8 = vadd.f32 %v1691_v5, %v674_v50  ;;  %v6205_v9 = vpop.f32.mrb[57].mxu1 }
 0x15f   : > { %v685_v10 = vpop.f32.mrb[62].mxu0  ;;  %v1694_v11 = vpop.f32.mrb[58].mxu1  ;;  %v3270_v6 = vor.u32 %v3268_v2, %v3266_v53 }
 0x160   : > { %v6068_v12 = vpop.f32.mrb[63].mxu0  ;;  %2023 = vst [vmem:[#allocation2 + $0xe0] sm:$0xff] %v1954_v8  ;;  %v1955_v16 = vadd.f32 %v1694_v11, %v677_v56  ;;  %v6206_v17 = vpop.f32.mrb[59].mxu1  ;;  %v6681_v8 = vld [vmem:[%s7063_s21 + $0x6c] sm:$0xff]  }
 0x161   : > { %v6680_v12 = vld [vmem:[%s7063_s21 + $0x64] sm:$0xff]   ;;  %v3280_v20 = vshll.u32 %v6681_v8, 16  ;;  %v3284_v36 = vshrl.u32 %v6681_v8, 16 }
 0x162   : > { %6318 = vmatmul.mubr.msk.bf16.gmra.mrb[168].mxu0 %vm422_vm1, %v6672_v7  ;;  %2024 = vst [vmem:[#allocation2 + $0xe8] sm:$0xff] %v1955_v16  ;;  %6456 = vmatmul.mubr.msk.bf16.gmra.mrb[164].mxu1 %vm422_vm1, %v3243_v13  ;;  %v3274_v7 = vrot.slane %v3272_v3, 1 }
 0x163   : > { %6321 = vmatprep.mubr.msk.bf16.mxu0 %vm7014_vm0, %v7013_v1  ;;  %6459 = vmatprep.mubr.msk.bf16.mxu1 %vm7014_vm0, %v7013_v1 }
 0x164   : > { %v3275_v18 = vsel %vm1154_vm2, %v3270_v6, %v3274_v7 }
 0x165   : > { %v690_v21 = vpop.f32.mrb[64].mxu0  ;;  %v1699_v22 = vpop.f32.mrb[60].mxu1 }
 0x166   : > { %v6071_v23 = vpop.f32.mrb[65].mxu0  ;;  %v1956_v25 = vadd.f32 %v1699_v22, %v682_v4  ;;  %v6209_v26 = vpop.f32.mrb[61].mxu1 }
 0x167   : > { %v693_v27 = vpop.f32.mrb[66].mxu0  ;;  %v1702_v28 = vpop.f32.mrb[62].mxu1  ;;  %v3278_v23 = vor.u32 %v3276_v19, %v3274_v7 }
 0x168   : > { %v6072_v29 = vpop.f32.mrb[67].mxu0  ;;  %2025 = vst [vmem:[#allocation2 + $0xf0] sm:$0xff] %v1956_v25  ;;  %v1957_v33 = vadd.f32 %v1702_v28, %v685_v10  ;;  %v6210_v34 = vpop.f32.mrb[63].mxu1  ;;  %v6683_v25 = vld [vmem:[%s7063_s21 + $0x74] sm:$0xff]  }
 0x169   : > { %v6682_v29 = vld [vmem:[%s7063_s21 + $0x6c] sm:$0xff]   ;;  %v3288_v37 = vshll.u32 %v6683_v25, 16  ;;  %v3292_v53 = vshrl.u32 %v6683_v25, 16 }
 0x16a   : > { %6322 = vmatmul.mubr.msk.bf16.gmra.mrb[172].mxu0 %vm422_vm1, %v6674_v24  ;;  %2026 = vst [vmem:[#allocation2 + $0xf8] sm:$0xff] %v1957_v33  ;;  %6460 = vmatmul.mubr.msk.bf16.gmra.mrb[168].mxu1 %vm422_vm1, %v3251_v30  ;;  %v3282_v24 = vrot.slane %v3280_v20, 1 }
 0x16b   : > { %6325 = vmatprep.mubr.msk.bf16.mxu0 %vm7014_vm0, %v7013_v1  ;;  %6463 = vmatprep.mubr.msk.bf16.mxu1 %vm7014_vm0, %v7013_v1 }
 0x16c   : > { %v3283_v35 = vsel %vm1154_vm2, %v3278_v23, %v3282_v24 }
 0x16d   : > { %v698_v38 = vpop.f32.mrb[68].mxu0  ;;  %v1707_v39 = vpop.f32.mrb[64].mxu1 }
 0x16e   : > { %v6075_v40 = vpop.f32.mrb[69].mxu0  ;;  %v1958_v42 = vadd.f32 %v1707_v39, %v690_v21  ;;  %v6213_v43 = vpop.f32.mrb[65].mxu1 }
 0x16f   : > { %v701_v44 = vpop.f32.mrb[70].mxu0  ;;  %v1710_v45 = vpop.f32.mrb[66].mxu1  ;;  %v3286_v40 = vor.u32 %v3284_v36, %v3282_v24 }
 0x170   : > { %v6076_v46 = vpop.f32.mrb[71].mxu0  ;;  %2027 = vst [vmem:[#allocation2 + $0x100] sm:$0xff] %v1958_v42  ;;  %v1959_v50 = vadd.f32 %v1710_v45, %v693_v27  ;;  %v6214_v51 = vpop.f32.mrb[67].mxu1  ;;  %v6685_v42 = vld [vmem:[%s7063_s21 + $0x7c] sm:$0xff]  }
 0x171   : > { %v6684_v46 = vld [vmem:[%s7063_s21 + $0x74] sm:$0xff]   ;;  %v3296_v54 = vshll.u32 %v6685_v42, 16  ;;  %v3300_v7 = vshrl.u32 %v6685_v42, 16 }
 0x172   : > { %6326 = vmatmul.mubr.msk.bf16.gmra.mrb[176].mxu0 %vm422_vm1, %v6676_v41  ;;  %2028 = vst [vmem:[#allocation2 + $0x108] sm:$0xff] %v1959_v50  ;;  %6464 = vmatmul.mubr.msk.bf16.gmra.mrb[172].mxu1 %vm422_vm1, %v3259_v47  ;;  %v3290_v41 = vrot.slane %v3288_v37, 1 }
 0x173   : > { %6329 = vmatprep.mubr.msk.bf16.mxu0 %vm7014_vm0, %v7013_v1  ;;  %6467 = vmatprep.mubr.msk.bf16.mxu1 %vm7014_vm0, %v7013_v1 }
 0x174   : > { %v3291_v52 = vsel %vm1154_vm2, %v3286_v40, %v3290_v41 }
 0x175   : > { %v706_v55 = vpop.f32.mrb[72].mxu0  ;;  %v1715_v56 = vpop.f32.mrb[68].mxu1 }
 0x176   : > { %v6079_v57 = vpop.f32.mrb[73].mxu0  ;;  %v1960_v59 = vadd.f32 %v1715_v56, %v698_v38  ;;  %v6217_v60 = vpop.f32.mrb[69].mxu1 }
 0x177   : > { %v709_v61 = vpop.f32.mrb[74].mxu0  ;;  %v1718_v62 = vpop.f32.mrb[70].mxu1  ;;  %v3294_v57 = vor.u32 %v3292_v53, %v3290_v41 }
 0x178   : > { %v6080_v63 = vpop.f32.mrb[75].mxu0  ;;  %2029 = vst [vmem:[#allocation2 + $0x110] sm:$0xff] %v1960_v59  ;;  %v1961_v4 = vadd.f32 %v1718_v62, %v701_v44  ;;  %v6218_v5 = vpop.f32.mrb[71].mxu1  ;;  %v6687_v59 = vld [vmem:[%s7063_s21 + $0x84] sm:$0xff]  }
 0x179   : > { %v6686_v63 = vld [vmem:[%s7063_s21 + $0x7c] sm:$0xff]   ;;  %v3304_v8 = vshll.u32 %v6687_v59, 16  ;;  %v3308_v24 = vshrl.u32 %v6687_v59, 16 }
 0x17a   : > { %6330 = vmatmul.mubr.msk.bf16.gmra.mrb[180].mxu0 %vm422_vm1, %v6678_v58  ;;  %2030 = vst [vmem:[#allocation2 + $0x118] sm:$0xff] %v1961_v4  ;;  %6468 = vmatmul.mubr.msk.bf16.gmra.mrb[176].mxu1 %vm422_vm1, %v3267_v0  ;;  %v3298_v58 = vrot.slane %v3296_v54, 1 }
 0x17b   : > { %6333 = vmatprep.mubr.msk.bf16.mxu0 %vm7014_vm0, %v7013_v1  ;;  %6471 = vmatprep.mubr.msk.bf16.mxu1 %vm7014_vm0, %v7013_v1 }
 0x17c   : > { %v3299_v6 = vsel %vm1154_vm2, %v3294_v57, %v3298_v58 }
 0x17d   : > { %v714_v9 = vpop.f32.mrb[76].mxu0  ;;  %v1723_v10 = vpop.f32.mrb[72].mxu1 }
 0x17e   : > { %v6083_v11 = vpop.f32.mrb[77].mxu0  ;;  %v1962_v13 = vadd.f32 %v1723_v10, %v706_v55  ;;  %v6221_v14 = vpop.f32.mrb[73].mxu1 }
 0x17f   : > { %v717_v15 = vpop.f32.mrb[78].mxu0  ;;  %v1726_v16 = vpop.f32.mrb[74].mxu1  ;;  %v3302_v11 = vor.u32 %v3300_v7, %v3298_v58 }
 0x180   : > { %v6084_v17 = vpop.f32.mrb[79].mxu0  ;;  %2031 = vst [vmem:[#allocation2 + $0x120] sm:$0xff] %v1962_v13  ;;  %v1963_v21 = vadd.f32 %v1726_v16, %v709_v61  ;;  %v6222_v22 = vpop.f32.mrb[75].mxu1  ;;  %v6689_v13 = vld [vmem:[%s7063_s21 + $0x8c] sm:$0xff]  }
 0x181   : > { %v6688_v17 = vld [vmem:[%s7063_s21 + $0x84] sm:$0xff]   ;;  %v3312_v25 = vshll.u32 %v6689_v13, 16  ;;  %v3316_v41 = vshrl.u32 %v6689_v13, 16 }
 0x182   : > { %6334 = vmatmul.mubr.msk.bf16.gmra.mrb[184].mxu0 %vm422_vm1, %v6680_v12  ;;  %2032 = vst [vmem:[#allocation2 + $0x128] sm:$0xff] %v1963_v21  ;;  %6472 = vmatmul.mubr.msk.bf16.gmra.mrb[180].mxu1 %vm422_vm1, %v3275_v18  ;;  %v3306_v12 = vrot.slane %v3304_v8, 1 }
 0x183   : > { %6337 = vmatprep.mubr.msk.bf16.mxu0 %vm7014_vm0, %v7013_v1  ;;  %6475 = vmatprep.mubr.msk.bf16.mxu1 %vm7014_vm0, %v7013_v1 }
 0x184   : > { %v3307_v23 = vsel %vm1154_vm2, %v3302_v11, %v3306_v12 }
 0x185   : > { %v722_v26 = vpop.f32.mrb[80].mxu0  ;;  %v1731_v27 = vpop.f32.mrb[76].mxu1 }
 0x186   : > { %v6087_v28 = vpop.f32.mrb[81].mxu0  ;;  %v1964_v30 = vadd.f32 %v1731_v27, %v714_v9  ;;  %v6225_v31 = vpop.f32.mrb[77].mxu1 }
 0x187   : > { %v725_v32 = vpop.f32.mrb[82].mxu0  ;;  %v1734_v33 = vpop.f32.mrb[78].mxu1  ;;  %v3310_v28 = vor.u32 %v3308_v24, %v3306_v12 }
 0x188   : > { %v6088_v34 = vpop.f32.mrb[83].mxu0  ;;  %2033 = vst [vmem:[#allocation2 + $0x130] sm:$0xff] %v1964_v30  ;;  %v1965_v38 = vadd.f32 %v1734_v33, %v717_v15  ;;  %v6226_v39 = vpop.f32.mrb[79].mxu1  ;;  %v6691_v30 = vld [vmem:[%s7063_s21 + $0x94] sm:$0xff]  }
 0x189   : > { %v6690_v34 = vld [vmem:[%s7063_s21 + $0x8c] sm:$0xff]   ;;  %v3320_v42 = vshll.u32 %v6691_v30, 16  ;;  %v3324_v58 = vshrl.u32 %v6691_v30, 16 }
 0x18a   : > { %6338 = vmatmul.mubr.msk.bf16.gmra.mrb[188].mxu0 %vm422_vm1, %v6682_v29  ;;  %2034 = vst [vmem:[#allocation2 + $0x138] sm:$0xff] %v1965_v38  ;;  %6476 = vmatmul.mubr.msk.bf16.gmra.mrb[184].mxu1 %vm422_vm1, %v3283_v35  ;;  %v3314_v29 = vrot.slane %v3312_v25, 1 }
 0x18b   : > { %6341 = vmatprep.mubr.msk.bf16.mxu0 %vm7014_vm0, %v7013_v1  ;;  %6479 = vmatprep.mubr.msk.bf16.mxu1 %vm7014_vm0, %v7013_v1 }
 0x18c   : > { %v3315_v40 = vsel %vm1154_vm2, %v3310_v28, %v3314_v29 }
 0x18d   : > { %v730_v43 = vpop.f32.mrb[84].mxu0  ;;  %v1739_v44 = vpop.f32.mrb[80].mxu1 }
 0x18e   : > { %v6091_v45 = vpop.f32.mrb[85].mxu0  ;;  %v1966_v47 = vadd.f32 %v1739_v44, %v722_v26  ;;  %v6229_v48 = vpop.f32.mrb[81].mxu1 }
 0x18f   : > { %v733_v49 = vpop.f32.mrb[86].mxu0  ;;  %v1742_v50 = vpop.f32.mrb[82].mxu1  ;;  %v3318_v45 = vor.u32 %v3316_v41, %v3314_v29 }
 0x190   : > { %v6092_v51 = vpop.f32.mrb[87].mxu0  ;;  %2035 = vst [vmem:[#allocation2 + $0x140] sm:$0xff] %v1966_v47  ;;  %v1967_v55 = vadd.f32 %v1742_v50, %v725_v32  ;;  %v6230_v56 = vpop.f32.mrb[83].mxu1  ;;  %v6693_v47 = vld [vmem:[%s7063_s21 + $0x9c] sm:$0xff]  }
 0x191   : > { %v6692_v51 = vld [vmem:[%s7063_s21 + $0x94] sm:$0xff]   ;;  %v3328_v59 = vshll.u32 %v6693_v47, 16  ;;  %v3332_v12 = vshrl.u32 %v6693_v47, 16 }
 0x192   : > { %6342 = vmatmul.mubr.msk.bf16.gmra.mrb[192].mxu0 %vm422_vm1, %v6684_v46  ;;  %2036 = vst [vmem:[#allocation2 + $0x148] sm:$0xff] %v1967_v55  ;;  %6480 = vmatmul.mubr.msk.bf16.gmra.mrb[188].mxu1 %vm422_vm1, %v3291_v52  ;;  %v3322_v46 = vrot.slane %v3320_v42, 1 }
 0x193   : > { %6345 = vmatprep.mubr.msk.bf16.mxu0 %vm7014_vm0, %v7013_v1  ;;  %6483 = vmatprep.mubr.msk.bf16.mxu1 %vm7014_vm0, %v7013_v1 }
 0x194   : > { %v3323_v57 = vsel %vm1154_vm2, %v3318_v45, %v3322_v46 }
 0x195   : > { %v738_v60 = vpop.f32.mrb[88].mxu0  ;;  %v1747_v61 = vpop.f32.mrb[84].mxu1 }
 0x196   : > { %v6095_v62 = vpop.f32.mrb[89].mxu0  ;;  %v1968_v0 = vadd.f32 %v1747_v61, %v730_v43  ;;  %v6233_v2 = vpop.f32.mrb[85].mxu1 }
 0x197   : > { %v741_v3 = vpop.f32.mrb[90].mxu0  ;;  %v1750_v4 = vpop.f32.mrb[86].mxu1  ;;  %v3326_v62 = vor.u32 %v3324_v58, %v3322_v46 }
 0x198   : > { %v6096_v5 = vpop.f32.mrb[91].mxu0  ;;  %2037 = vst [vmem:[#allocation2 + $0x150] sm:$0xff] %v1968_v0  ;;  %v1969_v9 = vadd.f32 %v1750_v4, %v733_v49  ;;  %v6234_v10 = vpop.f32.mrb[87].mxu1  ;;  %v6695_v0 = vld [vmem:[%s7063_s21 + $0xa4] sm:$0xff]  }
 0x199   : > { %v6694_v5 = vld [vmem:[%s7063_s21 + $0x9c] sm:$0xff]   ;;  %v3336_v13 = vshll.u32 %v6695_v0, 16  ;;  %v3340_v29 = vshrl.u32 %v6695_v0, 16 }
 0x19a   : > { %6346 = vmatmul.mubr.msk.bf16.gmra.mrb[196].mxu0 %vm422_vm1, %v6686_v63  ;;  %2038 = vst [vmem:[#allocation2 + $0x158] sm:$0xff] %v1969_v9  ;;  %6484 = vmatmul.mubr.msk.bf16.gmra.mrb[192].mxu1 %vm422_vm1, %v3299_v6  ;;  %v3330_v63 = vrot.slane %v3328_v59, 1 }
 0x19b   : > { %6349 = vmatprep.mubr.msk.bf16.mxu0 %vm7014_vm0, %v7013_v1  ;;  %6487 = vmatprep.mubr.msk.bf16.mxu1 %vm7014_vm0, %v7013_v1 }
 0x19c   : > { %v3331_v11 = vsel %vm1154_vm2, %v3326_v62, %v3330_v63 }
 0x19d   : > { %v746_v14 = vpop.f32.mrb[92].mxu0  ;;  %v1755_v15 = vpop.f32.mrb[88].mxu1 }
 0x19e   : > { %v6099_v16 = vpop.f32.mrb[93].mxu0  ;;  %v1970_v18 = vadd.f32 %v1755_v15, %v738_v60  ;;  %v6237_v19 = vpop.f32.mrb[89].mxu1 }
 0x19f   : > { %v749_v20 = vpop.f32.mrb[94].mxu0  ;;  %v1758_v21 = vpop.f32.mrb[90].mxu1  ;;  %v3334_v16 = vor.u32 %v3332_v12, %v3330_v63 }
 0x1a0   : > { %v6100_v22 = vpop.f32.mrb[95].mxu0  ;;  %2039 = vst [vmem:[#allocation2 + $0x160] sm:$0xff] %v1970_v18  ;;  %v1971_v26 = vadd.f32 %v1758_v21, %v741_v3  ;;  %v6238_v27 = vpop.f32.mrb[91].mxu1  ;;  %v6697_v18 = vld [vmem:[%s7063_s21 + $0xac] sm:$0xff]  }
 0x1a1   : > { %v6696_v22 = vld [vmem:[%s7063_s21 + $0xa4] sm:$0xff]   ;;  %v3344_v30 = vshll.u32 %v6697_v18, 16  ;;  %v3348_v46 = vshrl.u32 %v6697_v18, 16 }
 0x1a2   : > { %6350 = vmatmul.mubr.msk.bf16.gmra.mrb[200].mxu0 %vm422_vm1, %v6688_v17  ;;  %2040 = vst [vmem:[#allocation2 + $0x168] sm:$0xff] %v1971_v26  ;;  %6488 = vmatmul.mubr.msk.bf16.gmra.mrb[196].mxu1 %vm422_vm1, %v3307_v23  ;;  %v3338_v17 = vrot.slane %v3336_v13, 1 }
 0x1a3   : > { %6353 = vmatprep.mubr.msk.bf16.mxu0 %vm7014_vm0, %v7013_v1  ;;  %6491 = vmatprep.mubr.msk.bf16.mxu1 %vm7014_vm0, %v7013_v1 }
 0x1a4   : > { %v3339_v28 = vsel %vm1154_vm2, %v3334_v16, %v3338_v17 }
 0x1a5   : > { %v754_v31 = vpop.f32.mrb[96].mxu0  ;;  %v1763_v32 = vpop.f32.mrb[92].mxu1 }
 0x1a6   : > { %v6103_v33 = vpop.f32.mrb[97].mxu0  ;;  %v1972_v35 = vadd.f32 %v1763_v32, %v746_v14  ;;  %v6241_v36 = vpop.f32.mrb[93].mxu1 }
 0x1a7   : > { %v757_v37 = vpop.f32.mrb[98].mxu0  ;;  %v1766_v38 = vpop.f32.mrb[94].mxu1  ;;  %v3342_v33 = vor.u32 %v3340_v29, %v3338_v17 }
 0x1a8   : > { %v6104_v39 = vpop.f32.mrb[99].mxu0  ;;  %2041 = vst [vmem:[#allocation2 + $0x170] sm:$0xff] %v1972_v35  ;;  %v1973_v43 = vadd.f32 %v1766_v38, %v749_v20  ;;  %v6242_v44 = vpop.f32.mrb[95].mxu1  ;;  %v6699_v35 = vld [vmem:[%s7063_s21 + $0xb4] sm:$0xff]  }
 0x1a9   : > { %v6698_v39 = vld [vmem:[%s7063_s21 + $0xac] sm:$0xff]   ;;  %v3352_v47 = vshll.u32 %v6699_v35, 16  ;;  %v3356_v63 = vshrl.u32 %v6699_v35, 16 }
 0x1aa   : > { %6354 = vmatmul.mubr.msk.bf16.gmra.mrb[204].mxu0 %vm422_vm1, %v6690_v34  ;;  %2042 = vst [vmem:[#allocation2 + $0x178] sm:$0xff] %v1973_v43  ;;  %6492 = vmatmul.mubr.msk.bf16.gmra.mrb[200].mxu1 %vm422_vm1, %v3315_v40  ;;  %v3346_v34 = vrot.slane %v3344_v30, 1 }
 0x1ab   : > { %6357 = vmatprep.mubr.msk.bf16.mxu0 %vm7014_vm0, %v7013_v1  ;;  %6495 = vmatprep.mubr.msk.bf16.mxu1 %vm7014_vm0, %v7013_v1 }
 0x1ac   : > { %v3347_v45 = vsel %vm1154_vm2, %v3342_v33, %v3346_v34 }
 0x1ad   : > { %v762_v48 = vpop.f32.mrb[100].mxu0  ;;  %v1771_v49 = vpop.f32.mrb[96].mxu1 }
 0x1ae   : > { %v6107_v50 = vpop.f32.mrb[101].mxu0  ;;  %v1974_v52 = vadd.f32 %v1771_v49, %v754_v31  ;;  %v6245_v53 = vpop.f32.mrb[97].mxu1 }
 0x1af   : > { %v765_v54 = vpop.f32.mrb[102].mxu0  ;;  %v1774_v55 = vpop.f32.mrb[98].mxu1  ;;  %v3350_v50 = vor.u32 %v3348_v46, %v3346_v34 }
 0x1b0   : > { %v6108_v56 = vpop.f32.mrb[103].mxu0  ;;  %2043 = vst [vmem:[#allocation2 + $0x180] sm:$0xff] %v1974_v52  ;;  %v1975_v60 = vadd.f32 %v1774_v55, %v757_v37  ;;  %v6246_v61 = vpop.f32.mrb[99].mxu1  ;;  %v6701_v52 = vld [vmem:[%s7063_s21 + $0xbc] sm:$0xff]  }
 0x1b1   : > { %v6700_v56 = vld [vmem:[%s7063_s21 + $0xb4] sm:$0xff]   ;;  %v3360_v0 = vshll.u32 %v6701_v52, 16  ;;  %v3364_v17 = vshrl.u32 %v6701_v52, 16 }
 0x1b2   : > { %6358 = vmatmul.mubr.msk.bf16.gmra.mrb[208].mxu0 %vm422_vm1, %v6692_v51  ;;  %2044 = vst [vmem:[#allocation2 + $0x188] sm:$0xff] %v1975_v60  ;;  %6496 = vmatmul.mubr.msk.bf16.gmra.mrb[204].mxu1 %vm422_vm1, %v3323_v57  ;;  %v3354_v51 = vrot.slane %v3352_v47, 1 }
 0x1b3   : > { %6361 = vmatprep.mubr.msk.bf16.mxu0 %vm7014_vm0, %v7013_v1  ;;  %6499 = vmatprep.mubr.msk.bf16.mxu1 %vm7014_vm0, %v7013_v1 }
 0x1b4   : > { %v3355_v62 = vsel %vm1154_vm2, %v3350_v50, %v3354_v51 }
 0x1b5   : > { %v770_v2 = vpop.f32.mrb[104].mxu0  ;;  %v1779_v3 = vpop.f32.mrb[100].mxu1 }
 0x1b6   : > { %v6111_v4 = vpop.f32.mrb[105].mxu0  ;;  %v1976_v6 = vadd.f32 %v1779_v3, %v762_v48  ;;  %v6249_v7 = vpop.f32.mrb[101].mxu1 }
 0x1b7   : > { %v773_v8 = vpop.f32.mrb[106].mxu0  ;;  %v1782_v9 = vpop.f32.mrb[102].mxu1  ;;  %v3358_v4 = vor.u32 %v3356_v63, %v3354_v51 }
 0x1b8   : > { %v6112_v10 = vpop.f32.mrb[107].mxu0  ;;  %2045 = vst [vmem:[#allocation2 + $0x190] sm:$0xff] %v1976_v6  ;;  %v1977_v14 = vadd.f32 %v1782_v9, %v765_v54  ;;  %v6250_v15 = vpop.f32.mrb[103].mxu1  ;;  %v6703_v6 = vld [vmem:[%s7063_s21 + $0xc4] sm:$0xff]  }
 0x1b9   : > { %v6702_v10 = vld [vmem:[%s7063_s21 + $0xbc] sm:$0xff]   ;;  %v3368_v18 = vshll.u32 %v6703_v6, 16  ;;  %v3372_v34 = vshrl.u32 %v6703_v6, 16 }
 0x1ba   : > { %6362 = vmatmul.mubr.msk.bf16.gmra.mrb[212].mxu0 %vm422_vm1, %v6694_v5  ;;  %2046 = vst [vmem:[#allocation2 + $0x198] sm:$0xff] %v1977_v14  ;;  %6500 = vmatmul.mubr.msk.bf16.gmra.mrb[208].mxu1 %vm422_vm1, %v3331_v11  ;;  %v3362_v5 = vrot.slane %v3360_v0, 1 }
 0x1bb   : > { %6365 = vmatprep.mubr.msk.bf16.mxu0 %vm7014_vm0, %v7013_v1  ;;  %6503 = vmatprep.mubr.msk.bf16.mxu1 %vm7014_vm0, %v7013_v1 }
 0x1bc   : > { %v3363_v16 = vsel %vm1154_vm2, %v3358_v4, %v3362_v5 }
 0x1bd   : > { %v778_v19 = vpop.f32.mrb[108].mxu0  ;;  %v1787_v20 = vpop.f32.mrb[104].mxu1 }
 0x1be   : > { %v6115_v21 = vpop.f32.mrb[109].mxu0  ;;  %v1978_v23 = vadd.f32 %v1787_v20, %v770_v2  ;;  %v6253_v24 = vpop.f32.mrb[105].mxu1 }
 0x1bf   : > { %v781_v25 = vpop.f32.mrb[110].mxu0  ;;  %v1790_v26 = vpop.f32.mrb[106].mxu1  ;;  %v3366_v21 = vor.u32 %v3364_v17, %v3362_v5 }
 0x1c0   : > { %v6116_v27 = vpop.f32.mrb[111].mxu0  ;;  %2047 = vst [vmem:[#allocation2 + $0x1a0] sm:$0xff] %v1978_v23  ;;  %v1979_v31 = vadd.f32 %v1790_v26, %v773_v8  ;;  %v6254_v32 = vpop.f32.mrb[107].mxu1  ;;  %v6705_v23 = vld [vmem:[%s7063_s21 + $0xcc] sm:$0xff]  }
 0x1c1   : > { %v6704_v27 = vld [vmem:[%s7063_s21 + $0xc4] sm:$0xff]   ;;  %v3376_v35 = vshll.u32 %v6705_v23, 16  ;;  %v3380_v51 = vshrl.u32 %v6705_v23, 16 }
 0x1c2   : > { %6366 = vmatmul.mubr.msk.bf16.gmra.mrb[216].mxu0 %vm422_vm1, %v6696_v22  ;;  %2048 = vst [vmem:[#allocation2 + $0x1a8] sm:$0xff] %v1979_v31  ;;  %6504 = vmatmul.mubr.msk.bf16.gmra.mrb[212].mxu1 %vm422_vm1, %v3339_v28  ;;  %v3370_v22 = vrot.slane %v3368_v18, 1 }
 0x1c3   : > { %6369 = vmatprep.mubr.msk.bf16.mxu0 %vm7014_vm0, %v7013_v1  ;;  %6507 = vmatprep.mubr.msk.bf16.mxu1 %vm7014_vm0, %v7013_v1 }
 0x1c4   : > { %v3371_v33 = vsel %vm1154_vm2, %v3366_v21, %v3370_v22 }
 0x1c5   : > { %v786_v36 = vpop.f32.mrb[112].mxu0  ;;  %v1795_v37 = vpop.f32.mrb[108].mxu1 }
 0x1c6   : > { %v6119_v38 = vpop.f32.mrb[113].mxu0  ;;  %v1980_v40 = vadd.f32 %v1795_v37, %v778_v19  ;;  %v6257_v41 = vpop.f32.mrb[109].mxu1 }
 0x1c7   : > { %v789_v42 = vpop.f32.mrb[114].mxu0  ;;  %v1798_v43 = vpop.f32.mrb[110].mxu1  ;;  %v3374_v38 = vor.u32 %v3372_v34, %v3370_v22 }
 0x1c8   : > { %v6120_v44 = vpop.f32.mrb[115].mxu0  ;;  %2049 = vst [vmem:[#allocation2 + $0x1b0] sm:$0xff] %v1980_v40  ;;  %v1981_v48 = vadd.f32 %v1798_v43, %v781_v25  ;;  %v6258_v49 = vpop.f32.mrb[111].mxu1  ;;  %v6707_v40 = vld [vmem:[%s7063_s21 + $0xd4] sm:$0xff]  }
 0x1c9   : > { %v6706_v44 = vld [vmem:[%s7063_s21 + $0xcc] sm:$0xff]   ;;  %v3384_v52 = vshll.u32 %v6707_v40, 16  ;;  %v3388_v5 = vshrl.u32 %v6707_v40, 16 }
 0x1ca   : > { %6370 = vmatmul.mubr.msk.bf16.gmra.mrb[220].mxu0 %vm422_vm1, %v6698_v39  ;;  %2050 = vst [vmem:[#allocation2 + $0x1b8] sm:$0xff] %v1981_v48  ;;  %6508 = vmatmul.mubr.msk.bf16.gmra.mrb[216].mxu1 %vm422_vm1, %v3347_v45  ;;  %v3378_v39 = vrot.slane %v3376_v35, 1 }
 0x1cb   : > { %6373 = vmatprep.mubr.msk.bf16.mxu0 %vm7014_vm0, %v7013_v1  ;;  %6511 = vmatprep.mubr.msk.bf16.mxu1 %vm7014_vm0, %v7013_v1 }
 0x1cc   : > { %v3379_v50 = vsel %vm1154_vm2, %v3374_v38, %v3378_v39 }
 0x1cd   : > { %v794_v53 = vpop.f32.mrb[116].mxu0  ;;  %v1803_v54 = vpop.f32.mrb[112].mxu1 }
 0x1ce   : > { %v6123_v55 = vpop.f32.mrb[117].mxu0  ;;  %v1982_v57 = vadd.f32 %v1803_v54, %v786_v36  ;;  %v6261_v58 = vpop.f32.mrb[113].mxu1 }
 0x1cf   : > { %v797_v59 = vpop.f32.mrb[118].mxu0  ;;  %v1806_v60 = vpop.f32.mrb[114].mxu1  ;;  %v3382_v55 = vor.u32 %v3380_v51, %v3378_v39  ;;  %v7638_v51 = vld [vmem:[%s8210_s2] ss:$0 sm:$0xff] }
 0x1d0   : > { %v6124_v61 = vpop.f32.mrb[119].mxu0  ;;  %2051 = vst [vmem:[#allocation2 + $0x1c0] sm:$0xff] %v1982_v57  ;;  %v1983_v2 = vadd.f32 %v1806_v60, %v789_v42  ;;  %v6262_v3 = vpop.f32.mrb[115].mxu1  ;;  %v6709_v57 = vld [vmem:[%s7063_s21 + $0xdc] sm:$0xff]  }
 0x1d1   : > { %v6708_v61 = vld [vmem:[%s7063_s21 + $0xd4] sm:$0xff]   ;;  %v3392_v6 = vshll.u32 %v6709_v57, 16  ;;  %v3396_v22 = vshrl.u32 %v6709_v57, 16 }
 0x1d2   : > { %6374 = vmatmul.mubr.msk.bf16.gmra.mrb[224].mxu0 %vm422_vm1, %v6700_v56  ;;  %2052 = vst [vmem:[#allocation2 + $0x1c8] sm:$0xff] %v1983_v2  ;;  %6512 = vmatmul.mubr.msk.bf16.gmra.mrb[220].mxu1 %vm422_vm1, %v3355_v62  ;;  %v3386_v56 = vrot.slane %v3384_v52, 1 }
 0x1d3   : > { %6377 = vmatprep.mubr.msk.bf16.mxu0 %vm7014_vm0, %v7013_v1  ;;  %6515 = vmatprep.mubr.msk.bf16.mxu1 %vm7014_vm0, %v7013_v1 }
 0x1d4   : > { %v3387_v4 = vsel %vm1154_vm2, %v3382_v55, %v3386_v56 }
 0x1d5   : > { %v802_v7 = vpop.f32.mrb[120].mxu0  ;;  %v1811_v8 = vpop.f32.mrb[116].mxu1 }
 0x1d6   : > { %v6127_v9 = vpop.f32.mrb[121].mxu0  ;;  %v1984_v11 = vadd.f32 %v1811_v8, %v794_v53  ;;  %v6265_v12 = vpop.f32.mrb[117].mxu1 }
 0x1d7   : > { %v805_v13 = vpop.f32.mrb[122].mxu0  ;;  %v1814_v14 = vpop.f32.mrb[118].mxu1  ;;  %v3390_v9 = vor.u32 %v3388_v5, %v3386_v56  ;;  %v2734_v5 = vld [vmem:[#allocation2 + $0x10] sm:$0xff] }
 0x1d8   : > { %v6128_v15 = vpop.f32.mrb[123].mxu0  ;;  %2053 = vst [vmem:[#allocation2 + $0x1d0] sm:$0xff] %v1984_v11  ;;  %v1985_v19 = vadd.f32 %v1814_v14, %v797_v59  ;;  %v6266_v20 = vpop.f32.mrb[119].mxu1  ;;  %v6711_v11 = vld [vmem:[%s7063_s21 + $0xe4] sm:$0xff]  }
 0x1d9   : > { %v6710_v15 = vld [vmem:[%s7063_s21 + $0xdc] sm:$0xff]   ;;  %v3400_v23 = vshll.u32 %v6711_v11, 16  ;;  %v3404_v40 = vshrl.u32 %v6711_v11, 16 }
 0x1da   : > { %6378 = vmatmul.mubr.msk.bf16.gmra.mrb[228].mxu0 %vm422_vm1, %v6702_v10  ;;  %2054 = vst [vmem:[#allocation2 + $0x1d8] sm:$0xff] %v1985_v19  ;;  %6516 = vmatmul.mubr.msk.bf16.gmra.mrb[224].mxu1 %vm422_vm1, %v3363_v16  ;;  %v3394_v10 = vrot.slane %v3392_v6, 1  ;;  %v7656_v6 = vld [vmem:[%s7063_s21 + $0xfc] sm:$0xff]  }
 0x1db   : > { %6381 = vmatprep.mubr.msk.bf16.mxu0 %vm7014_vm0, %v7013_v1  ;;  %6519 = vmatprep.mubr.msk.bf16.mxu1 %vm7014_vm0, %v7013_v1 }
 0x1dc   : > { %v3395_v21 = vsel %vm1154_vm2, %v3390_v9, %v3394_v10 }
 0x1dd   : > { %v810_v24 = vpop.f32.mrb[124].mxu0  ;;  %v1819_v25 = vpop.f32.mrb[120].mxu1 }
 0x1de   : > { %v6131_v26 = vpop.f32.mrb[125].mxu0  ;;  %v1986_v28 = vadd.f32 %v1819_v25, %v802_v7  ;;  %v6269_v29 = vpop.f32.mrb[121].mxu1 }
 0x1df   : > { %v813_v30 = vpop.f32.mrb[126].mxu0  ;;  %v1822_v31 = vpop.f32.mrb[122].mxu1  ;;  %v3398_v26 = vor.u32 %v3396_v22, %v3394_v10 }
 0x1e0   : > { %v6132_v32 = vpop.f32.mrb[127].mxu0  ;;  %2055 = vst [vmem:[#allocation2 + $0x1e0] sm:$0xff] %v1986_v28  ;;  %v1987_v36 = vadd.f32 %v1822_v31, %v805_v13  ;;  %v6270_v37 = vpop.f32.mrb[123].mxu1  ;;  %v6713_v28 = vld [vmem:[%s7063_s21 + $0xec] sm:$0xff]  }
 0x1e2   : > { %6382 = vmatmul.mubr.msk.bf16.gmra.mrb[232].mxu0 %vm422_vm1, %v6704_v27  ;;  %2056 = vst [vmem:[#allocation2 + $0x1e8] sm:$0xff] %v1987_v36  ;;  %6520 = vmatmul.mubr.msk.bf16.gmra.mrb[228].mxu1 %vm422_vm1, %v3371_v33  ;;  %v3402_v27 = vrot.slane %v3400_v23, 1  ;;  %v6712_v33 = vld [vmem:[%s7063_s21 + $0xe4] sm:$0xff]  }
 0x1e3   : > { %6385 = vmatprep.mubr.msk.bf16.mxu0 %vm7014_vm0, %v7013_v1  ;;  %6523 = vmatprep.mubr.msk.bf16.mxu1 %vm7014_vm0, %v7013_v1 }
 0x1e4   : > { %v3403_v39 = vsel %vm1154_vm2, %v3398_v26, %v3402_v27 }
 0x1e5   : > { %v818_v41 = vpop.f32.mrb[128].mxu0  ;;  %v1827_v42 = vpop.f32.mrb[124].mxu1 }
 0x1e6   : > { %v6135_v43 = vpop.f32.mrb[129].mxu0  ;;  %v1988_v45 = vadd.f32 %v1827_v42, %v810_v24  ;;  %v6273_v46 = vpop.f32.mrb[125].mxu1 }
 0x1e7   : > { %v821_v47 = vpop.f32.mrb[130].mxu0  ;;  %v1830_v48 = vpop.f32.mrb[126].mxu1  ;;  %v2732_v43 = vld [vmem:[#allocation2] sm:$0xff]  ;;  %v6715_v46 = vld [vmem:[%s7063_s21 + $0xf4] sm:$0xff]  }
 0x1e8   : > { %v6136_v49 = vpop.f32.mrb[131].mxu0  ;;  %2057 = vst [vmem:[#allocation2 + $0x1f0] sm:$0xff] %v1988_v45  ;;  %v1989_v53 = vadd.f32 %v1830_v48, %v813_v30  ;;  %v6274_v54 = vpop.f32.mrb[127].mxu1  ;;  %v3420_v23 = vshrl.u32 %v6715_v46, 16 }
 0x1e9   : > { %v2733_v49 = vld [vmem:[#allocation2 + $0x8] sm:$0xff] }
 0x1ea   : > { %6386 = vmatmul.mubr.msk.bf16.gmra.mrb[236].mxu0 %vm422_vm1, %v6706_v44  ;;  %2058 = vst [vmem:[#allocation2 + $0x1f8] sm:$0xff] %v1989_v53  ;;  %6524 = vmatmul.mubr.msk.bf16.gmra.mrb[232].mxu1 %vm422_vm1, %v3379_v50  ;;  %v3406_v44 = vor.u32 %v3404_v40, %v3402_v27  ;;  %v6714_v53 = vld [vmem:[%s7063_s21 + $0xec] sm:$0xff]   ;;  %v6718_v40 = vld [vmem:[%s7063_s21 + $0xfc] sm:$0xff]  }
 0x1eb   : > { %6389 = vmatprep.mubr.msk.bf16.mxu0 %vm7014_vm0, %v7013_v1  ;;  %6527 = vmatprep.mubr.msk.bf16.mxu1 %vm7014_vm0, %v7013_v1 }
 0x1ed   : > { %v826_v58 = vpop.f32.mrb[132].mxu0  ;;  %v1835_v59 = vpop.f32.mrb[128].mxu1 }
 0x1ee   : > { %v6139_v60 = vpop.f32.mrb[133].mxu0  ;;  %v1990_v62 = vadd.f32 %v1835_v59, %v818_v41  ;;  %v6277_v63 = vpop.f32.mrb[129].mxu1  ;;  %v3408_v41 = vshll.u32 %v6713_v28, 16 }
 0x1ef   : > { %v829_v0 = vpop.f32.mrb[134].mxu0  ;;  %v1838_v2 = vpop.f32.mrb[130].mxu1 }
 0x1f0   : > { %v6140_v3 = vpop.f32.mrb[135].mxu0  ;;  %2059 = vst [vmem:[#allocation2 + $0x200] sm:$0xff] %v1990_v62  ;;  %v1991_v7 = vadd.f32 %v1838_v2, %v821_v47  ;;  %v6278_v8 = vpop.f32.mrb[131].mxu1  ;;  %v3410_v45 = vrot.slane %v3408_v41, 1  ;;  %v3416_v62 = vshll.u32 %v6715_v46, 16 }
 0x1f2   : > { %6390 = vmatmul.mubr.msk.bf16.gmra.mrb[240].mxu0 %vm422_vm1, %v6708_v61  ;;  %2060 = vst [vmem:[#allocation2 + $0x208] sm:$0xff] %v1991_v7  ;;  %6528 = vmatmul.mubr.msk.bf16.gmra.mrb[236].mxu1 %vm422_vm1, %v3387_v4  ;;  %v3411_v60 = vsel %vm1154_vm2, %v3406_v44, %v3410_v45  ;;  %v3412_v61 = vshrl.u32 %v6713_v28, 16  ;;  %v3418_v8 = vrot.slane %v3416_v62, 1 }
 0x1f3   : > { %6393 = vmatprep.mubr.msk.bf16.mxu0 %vm7014_vm0, %v7013_v1  ;;  %6531 = vmatprep.mubr.msk.bf16.mxu1 %vm7014_vm0, %v7013_v1 }
 0x1f4   : > { %v3414_v7 = vor.u32 %v3412_v61, %v3410_v45 }
 0x1f5   : > { %v834_v12 = vpop.f32.mrb[136].mxu0  ;;  %v1843_v13 = vpop.f32.mrb[132].mxu1 }
 0x1f6   : > { %908 = vst [vmem:[#allocation2 + $0x220] sm:$0x7f] %v834_v12  ;;  %v6143_v14 = vpop.f32.mrb[137].mxu0  ;;  %v1992_v16 = vadd.f32 %v1843_v13, %v826_v58  ;;  %v6281_v17 = vpop.f32.mrb[133].mxu1  ;;  %v2735_v12 = vld [vmem:[#allocation2 + $0x18] sm:$0xff]  ;;  %v3419_v22 = vsel %vm1154_vm2, %v3414_v7, %v3418_v8 }
 0x1f7   : > { %v837_v18 = vpop.f32.mrb[138].mxu0  ;;  %v1846_v19 = vpop.f32.mrb[134].mxu1 }
 0x1f8   : > { %v6144_v20 = vpop.f32.mrb[139].mxu0  ;;  %2061 = vst [vmem:[#allocation2 + $0x210] sm:$0xff] %v1992_v16  ;;  %v1993_v24 = vadd.f32 %v1846_v19, %v829_v0  ;;  %v6282_v25 = vpop.f32.mrb[135].mxu1 }
 0x1fa   : > { %6394 = vmatmul.mubr.msk.bf16.gmra.mrb[244].mxu0 %vm422_vm1, %v6710_v15  ;;  %2062 = vst [vmem:[#allocation2 + $0x218] sm:$0xff] %v1993_v24  ;;  %6532 = vmatmul.mubr.msk.bf16.gmra.mrb[240].mxu1 %vm422_vm1, %v3395_v21  ;;  %v6717_v15 = vld [vmem:[%s7063_s21 + $0xf4] sm:$0xff]   ;;  %v3424_v24 = vshll.u32 %v7656_v6, 16 }
 0x1fb   : > { %6397 = vmatprep.mubr.msk.bf16.mxu0 %vm7014_vm0, %v7013_v1  ;;  %6535 = vmatprep.mubr.msk.bf16.mxu1 %vm7014_vm0, %v7013_v1 }
 0x1fd   : > { %v1925_v29 = vld [vmem:[#allocation2 + $0x220] sm:$0x7f]  ;;  %v2454_v30 = vpop.f32.mrb[140].mxu0  ;;  %v1851_v31 = vpop.f32.mrb[136].mxu1 }
 0x1fe   : > { %v6291_v32 = vpop.f32.mrb[141].mxu0  ;;  %v1994_v34 = vadd.f32 %v1925_v29, %v1851_v31  ;;  %v6285_v35 = vpop.f32.mrb[137].mxu1  ;;  %v2801_v47 = vadd.f32 %v2732_v43, %v2454_v30  ;;  %v2736_v30 = vld [vmem:[#allocation2 + $0x20] sm:$0xff]  ;;  %v3422_v31 = vor.u32 %v3420_v23, %v3418_v8 }
 0x1ff   : > { %v2457_v36 = vpop.f32.mrb[142].mxu0  ;;  %v1854_v37 = vpop.f32.mrb[138].mxu1  ;;  %v3426_v32 = vrot.slane %v3424_v24, 1 }
 0x200   : > { %v6292_v38 = vpop.f32.mrb[143].mxu0  ;;  %2063 = vst [vmem:[#allocation2 + $0x220] sm:$0x7f] %v1994_v34  ;;  %v6286_v42 = vpop.f32.mrb[139].mxu1  ;;  %v2802_v54 = vadd.f32 %v2733_v49, %v2457_v36  ;;  %v2737_v37 = vld [vmem:[#allocation2 + $0x28] sm:$0xff] }
 0x202   : > { %6398 = vmatmul.mubr.msk.bf16.gmra.mrb[248].mxu0 %vm422_vm1, %v6712_v33  ;;  %6536 = vmatmul.mubr.msk.bf16.gmra.mrb[244].mxu1 %vm422_vm1, %v3403_v39  ;;  %v7676_v33 = vld [vmem:[%s7063_s21 + $0x104] sm:$0xff]  }
 0x203   : > { %6401 = vmatprep.mubr.msk.bf16.mxu0 %vm7014_vm0, %v7013_v1  ;;  %6539 = vmatprep.mubr.msk.bf16.mxu1 %vm7014_vm0, %v7013_v1 }
 0x205   : > { %v2462_v48 = vpop.f32.mrb[144].mxu0  ;;  %v3608_v50 = vpop.f32.mrb[140].mxu1 }
 0x206   : > { %v6295_v52 = vpop.f32.mrb[145].mxu0  ;;  %v3955_v55 = vadd.f32 %v3608_v50, %v2801_v47  ;;  %v6433_v56 = vpop.f32.mrb[141].mxu1  ;;  %v2803_v9 = vadd.f32 %v2734_v5, %v2462_v48  ;;  %v3427_v47 = vsel %vm1154_vm2, %v3422_v31, %v3426_v32  ;;  %v3428_v50 = vshrl.u32 %v7656_v6, 16  ;;  %v2739_v6 = vld [vmem:[#allocation2 + $0x38] sm:$0xff]  ;;  %v2740_v31 = vld [vmem:[#allocation2 + $0x40] sm:$0xff] }
 0x207   : > { %v2465_v57 = vpop.f32.mrb[146].mxu0  ;;  %v3611_v58 = vpop.f32.mrb[142].mxu1  ;;  %v3432_v52 = vshll.u32 %v7676_v33, 16 }
 0x208   : > { %v6296_v59 = vpop.f32.mrb[147].mxu0  ;;  %4024 = vst [vmem:[#allocation2] sm:$0xff] %v3955_v55  ;;  %v7643_v63 = vadd.f32 %v7638_v51, %v3955_v55  ;;  %v3956_v0 = vadd.f32 %v3611_v58, %v2802_v54  ;;  %v6434_v2 = vpop.f32.mrb[143].mxu1  ;;  %v2804_v16 = vadd.f32 %v2735_v12, %v2465_v57  ;;  %v3430_v61 = vor.u32 %v3428_v50, %v3426_v32 }
 0x209   : > { %v3434_v62 = vrot.slane %v3432_v52, 1 }
 0x20a   : > { %6402 = vmatmul.mubr.msk.bf16.gmra.mrb[252].mxu0 %vm422_vm1, %v6714_v53  ;;  %v5491_v3 = vmul.f32 -1.442695, %v7643_v63  ;;  %4025 = vst [vmem:[#allocation2 + $0x8] sm:$0xff] %v3956_v0  ;;  %v7648_v4 = vadd.f32 %v7638_v51, %v3956_v0  ;;  %6540 = vmatmul.mubr.msk.bf16.gmra.mrb[248].mxu1 %vm422_vm1, %v3411_v60  ;;  %v2738_v60 = vld [vmem:[#allocation2 + $0x30] sm:$0xff] }
 0x20b   : > { %6405 = vmatprep.mubr.msk.bf16.mxu0 %vm7014_vm0, %v7013_v1  ;;  %6543 = vmatprep.mubr.msk.bf16.mxu1 %vm7014_vm0, %v7013_v1  ;;  %v7697_v0 = vld [vmem:[%s7063_s21 + $0x10c] sm:$0xff]  }
 0x20c   : > { %6727 = vpow2.f32 %v5491_v3  ;;  %v5492_v10 = vmul.f32 -1.442695, %v7648_v4 }
 0x20d   : > { %v2470_v11 = vpop.f32.mrb[148].mxu0  ;;  %v3616_v13 = vpop.f32.mrb[144].mxu1 }
 0x20e   : > { %v6299_v14 = vpop.f32.mrb[149].mxu0  ;;  %6729 = vpow2.f32 %v5492_v10  ;;  %v3957_v17 = vadd.f32 %v3616_v13, %v2803_v9  ;;  %v6437_v18 = vpop.f32.mrb[145].mxu1  ;;  %v2805_v34 = vadd.f32 %v2736_v30, %v2470_v11  ;;  %v6720_v9 = vld [vmem:[%s7063_s21 + $0x104] sm:$0xff]  }
 0x20f   : > { %v2473_v19 = vpop.f32.mrb[150].mxu0  ;;  %v3619_v20 = vpop.f32.mrb[146].mxu1  ;;  %v3435_v18 = vsel %vm1154_vm2, %v3430_v61, %v3434_v62 }
 0x210   : > { %v6300_v21 = vpop.f32.mrb[151].mxu0  ;;  %4026 = vst [vmem:[#allocation2 + $0x10] sm:$0xff] %v3957_v17  ;;  %v7663_v25 = vadd.f32 %v7638_v51, %v3957_v17  ;;  %v3958_v26 = vadd.f32 %v3619_v20, %v2804_v16  ;;  %v6438_v27 = vpop.f32.mrb[147].mxu1  ;;  %v2806_v42 = vadd.f32 %v2737_v37, %v2473_v19  ;;  %v3436_v19 = vshrl.u32 %v7676_v33, 16  ;;  %v2741_v37 = vld [vmem:[#allocation2 + $0x48] sm:$0xff] }
 0x211   : > { %v3440_v20 = vshll.u32 %v7697_v0, 16 }
 0x212   : > { %6406 = vmatmul.mubr.msk.bf16.gmra.mrb[0].mxu0 %vm422_vm1, %v6717_v15  ;;  %v5493_v28 = vmul.f32 -1.442695, %v7663_v25  ;;  %4027 = vst [vmem:[#allocation2 + $0x18] sm:$0xff] %v3958_v26  ;;  %v7668_v29 = vadd.f32 %v7638_v51, %v3958_v26  ;;  %6544 = vmatmul.mubr.msk.bf16.gmra.mrb[252].mxu1 %vm422_vm1, %v3419_v22  ;;  %v3438_v32 = vor.u32 %v3436_v19, %v3434_v62 }
 0x213   : > { %6409 = vmatprep.mubr.msk.bf16.mxu0 %vm7014_vm0, %v7013_v1  ;;  %6547 = vmatprep.mubr.msk.bf16.mxu1 %vm7014_vm0, %v7013_v1  ;;  %v3442_v33 = vrot.slane %v3440_v20, 1  ;;  %v6724_v20 = vld [vmem:[%s7063_s21 + $0x114] sm:$0xff]  }
 0x214   : > { %6731 = vpow2.f32 %v5493_v28  ;;  %v5494_v35 = vmul.f32 -1.442695, %v7668_v29 }
 0x215   : > { %v2478_v36 = vpop.f32.mrb[152].mxu0  ;;  %v3624_v38 = vpop.f32.mrb[148].mxu1 }
 0x216   : > { %v6303_v39 = vpop.f32.mrb[153].mxu0  ;;  %v6728_v41 = vpop.eup %6727  ;;  %6733 = vpow2.f32 %v5494_v35  ;;  %v3959_v43 = vadd.f32 %v3624_v38, %v2805_v34  ;;  %v2807_v2 = vadd.f32 %v2738_v60, %v2478_v36  ;;  %v7719_v34 = vld [vmem:[%s7063_s21 + $0x114] sm:$0xff]  }
 0x217   : > { %v6441_v44 = vpop.f32.mrb[149].mxu1  ;;  %v2481_v45 = vpop.f32.mrb[154].mxu0  ;;  %v4445_v46 = vadd.f32 1.0, %v6728_v41 }
 0x218   : > { %v3627_v48 = vpop.f32.mrb[150].mxu1  ;;  %v6304_v49 = vpop.f32.mrb[155].mxu0  ;;  %4028 = vst [vmem:[#allocation2 + $0x20] sm:$0xff] %v3959_v43  ;;  %v7684_v54 = vadd.f32 %v7638_v51, %v3959_v43  ;;  %v2808_v11 = vadd.f32 %v2739_v6, %v2481_v45  ;;  %v6722_v43 = vld [vmem:[%s7063_s21 + $0x10c] sm:$0xff]  }
 0x219   : > { %v6730_v53 = vpop.eup %6729  ;;  %v3960_v55 = vadd.f32 %v3627_v48, %v2806_v42  ;;  %v6442_v56 = vpop.f32.mrb[151].mxu1  ;;  %6735 = vrcp.f32 %v4445_v46 }
 0x21a   : > { %v4446_v57 = vadd.f32 1.0, %v6730_v53  ;;  %6410 = vmatmul.mubr.msk.bf16.gmra.mrb[4].mxu0 %vm422_vm1, %v6718_v40  ;;  %v5495_v58 = vmul.f32 -1.442695, %v7684_v54  ;;  %6548 = vmatmul.mubr.msk.bf16.gmra.mrb[0].mxu1 %vm422_vm1, %v3427_v47  ;;  %v3444_v56 = vshrl.u32 %v7697_v0, 16 }
 0x21b   : > { %4029 = vst [vmem:[#allocation2 + $0x28] sm:$0xff] %v3960_v55  ;;  %v7689_v59 = vadd.f32 %v7638_v51, %v3960_v55  ;;  %6413 = vmatprep.mubr.msk.bf16.mxu0 %vm7014_vm0, %v7013_v1  ;;  %6551 = vmatprep.mubr.msk.bf16.mxu1 %vm7014_vm0, %v7013_v1  ;;  %v3443_v55 = vsel %vm1154_vm2, %v3438_v32, %v3442_v33 }
 0x21c   : > { %6737 = vrcp.f32 %v4446_v57  ;;  %v3446_v6 = vor.u32 %v3444_v56, %v3442_v33 }
 0x21d   : > { %6739 = vpow2.f32 %v5495_v58  ;;  %v5496_v3 = vmul.f32 -1.442695, %v7689_v59  ;;  %v2486_v5 = vpop.f32.mrb[156].mxu0  ;;  %v3632_v7 = vpop.f32.mrb[152].mxu1 }
 0x21e   : > { %v6307_v8 = vpop.f32.mrb[157].mxu0  ;;  %v6732_v10 = vpop.eup %6731  ;;  %v3961_v12 = vadd.f32 %v3632_v7, %v2807_v2  ;;  %v2809_v35 = vadd.f32 %v2740_v31, %v2486_v5  ;;  %v2742_v5 = vld [vmem:[#allocation2 + $0x50] sm:$0xff] }
 0x21f   : > { %6741 = vpow2.f32 %v5496_v3  ;;  %v6445_v13 = vpop.f32.mrb[153].mxu1  ;;  %v2489_v14 = vpop.f32.mrb[158].mxu0  ;;  %v4447_v15 = vadd.f32 1.0, %v6732_v10  ;;  %v7748_v8 = vld [vmem:[%s7063_s21 + $0x11c] ss:$0 sps:$4 sm:$0xff]  }
 0x220   : > { %v3635_v16 = vpop.f32.mrb[154].mxu1  ;;  %v6308_v17 = vpop.f32.mrb[159].mxu0  ;;  %4030 = vst [vmem:[#allocation2 + $0x30] sm:$0xff] %v3961_v12  ;;  %v7705_v22 = vadd.f32 %v7638_v51, %v3961_v12  ;;  %v2810_v40 = vadd.f32 %v2741_v37, %v2489_v14  ;;  %v2743_v12 = vld [vmem:[#allocation2 + $0x58] sm:$0xff] }
 0x221   : > { %v6734_v21 = vpop.eup %6733  ;;  %v3962_v23 = vadd.f32 %v3635_v16, %v2808_v11  ;;  %v6446_v24 = vpop.f32.mrb[155].mxu1  ;;  %6743 = vrcp.f32 %v4447_v15  ;;  %v4772_v16 = vld [vmem:[%s7728_s4 + $0x8] sm:$0xf] }
 0x222   : > { %v4448_v26 = vadd.f32 1.0, %v6734_v21  ;;  %6414 = vmatmul.mubr.msk.bf16.gmra.mrb[8].mxu0 %vm422_vm1, %v6720_v9  ;;  %v5497_v27 = vmul.f32 -1.442695, %v7705_v22  ;;  %6552 = vmatmul.mubr.msk.bf16.gmra.mrb[4].mxu1 %vm422_vm1, %v3435_v18 }
 0x223   : > { %4031 = vst [vmem:[#allocation2 + $0x38] sm:$0xff] %v3962_v23  ;;  %v7710_v28 = vadd.f32 %v7638_v51, %v3962_v23  ;;  %6417 = vmatprep.mubr.msk.bf16.mxu0 %vm7014_vm0, %v7013_v1  ;;  %v6736_v30 = vpop.eup %6735  ;;  %6555 = vmatprep.mubr.msk.bf16.mxu1 %vm7014_vm0, %v7013_v1 }
 0x224   : > { %6745 = vrcp.f32 %v4448_v26  ;;  %v4652_v45 = vmul.f32 %v6736_v30, %v7643_v63  ;;  %v3448_v63 = vshll.u32 %v7719_v34, 16 }
 0x225   : > { %6747 = vpow2.f32 %v5497_v27  ;;  %v5498_v36 = vmul.f32 -1.442695, %v7710_v28  ;;  %v2494_v38 = vpop.f32.mrb[160].mxu0  ;;  %v3640_v41 = vpop.f32.mrb[156].mxu1 }
 0x226   : > { %v6738_v39 = vpop.eup %6737  ;;  %v6311_v42 = vpop.f32.mrb[161].mxu0  ;;  %v3963_v47 = vadd.f32 %v3640_v41, %v2809_v35  ;;  %v3450_v7 = vrot.slane %v3448_v63, 1  ;;  %v2811_v10 = vadd.f32 %v2742_v5, %v2494_v38  ;;  %v3452_v35 = vshrl.u32 %v7719_v34, 16  ;;  %v5568_v5 = vld [vmem:[%s7728_s4 + $0x14] sm:$0xf] }
 0x227   : > { %v6740_v44 = vpop.eup %6739  ;;  %v4653_v46 = vmul.f32 %v6738_v39, %v7648_v4  ;;  %6749 = vpow2.f32 %v5498_v36  ;;  %v6449_v48 = vpop.f32.mrb[157].mxu1  ;;  %v3456_v36 = vshll.u32 %v7748_v8, 16 }
 0x228   : > { %v2497_v49 = vpop.f32.mrb[162].mxu0  ;;  %v4449_v50 = vadd.f32 1.0, %v6740_v44  ;;  %v3643_v52 = vpop.f32.mrb[158].mxu1  ;;  %4032 = vst [vmem:[#allocation2 + $0x40] sm:$0xff] %v3963_v47  ;;  %v7734_v58 = vadd.f32 %v7638_v51, %v3963_v47  ;;  %v3451_v33 = vsel %vm1154_vm2, %v3446_v6, %v3450_v7 }
 0x229   : > { %v6312_v53 = vpop.f32.mrb[163].mxu0  ;;  %v6742_v4 = vpop.eup %6741  ;;  %v5791_v57 = vpack.c.bf16 %v4653_v46, %v4652_v45  ;;  %v3964_v60 = vadd.f32 %v3643_v52, %v2810_v40  ;;  %v2812_v17 = vadd.f32 %v2743_v12, %v2497_v49  ;;  %v2744_v45 = vld [vmem:[#allocation2 + $0x60] sm:$0xff]  ;;  %v3454_v46 = vor.u32 %v3452_v35, %v3450_v7  ;;  %v2745_v52 = vld [vmem:[#allocation2 + $0x68] sm:$0xff] }
 0x22a   : > { %v6450_v61 = vpop.f32.mrb[159].mxu1  ;;  %6751 = vrcp.f32 %v4449_v50  ;;  %v4450_v62 = vadd.f32 1.0, %v6742_v4  ;;  %6418 = vmatmul.mubr.msk.bf16.gmra.mrb[12].mxu0 %vm422_vm1, %v6722_v43  ;;  %v5499_v0 = vmul.f32 -1.442695, %v7734_v58  ;;  %6556 = vmatmul.mubr.msk.bf16.gmra.mrb[8].mxu1 %vm422_vm1, %v3443_v55  ;;  %v3458_v47 = vrot.slane %v3456_v36, 1 }
 0x22b   : > { %5792 = vst [vmem:[%s7728_s4] sm:$0xff] %v5791_v57   ;;  %4033 = vst [vmem:[#allocation2 + $0x48] sm:$0xff] %v3964_v60  ;;  %v7740_v2 = vadd.f32 %v7638_v51, %v3964_v60  ;;  %6421 = vmatprep.mubr.msk.bf16.mxu0 %vm7014_vm0, %v7013_v1  ;;  %v6744_v3 = vpop.eup %6743  ;;  %6559 = vmatprep.mubr.msk.bf16.mxu1 %vm7014_vm0, %v7013_v1  ;;  %v6726_v57 = vld [vmem:[%s7063_s21 + $0x11c] ss:$0 sps:$4 sm:$0xff]  }
 0x22c   : > { %6753 = vrcp.f32 %v4450_v62  ;;  %v4654_v9 = vmul.f32 %v6744_v3, %v7663_v25 }
 0x22d   : > { %6755 = vpow2.f32 %v5499_v0  ;;  %v5500_v11 = vmul.f32 -1.442695, %v7740_v2  ;;  %v2502_v13 = vpop.f32.mrb[164].mxu0  ;;  %v3648_v18 = vpop.f32.mrb[160].mxu1 }
 0x22e   : > { %v6746_v14 = vpop.eup %6745  ;;  %v6315_v19 = vpop.f32.mrb[165].mxu0  ;;  %v5721_v25 = vpack.c.bf16 %v4654_v9, %v4654_v9  ;;  %v3965_v24 = vadd.f32 %v3648_v18, %v2811_v10  ;;  %v2813_v49 = vadd.f32 %v2744_v45, %v2502_v13  ;;  %v3459_v10 = vsel %vm1154_vm2, %v3454_v46, %v3458_v47 }
 0x22f   : > { %v6748_v21 = vpop.eup %6747  ;;  %v4655_v23 = vmul.f32 %v6746_v14, %v7668_v29  ;;  %6757 = vpow2.f32 %v5500_v11  ;;  %v6453_v26 = vpop.f32.mrb[161].mxu1 }
 0x230   : > { %v2505_v27 = vpop.f32.mrb[166].mxu0  ;;  %v4451_v30 = vadd.f32 1.0, %v6748_v21  ;;  %v3651_v31 = vpop.f32.mrb[162].mxu1  ;;  %v4773_v38 = vsel %vm7754_vm5, %v5721_v25, %v4772_v16  ;;  %4034 = vst [vmem:[#allocation2 + $0x50] sm:$0xff] %v3965_v24  ;;  %v7767_v39 = vadd.f32 %v7638_v51, %v3965_v24  ;;  %v2746_v25 = vld [vmem:[#allocation2 + $0x70] sm:$0xff]  ;;  %v2747_v24 = vld [vmem:[#allocation2 + $0x78] sm:$0xff] }
 0x231   : > { %v6316_v32 = vpop.f32.mrb[167].mxu0  ;;  %v6750_v37 = vpop.eup %6749  ;;  %v5722_v29 = vpack.c.bf16 %v4655_v23, %v4655_v23  ;;  %v3966_v40 = vadd.f32 %v3651_v31, %v2812_v17  ;;  %4774 = vst [vmem:[%s7728_s4 + $0x8] sm:$0xf] %v4773_v38  ;;  %v2814_v56 = vadd.f32 %v2745_v52, %v2505_v27  ;;  %v3460_v17 = vshrl.u32 %v7748_v8, 16 }
 0x232   : > { %v6454_v41 = vpop.f32.mrb[163].mxu1  ;;  %6759 = vrcp.f32 %v4451_v30  ;;  %v4452_v42 = vadd.f32 1.0, %v6750_v37  ;;  %6422 = vmatmul.mubr.msk.bf16.gmra.mrb[16].mxu0 %vm422_vm1, %v6724_v20  ;;  %v5501_v34 = vmul.f32 -1.442695, %v7767_v39  ;;  %6560 = vmatmul.mubr.msk.bf16.gmra.mrb[12].mxu1 %vm422_vm1, %v3451_v33 }
 0x233   : > { %5566 = vst [vmem:[%s7728_s4 + $0xc] sm:$0xf] %v5722_v29  ;;  %4035 = vst [vmem:[#allocation2 + $0x58] sm:$0xff] %v3966_v40  ;;  %v7774_v43 = vadd.f32 %v7638_v51, %v3966_v40  ;;  %6425 = vmatprep.mubr.msk.bf16.mxu0 %vm7014_vm0, %v7013_v1  ;;  %6563 = vmatprep.mubr.msk.bf16.mxu1 %vm7014_vm0, %v7013_v1  ;;  %v3462_v31 = vor.u32 %v3460_v17, %v3458_v47 }
 0x234   : > { %v6752_v44 = vpop.eup %6751  ;;  %6761 = vrcp.f32 %v4452_v42 }
 0x235   : > { %v4656_v48 = vmul.f32 %v6752_v44, %v7684_v54  ;;  %6763 = vpow2.f32 %v5501_v34  ;;  %v5502_v50 = vmul.f32 -1.442695, %v7774_v43  ;;  %v2510_v53 = vpop.f32.mrb[168].mxu0  ;;  %v3656_v63 = vpop.f32.mrb[164].mxu1 }
 0x236   : > { %v6754_v55 = vpop.eup %6753  ;;  %v6319_v4 = vpop.f32.mrb[169].mxu0  ;;  %v3967_v0 = vadd.f32 %v3656_v63, %v2813_v49  ;;  %v2815_v8 = vadd.f32 %v2746_v25, %v2510_v53  ;;  %v2750_v25 = vld [vmem:[#allocation2 + $0x90] sm:$0xff] }
 0x237   : > { %v6756_v60 = vpop.eup %6755  ;;  %v5723_v61 = vpack.c.bf16 %v4656_v48, %v4656_v48  ;;  %v4657_v62 = vmul.f32 %v6754_v55, %v7689_v59  ;;  %6765 = vpow2.f32 %v5502_v50  ;;  %v6457_v54 = vpop.f32.mrb[165].mxu1  ;;  %v2748_v50 = vld [vmem:[#allocation2 + $0x80] sm:$0xff] }
 0x238   : > { %v2513_v3 = vpop.f32.mrb[170].mxu0  ;;  %v4453_v6 = vadd.f32 1.0, %v6756_v60  ;;  %v3659_v7 = vpop.f32.mrb[166].mxu1  ;;  %4036 = vst [vmem:[#allocation2 + $0x60] sm:$0xff] %v3967_v0  ;;  %v7789_v13 = vadd.f32 %v7638_v51, %v3967_v0 }
 0x239   : > { %v6320_v9 = vpop.f32.mrb[171].mxu0  ;;  %v6758_v11 = vpop.eup %6757  ;;  %5567 = vst [vmem:[%s7728_s4 + $0x10] sm:$0xf] %v5723_v61  ;;  %v5724_v12 = vpack.c.bf16 %v4657_v62, %v4657_v62  ;;  %v3968_v14 = vadd.f32 %v3659_v7, %v2814_v56  ;;  %v2816_v30 = vadd.f32 %v2747_v24, %v2513_v3  ;;  %v2749_v56 = vld [vmem:[#allocation2 + $0x88] sm:$0xff] }
 0x23a   : > { %v6458_v59 = vpop.f32.mrb[167].mxu1  ;;  %6767 = vrcp.f32 %v4453_v6  ;;  %v4454_v16 = vadd.f32 1.0, %v6758_v11  ;;  %6426 = vmatmul.mubr.msk.bf16.gmra.mrb[20].mxu0 %vm422_vm1, %v6726_v57  ;;  %v5503_v19 = vmul.f32 -1.442695, %v7789_v13  ;;  %6564 = vmatmul.mubr.msk.bf16.gmra.mrb[16].mxu1 %vm422_vm1, %v3459_v10  ;;  %v5575_v57 = vld [vmem:[%s7728_s4 + $0x20] sm:$0xf] }
 0x23b   : > { %v4789_v18 = vsel %vm7754_vm5, %v5724_v12, %v5568_v5  ;;  %4037 = vst [vmem:[#allocation2 + $0x68] sm:$0xff] %v3968_v14  ;;  %v7797_v20 = vadd.f32 %v7638_v51, %v3968_v14  ;;  %6567 = vmatprep.mubr.msk.bf16.mxu1 %vm7014_vm0, %v7013_v1 }
 0x23c   : > { %v6760_v21 = vpop.eup %6759  ;;  %5569 = vst [vmem:[%s7728_s4 + $0x14] sm:$0xf] %v4789_v18  ;;  %6769 = vrcp.f32 %v4454_v16 }
 0x23d   : > { %6771 = vpow2.f32 %v5503_v19  ;;  %v5504_v23 = vmul.f32 -1.442695, %v7797_v20  ;;  %v2518_v26 = vpop.f32.mrb[172].mxu0  ;;  %v3664_v32 = vpop.f32.mrb[168].mxu1  ;;  %v4658_v36 = vmul.f32 %v6760_v21, %v7705_v22 }
 0x23e   : > { %v6762_v27 = vpop.eup %6761  ;;  %v6323_v33 = vpop.f32.mrb[173].mxu0  ;;  %v3969_v38 = vadd.f32 %v3664_v32, %v2815_v8  ;;  %v2817_v53 = vadd.f32 %v2748_v50, %v2518_v26  ;;  %v2751_v26 = vld [vmem:[#allocation2 + $0x98] sm:$0xff] }
 0x23f   : > { %v6764_v35 = vpop.eup %6763  ;;  %v4659_v37 = vmul.f32 %v6762_v27, %v7710_v28  ;;  %6773 = vpow2.f32 %v5504_v23  ;;  %v6461_v1 = vpop.f32.mrb[169].mxu1 }
 0x240   : > { %v2521_v29 = vpop.f32.mrb[174].mxu0  ;;  %v4455_v40 = vadd.f32 1.0, %v6764_v35  ;;  %v3667_v41 = vpop.f32.mrb[170].mxu1  ;;  %4038 = vst [vmem:[#allocation2 + $0x70] sm:$0xff] %v3969_v38  ;;  %v7807_v45 = vadd.f32 %v7638_v51, %v3969_v38 }
 0x241   : > { %v6324_v42 = vpop.f32.mrb[175].mxu0  ;;  %v6766_v34 = vpop.eup %6765  ;;  %v5796_v44 = vpack.c.bf16 %v4659_v37, %v4658_v36  ;;  %v3970_v46 = vadd.f32 %v3667_v41, %v2816_v30  ;;  %v2818_v60 = vadd.f32 %v2749_v56, %v2521_v29  ;;  %v5582_v29 = vld [vmem:[%s7728_s4 + $0x2c] sm:$0xf] }
 0x242   : > { %v6462_v47 = vpop.f32.mrb[171].mxu1  ;;  %6775 = vrcp.f32 %v4455_v40  ;;  %v4456_v22 = vadd.f32 1.0, %v6766_v34  ;;  %v5505_v28 = vmul.f32 -1.442695, %v7807_v45  ;;  %6568 = vmatmul.mubr.msk.bf16.gmra.mrb[20].mxu1 %vm422_vm1, %v3462_v31 }
 0x243   : > { %5848 = vst [vmem:[%s7728_s4 + $0x18] sm:$0xff] %v5796_v44   ;;  %4039 = vst [vmem:[#allocation2 + $0x78] sm:$0xff] %v3970_v46  ;;  %v7812_v48 = vadd.f32 %v7638_v51, %v3970_v46 }
 0x244   : > { %v6768_v49 = vpop.eup %6767  ;;  %6777 = vrcp.f32 %v4456_v22 }
 0x245   : > { %v4660_v52 = vmul.f32 %v6768_v49, %v7734_v58  ;;  %6779 = vpow2.f32 %v5505_v28  ;;  %v5506_v55 = vmul.f32 -1.442695, %v7812_v48  ;;  %v2526_v63 = vpop.f32.mrb[176].mxu0  ;;  %v3672_v61 = vpop.f32.mrb[172].mxu1 }
 0x246   : > { %v6770_v4 = vpop.eup %6769  ;;  %v6327_v62 = vpop.f32.mrb[177].mxu0  ;;  %v3971_v5 = vadd.f32 %v3672_v61, %v2817_v53  ;;  %v2819_v23 = vadd.f32 %v2750_v25, %v2526_v63  ;;  %v2752_v53 = vld [vmem:[#allocation2 + $0xa0] sm:$0xff]  ;;  %v2753_v63 = vld [vmem:[#allocation2 + $0xa8] sm:$0xff] }
 0x247   : > { %v6772_v0 = vpop.eup %6771  ;;  %v5727_v54 = vpack.c.bf16 %v4660_v52, %v4660_v52  ;;  %v4661_v3 = vmul.f32 %v6770_v4, %v7740_v2  ;;  %6781 = vpow2.f32 %v5506_v55  ;;  %v6465_v58 = vpop.f32.mrb[173].mxu1 }
 0x248   : > { %v2529_v6 = vpop.f32.mrb[178].mxu0  ;;  %v4457_v7 = vadd.f32 1.0, %v6772_v0  ;;  %v3675_v9 = vpop.f32.mrb[174].mxu1  ;;  %4040 = vst [vmem:[#allocation2 + $0x80] sm:$0xff] %v3971_v5  ;;  %v7822_v59 = vadd.f32 %v7638_v51, %v3971_v5 }
 0x249   : > { %v6328_v10 = vpop.f32.mrb[179].mxu0  ;;  %v6774_v11 = vpop.eup %6773  ;;  %v4806_v12 = vsel %vm7754_vm5, %v5727_v54, %v5575_v57  ;;  %v5728_v14 = vpack.c.bf16 %v4661_v3, %v4661_v3  ;;  %v3972_v16 = vadd.f32 %v3675_v9, %v2818_v60  ;;  %v2820_v31 = vadd.f32 %v2751_v26, %v2529_v6 }
 0x24a   : > { %v6466_v17 = vpop.f32.mrb[175].mxu1  ;;  %5576 = vst [vmem:[%s7728_s4 + $0x20] sm:$0xf] %v4806_v12  ;;  %6783 = vrcp.f32 %v4457_v7  ;;  %v4458_v2 = vadd.f32 1.0, %v6774_v11  ;;  %v5507_v18 = vmul.f32 -1.442695, %v7822_v59 }
 0x24b   : > { %5580 = vst [vmem:[%s7728_s4 + $0x24] sm:$0xf] %v5728_v14  ;;  %4041 = vst [vmem:[#allocation2 + $0x88] sm:$0xff] %v3972_v16  ;;  %v7828_v19 = vadd.f32 %v7638_v51, %v3972_v16 }
 0x24c   : > { %v6776_v21 = vpop.eup %6775  ;;  %6785 = vrcp.f32 %v4458_v2 }
 0x24d   : > { %v4662_v8 = vmul.f32 %v6776_v21, %v7767_v39  ;;  %6787 = vpow2.f32 %v5507_v18  ;;  %v5508_v24 = vmul.f32 -1.442695, %v7828_v19  ;;  %v2534_v27 = vpop.f32.mrb[180].mxu0  ;;  %v3680_v32 = vpop.f32.mrb[176].mxu1  ;;  %v2754_v21 = vld [vmem:[#allocation2 + $0xb0] sm:$0xff] }
 0x24e   : > { %v6778_v30 = vpop.eup %6777  ;;  %v6331_v33 = vpop.f32.mrb[181].mxu0  ;;  %v3973_v38 = vadd.f32 %v3680_v32, %v2819_v23  ;;  %v2821_v55 = vadd.f32 %v2752_v53, %v2534_v27 }
 0x24f   : > { %v6780_v35 = vpop.eup %6779  ;;  %v5729_v36 = vpack.c.bf16 %v4662_v8, %v4662_v8  ;;  %v4663_v37 = vmul.f32 %v6778_v30, %v7774_v43  ;;  %6789 = vpow2.f32 %v5508_v24  ;;  %v6469_v1 = vpop.f32.mrb[177].mxu1  ;;  %v2755_v24 = vld [vmem:[#allocation2 + $0xb8] sm:$0xff] }
 0x250   : > { %v2537_v39 = vpop.f32.mrb[182].mxu0  ;;  %v4459_v40 = vadd.f32 1.0, %v6780_v35  ;;  %v3683_v41 = vpop.f32.mrb[178].mxu1  ;;  %4042 = vst [vmem:[#allocation2 + $0x90] sm:$0xff] %v3973_v38  ;;  %v7836_v46 = vadd.f32 %v7638_v51, %v3973_v38  ;;  %v5589_v30 = vld [vmem:[%s7728_s4 + $0x38] sm:$0xf] }
 0x251   : > { %v6332_v42 = vpop.f32.mrb[183].mxu0  ;;  %v6782_v34 = vpop.eup %6781  ;;  %5581 = vst [vmem:[%s7728_s4 + $0x28] sm:$0xf] %v5729_v36  ;;  %v5730_v44 = vpack.c.bf16 %v4663_v37, %v4663_v37  ;;  %v3974_v47 = vadd.f32 %v3683_v41, %v2820_v31  ;;  %v2822_v60 = vadd.f32 %v2753_v63, %v2537_v39  ;;  %v2757_v63 = vld [vmem:[#allocation2 + $0xc8] sm:$0xff] }
 0x252   : > { %v6470_v22 = vpop.f32.mrb[179].mxu1  ;;  %6791 = vrcp.f32 %v4459_v40  ;;  %v4460_v43 = vadd.f32 1.0, %v6782_v34  ;;  %v5509_v49 = vmul.f32 -1.442695, %v7836_v46 }
 0x253   : > { %v4822_v28 = vsel %vm7754_vm5, %v5730_v44, %v5582_v29  ;;  %4043 = vst [vmem:[#allocation2 + $0x98] sm:$0xff] %v3974_v47  ;;  %v7842_v50 = vadd.f32 %v7638_v51, %v3974_v47 }
 0x254   : > { %v6784_v52 = vpop.eup %6783  ;;  %5583 = vst [vmem:[%s7728_s4 + $0x2c] sm:$0xf] %v4822_v28  ;;  %6793 = vrcp.f32 %v4460_v43 }
 0x255   : > { %6795 = vpow2.f32 %v5509_v49  ;;  %v5510_v56 = vmul.f32 -1.442695, %v7842_v50  ;;  %v2542_v4 = vpop.f32.mrb[184].mxu0  ;;  %v3688_v61 = vpop.f32.mrb[180].mxu1  ;;  %v4664_v54 = vmul.f32 %v6784_v52, %v7789_v13  ;;  %v2756_v52 = vld [vmem:[#allocation2 + $0xc0] sm:$0xff] }
 0x256   : > { %v6786_v57 = vpop.eup %6785  ;;  %v6335_v62 = vpop.f32.mrb[185].mxu0  ;;  %v3975_v5 = vadd.f32 %v3688_v61, %v2821_v55  ;;  %v2823_v8 = vadd.f32 %v2754_v21, %v2542_v4 }
 0x257   : > { %v6788_v0 = vpop.eup %6787  ;;  %v4665_v3 = vmul.f32 %v6786_v57, %v7797_v20  ;;  %6797 = vpow2.f32 %v5510_v56  ;;  %v6473_v58 = vpop.f32.mrb[181].mxu1 }
 0x258   : > { %v2545_v6 = vpop.f32.mrb[186].mxu0  ;;  %v4461_v7 = vadd.f32 1.0, %v6788_v0  ;;  %v3691_v9 = vpop.f32.mrb[182].mxu1  ;;  %4044 = vst [vmem:[#allocation2 + $0xa0] sm:$0xff] %v3975_v5  ;;  %v7849_v14 = vadd.f32 %v7638_v51, %v3975_v5 }
 0x259   : > { %v6336_v10 = vpop.f32.mrb[187].mxu0  ;;  %v6790_v11 = vpop.eup %6789  ;;  %v5801_v12 = vpack.c.bf16 %v4665_v3, %v4664_v54  ;;  %v3976_v16 = vadd.f32 %v3691_v9, %v2822_v60  ;;  %v2824_v31 = vadd.f32 %v2755_v24, %v2545_v6  ;;  %v5596_v6 = vld [vmem:[%s7728_s4 + $0x44] sm:$0xf] }
 0x25a   : > { %v6474_v17 = vpop.f32.mrb[183].mxu1  ;;  %6799 = vrcp.f32 %v4461_v7  ;;  %v4462_v13 = vadd.f32 1.0, %v6790_v11  ;;  %v5511_v20 = vmul.f32 -1.442695, %v7849_v14 }
 0x25b   : > { %5849 = vst [vmem:[%s7728_s4 + $0x30] sm:$0xff] %v5801_v12   ;;  %4045 = vst [vmem:[#allocation2 + $0xa8] sm:$0xff] %v3976_v16  ;;  %v7854_v2 = vadd.f32 %v7638_v51, %v3976_v16 }
 0x25c   : > { %v6792_v18 = vpop.eup %6791  ;;  %6801 = vrcp.f32 %v4462_v13 }
 0x25d   : > { %v4666_v25 = vmul.f32 %v6792_v18, %v7807_v45  ;;  %6803 = vpow2.f32 %v5511_v20  ;;  %v5512_v23 = vmul.f32 -1.442695, %v7854_v2  ;;  %v2550_v26 = vpop.f32.mrb[188].mxu0  ;;  %v3696_v32 = vpop.f32.mrb[184].mxu1 }
 0x25e   : > { %v6794_v27 = vpop.eup %6793  ;;  %v6339_v33 = vpop.f32.mrb[189].mxu0  ;;  %v3977_v38 = vadd.f32 %v3696_v32, %v2823_v8  ;;  %v2825_v55 = vadd.f32 %v2756_v52, %v2550_v26  ;;  %v2758_v8 = vld [vmem:[#allocation2 + $0xd0] sm:$0xff]  ;;  %v2759_v26 = vld [vmem:[#allocation2 + $0xd8] sm:$0xff] }
 0x25f   : > { %v6796_v35 = vpop.eup %6795  ;;  %v5733_v36 = vpack.c.bf16 %v4666_v25, %v4666_v25  ;;  %v4667_v37 = vmul.f32 %v6794_v27, %v7812_v48  ;;  %6805 = vpow2.f32 %v5512_v23  ;;  %v6477_v45 = vpop.f32.mrb[185].mxu1 }
 0x260   : > { %v2553_v1 = vpop.f32.mrb[190].mxu0  ;;  %v4463_v39 = vadd.f32 1.0, %v6796_v35  ;;  %v3699_v29 = vpop.f32.mrb[186].mxu1  ;;  %4046 = vst [vmem:[#allocation2 + $0xb0] sm:$0xff] %v3977_v38  ;;  %v7863_v44 = vadd.f32 %v7638_v51, %v3977_v38 }
 0x261   : > { %v6340_v40 = vpop.f32.mrb[191].mxu0  ;;  %v6798_v41 = vpop.eup %6797  ;;  %v4839_v42 = vsel %vm7754_vm5, %v5733_v36, %v5589_v30  ;;  %v5734_v34 = vpack.c.bf16 %v4667_v37, %v4667_v37  ;;  %v3978_v47 = vadd.f32 %v3699_v29, %v2824_v31  ;;  %v2826_v60 = vadd.f32 %v2757_v63, %v2553_v1 }
 0x262   : > { %v6478_v22 = vpop.f32.mrb[187].mxu1  ;;  %5590 = vst [vmem:[%s7728_s4 + $0x38] sm:$0xf] %v4839_v42  ;;  %6807 = vrcp.f32 %v4463_v39  ;;  %v4464_v48 = vadd.f32 1.0, %v6798_v41  ;;  %v5513_v43 = vmul.f32 -1.442695, %v7863_v44 }
 0x263   : > { %5594 = vst [vmem:[%s7728_s4 + $0x3c] sm:$0xf] %v5734_v34  ;;  %4047 = vst [vmem:[#allocation2 + $0xb8] sm:$0xff] %v3978_v47  ;;  %v7869_v28 = vadd.f32 %v7638_v51, %v3978_v47  ;;  %v7892_v42 = vld [vmem:[%s8210_s2] ss:$0 sm:$0xff] }
 0x264   : > { %v6800_v49 = vpop.eup %6799  ;;  %6809 = vrcp.f32 %v4464_v48 }
 0x265   : > { %v4668_v53 = vmul.f32 %v6800_v49, %v7822_v59  ;;  %6811 = vpow2.f32 %v5513_v43  ;;  %v5514_v56 = vmul.f32 -1.442695, %v7869_v28  ;;  %v2558_v4 = vpop.f32.mrb[192].mxu0  ;;  %v3704_v61 = vpop.f32.mrb[188].mxu1  ;;  %v2760_v49 = vld [vmem:[#allocation2 + $0xe0] sm:$0xff] }
 0x266   : > { %v6802_v57 = vpop.eup %6801  ;;  %v6343_v62 = vpop.f32.mrb[193].mxu0  ;;  %v3979_v5 = vadd.f32 %v3704_v61, %v2825_v55  ;;  %v2827_v23 = vadd.f32 %v2758_v8, %v2558_v4 }
 0x267   : > { %v6804_v0 = vpop.eup %6803  ;;  %v5735_v54 = vpack.c.bf16 %v4668_v53, %v4668_v53  ;;  %v4669_v3 = vmul.f32 %v6802_v57, %v7828_v19  ;;  %6813 = vpow2.f32 %v5514_v56  ;;  %v6481_v58 = vpop.f32.mrb[189].mxu1  ;;  %v2761_v56 = vld [vmem:[#allocation2 + $0xe8] sm:$0xff]  ;;  %v5603_v57 = vld [vmem:[%s7728_s4 + $0x50] sm:$0xf] }
 0x268   : > { %v2561_v59 = vpop.f32.mrb[194].mxu0  ;;  %v4465_v7 = vadd.f32 1.0, %v6804_v0  ;;  %v3707_v9 = vpop.f32.mrb[190].mxu1  ;;  %4048 = vst [vmem:[#allocation2 + $0xc0] sm:$0xff] %v3979_v5  ;;  %v7877_v16 = vadd.f32 %v7638_v51, %v3979_v5 }
 0x269   : > { %v6344_v10 = vpop.f32.mrb[195].mxu0  ;;  %v6806_v11 = vpop.eup %6805  ;;  %5595 = vst [vmem:[%s7728_s4 + $0x40] sm:$0xf] %v5735_v54  ;;  %v5736_v12 = vpack.c.bf16 %v4669_v3, %v4669_v3  ;;  %v3980_v17 = vadd.f32 %v3707_v9, %v2826_v60  ;;  %v2828_v31 = vadd.f32 %v2759_v26, %v2561_v59  ;;  %v2763_v26 = vld [vmem:[#allocation2 + $0xf8] sm:$0xff] }
 0x26a   : > { %v6482_v13 = vpop.f32.mrb[191].mxu1  ;;  %6815 = vrcp.f32 %v4465_v7  ;;  %v4466_v19 = vadd.f32 1.0, %v6806_v11  ;;  %v5515_v18 = vmul.f32 -1.442695, %v7877_v16 }
 0x26b   : > { %v4855_v20 = vsel %vm7754_vm5, %v5736_v12, %v5596_v6  ;;  %4049 = vst [vmem:[#allocation2 + $0xc8] sm:$0xff] %v3980_v17  ;;  %v7883_v21 = vadd.f32 %v7638_v51, %v3980_v17 }
 0x26c   : > { %v6808_v25 = vpop.eup %6807  ;;  %5597 = vst [vmem:[%s7728_s4 + $0x44] sm:$0xf] %v4855_v20  ;;  %6817 = vrcp.f32 %v4466_v19 }
 0x26d   : > { %6819 = vpow2.f32 %v5515_v18  ;;  %v5516_v24 = vmul.f32 -1.442695, %v7883_v21  ;;  %v2566_v27 = vpop.f32.mrb[196].mxu0  ;;  %v3712_v32 = vpop.f32.mrb[192].mxu1  ;;  %v4670_v36 = vmul.f32 %v6808_v25, %v7836_v46  ;;  %v2762_v25 = vld [vmem:[#allocation2 + $0xf0] sm:$0xff] }
 0x26e   : > { %v6810_v30 = vpop.eup %6809  ;;  %v6347_v33 = vpop.f32.mrb[197].mxu0  ;;  %v3981_v37 = vadd.f32 %v3712_v32, %v2827_v23  ;;  %v2829_v53 = vadd.f32 %v2760_v49, %v2566_v27 }
 0x26f   : > { %v6812_v35 = vpop.eup %6811  ;;  %v4671_v51 = vmul.f32 %v6810_v30, %v7842_v50  ;;  %6821 = vpow2.f32 %v5516_v24  ;;  %v6485_v38 = vpop.f32.mrb[193].mxu1 }
 0x270   : > { %v2569_v45 = vpop.f32.mrb[198].mxu0  ;;  %v4467_v1 = vadd.f32 1.0, %v6812_v35  ;;  %v3715_v39 = vpop.f32.mrb[194].mxu1  ;;  %4050 = vst [vmem:[#allocation2 + $0xd0] sm:$0xff] %v3981_v37  ;;  %v7895_v46 = vadd.f32 %v7892_v42, %v3981_v37 }
 0x271   : > { %v6348_v29 = vpop.f32.mrb[199].mxu0  ;;  %v6814_v40 = vpop.eup %6813  ;;  %v5806_v41 = vpack.c.bf16 %v4671_v51, %v4670_v36  ;;  %v3982_v50 = vadd.f32 %v3715_v39, %v2828_v31  ;;  %v2830_v60 = vadd.f32 %v2761_v56, %v2569_v45  ;;  %v5610_v45 = vld [vmem:[%s7728_s4 + $0x5c] sm:$0xf] }
 0x272   : > { %v6486_v34 = vpop.f32.mrb[195].mxu1  ;;  %6823 = vrcp.f32 %v4467_v1  ;;  %v4468_v47 = vadd.f32 1.0, %v6814_v40  ;;  %v5517_v22 = vmul.f32 -1.442695, %v7895_v46 }
 0x273   : > { %5850 = vst [vmem:[%s7728_s4 + $0x48] sm:$0xff] %v5806_v41   ;;  %4051 = vst [vmem:[#allocation2 + $0xd8] sm:$0xff] %v3982_v50  ;;  %v7900_v48 = vadd.f32 %v7892_v42, %v3982_v50 }
 0x274   : > { %v6816_v43 = vpop.eup %6815  ;;  %6825 = vrcp.f32 %v4468_v47 }
 0x275   : > { %v4672_v52 = vmul.f32 %v6816_v43, %v7849_v14  ;;  %6827 = vpow2.f32 %v5517_v22  ;;  %v5518_v55 = vmul.f32 -1.442695, %v7900_v48  ;;  %v2574_v63 = vpop.f32.mrb[200].mxu0  ;;  %v3720_v61 = vpop.f32.mrb[196].mxu1 }
 0x276   : > { %v6818_v4 = vpop.eup %6817  ;;  %v6351_v62 = vpop.f32.mrb[201].mxu0  ;;  %v3983_v5 = vadd.f32 %v3720_v61, %v2829_v53  ;;  %v2831_v23 = vadd.f32 %v2762_v25, %v2574_v63  ;;  %v2764_v53 = vld [vmem:[#allocation2 + $0x100] sm:$0xff]  ;;  %v2765_v63 = vld [vmem:[#allocation2 + $0x108] sm:$0xff] }
 0x277   : > { %v6820_v0 = vpop.eup %6819  ;;  %v5739_v54 = vpack.c.bf16 %v4672_v52, %v4672_v52  ;;  %v4673_v3 = vmul.f32 %v6818_v4, %v7854_v2  ;;  %6829 = vpow2.f32 %v5518_v55  ;;  %v6489_v14 = vpop.f32.mrb[197].mxu1 }
 0x278   : > { %v2577_v58 = vpop.f32.mrb[202].mxu0  ;;  %v4469_v59 = vadd.f32 1.0, %v6820_v0  ;;  %v3723_v6 = vpop.f32.mrb[198].mxu1  ;;  %4052 = vst [vmem:[#allocation2 + $0xe0] sm:$0xff] %v3983_v5  ;;  %v7909_v12 = vadd.f32 %v7892_v42, %v3983_v5 }
 0x279   : > { %v6352_v7 = vpop.f32.mrb[203].mxu0  ;;  %v6822_v9 = vpop.eup %6821  ;;  %v4872_v10 = vsel %vm7754_vm5, %v5739_v54, %v5603_v57  ;;  %v5740_v11 = vpack.c.bf16 %v4673_v3, %v4673_v3  ;;  %v3984_v17 = vadd.f32 %v3723_v6, %v2830_v60  ;;  %v2832_v31 = vadd.f32 %v2763_v26, %v2577_v58 }
 0x27a   : > { %v6490_v13 = vpop.f32.mrb[199].mxu1  ;;  %5604 = vst [vmem:[%s7728_s4 + $0x50] sm:$0xf] %v4872_v10  ;;  %6831 = vrcp.f32 %v4469_v59  ;;  %v4470_v2 = vadd.f32 1.0, %v6822_v9  ;;  %v5519_v19 = vmul.f32 -1.442695, %v7909_v12 }
 0x27b   : > { %5608 = vst [vmem:[%s7728_s4 + $0x54] sm:$0xf] %v5740_v11  ;;  %4053 = vst [vmem:[#allocation2 + $0xe8] sm:$0xff] %v3984_v17  ;;  %v7915_v20 = vadd.f32 %v7892_v42, %v3984_v17 }
 0x27c   : > { %v6824_v18 = vpop.eup %6823  ;;  %6833 = vrcp.f32 %v4470_v2 }
 0x27d   : > { %v4674_v8 = vmul.f32 %v6824_v18, %v7863_v44  ;;  %6835 = vpow2.f32 %v5519_v19  ;;  %v5520_v24 = vmul.f32 -1.442695, %v7915_v20  ;;  %v2582_v27 = vpop.f32.mrb[204].mxu0  ;;  %v3728_v32 = vpop.f32.mrb[200].mxu1  ;;  %v2766_v18 = vld [vmem:[#allocation2 + $0x110] sm:$0xff] }
 0x27e   : > { %v6826_v30 = vpop.eup %6825  ;;  %v6355_v33 = vpop.f32.mrb[205].mxu0  ;;  %v3985_v37 = vadd.f32 %v3728_v32, %v2831_v23  ;;  %v2833_v55 = vadd.f32 %v2764_v53, %v2582_v27 }
 0x27f   : > { %v6828_v35 = vpop.eup %6827  ;;  %v5741_v36 = vpack.c.bf16 %v4674_v8, %v4674_v8  ;;  %v4675_v51 = vmul.f32 %v6826_v30, %v7869_v28  ;;  %6837 = vpow2.f32 %v5520_v24  ;;  %v6493_v38 = vpop.f32.mrb[201].mxu1  ;;  %v2767_v24 = vld [vmem:[#allocation2 + $0x118] sm:$0xff]  ;;  %v5617_v30 = vld [vmem:[%s7728_s4 + $0x68] sm:$0xf] }
 0x280   : > { %v2585_v44 = vpop.f32.mrb[206].mxu0  ;;  %v4471_v1 = vadd.f32 1.0, %v6828_v35  ;;  %v3731_v39 = vpop.f32.mrb[202].mxu1  ;;  %4054 = vst [vmem:[#allocation2 + $0xf0] sm:$0xff] %v3985_v37  ;;  %v7923_v50 = vadd.f32 %v7892_v42, %v3985_v37 }
 0x281   : > { %v6356_v29 = vpop.f32.mrb[207].mxu0  ;;  %v6830_v40 = vpop.eup %6829  ;;  %5609 = vst [vmem:[%s7728_s4 + $0x58] sm:$0xf] %v5741_v36  ;;  %v5742_v41 = vpack.c.bf16 %v4675_v51, %v4675_v51  ;;  %v3986_v34 = vadd.f32 %v3731_v39, %v2832_v31  ;;  %v2834_v60 = vadd.f32 %v2765_v63, %v2585_v44  ;;  %v2769_v63 = vld [vmem:[#allocation2 + $0x128] sm:$0xff] }
 0x282   : > { %v6494_v47 = vpop.f32.mrb[203].mxu1  ;;  %6839 = vrcp.f32 %v4471_v1  ;;  %v4472_v28 = vadd.f32 1.0, %v6830_v40  ;;  %v5521_v43 = vmul.f32 -1.442695, %v7923_v50 }
 0x283   : > { %v4888_v22 = vsel %vm7754_vm5, %v5742_v41, %v5610_v45  ;;  %4055 = vst [vmem:[#allocation2 + $0xf8] sm:$0xff] %v3986_v34  ;;  %v7929_v49 = vadd.f32 %v7892_v42, %v3986_v34 }
 0x284   : > { %v6832_v52 = vpop.eup %6831  ;;  %5611 = vst [vmem:[%s7728_s4 + $0x5c] sm:$0xf] %v4888_v22  ;;  %6841 = vrcp.f32 %v4472_v28 }
 0x285   : > { %6843 = vpow2.f32 %v5521_v43  ;;  %v5522_v56 = vmul.f32 -1.442695, %v7929_v49  ;;  %v2590_v4 = vpop.f32.mrb[208].mxu0  ;;  %v3736_v61 = vpop.f32.mrb[204].mxu1  ;;  %v4676_v54 = vmul.f32 %v6832_v52, %v7877_v16  ;;  %v2768_v52 = vld [vmem:[#allocation2 + $0x120] sm:$0xff] }
 0x286   : > { %v6834_v57 = vpop.eup %6833  ;;  %v6359_v62 = vpop.f32.mrb[209].mxu0  ;;  %v3987_v5 = vadd.f32 %v3736_v61, %v2833_v55  ;;  %v2835_v8 = vadd.f32 %v2766_v18, %v2590_v4 }
 0x287   : > { %v6836_v0 = vpop.eup %6835  ;;  %v4677_v3 = vmul.f32 %v6834_v57, %v7883_v21  ;;  %6845 = vpow2.f32 %v5522_v56  ;;  %v6497_v14 = vpop.f32.mrb[205].mxu1 }
 0x288   : > { %v2593_v58 = vpop.f32.mrb[210].mxu0  ;;  %v4473_v59 = vadd.f32 1.0, %v6836_v0  ;;  %v3739_v6 = vpop.f32.mrb[206].mxu1  ;;  %4056 = vst [vmem:[#allocation2 + $0x100] sm:$0xff] %v3987_v5  ;;  %v7936_v11 = vadd.f32 %v7892_v42, %v3987_v5 }
 0x289   : > { %v6360_v7 = vpop.f32.mrb[211].mxu0  ;;  %v6838_v9 = vpop.eup %6837  ;;  %v5811_v10 = vpack.c.bf16 %v4677_v3, %v4676_v54  ;;  %v3988_v17 = vadd.f32 %v3739_v6, %v2834_v60  ;;  %v2836_v31 = vadd.f32 %v2767_v24, %v2593_v58  ;;  %v5624_v58 = vld [vmem:[%s7728_s4 + $0x74] sm:$0xf] }
 0x28a   : > { %v6498_v13 = vpop.f32.mrb[207].mxu1  ;;  %6847 = vrcp.f32 %v4473_v59  ;;  %v4474_v16 = vadd.f32 1.0, %v6838_v9  ;;  %v5523_v21 = vmul.f32 -1.442695, %v7936_v11 }
 0x28b   : > { %5851 = vst [vmem:[%s7728_s4 + $0x60] sm:$0xff] %v5811_v10   ;;  %4057 = vst [vmem:[#allocation2 + $0x108] sm:$0xff] %v3988_v17  ;;  %v7941_v2 = vadd.f32 %v7892_v42, %v3988_v17 }
 0x28c   : > { %v6840_v19 = vpop.eup %6839  ;;  %6849 = vrcp.f32 %v4474_v16 }
 0x28d   : > { %v4678_v25 = vmul.f32 %v6840_v19, %v7895_v46  ;;  %6851 = vpow2.f32 %v5523_v21  ;;  %v5524_v23 = vmul.f32 -1.442695, %v7941_v2  ;;  %v2598_v26 = vpop.f32.mrb[212].mxu0  ;;  %v3744_v32 = vpop.f32.mrb[208].mxu1 }
 0x28e   : > { %v6842_v27 = vpop.eup %6841  ;;  %v6363_v33 = vpop.f32.mrb[213].mxu0  ;;  %v3989_v37 = vadd.f32 %v3744_v32, %v2835_v8  ;;  %v2837_v55 = vadd.f32 %v2768_v52, %v2598_v26  ;;  %v2770_v8 = vld [vmem:[#allocation2 + $0x130] sm:$0xff]  ;;  %v2771_v26 = vld [vmem:[#allocation2 + $0x138] sm:$0xff] }
 0x28f   : > { %v6844_v35 = vpop.eup %6843  ;;  %v5745_v36 = vpack.c.bf16 %v4678_v25, %v4678_v25  ;;  %v4679_v51 = vmul.f32 %v6842_v27, %v7900_v48  ;;  %6853 = vpow2.f32 %v5524_v23  ;;  %v6501_v46 = vpop.f32.mrb[209].mxu1 }
 0x290   : > { %v2601_v38 = vpop.f32.mrb[214].mxu0  ;;  %v4475_v44 = vadd.f32 1.0, %v6844_v35  ;;  %v3747_v45 = vpop.f32.mrb[210].mxu1  ;;  %4058 = vst [vmem:[#allocation2 + $0x110] sm:$0xff] %v3989_v37  ;;  %v7950_v41 = vadd.f32 %v7892_v42, %v3989_v37 }
 0x291   : > { %v6364_v1 = vpop.f32.mrb[215].mxu0  ;;  %v6846_v39 = vpop.eup %6845  ;;  %v4905_v29 = vsel %vm7754_vm5, %v5745_v36, %v5617_v30  ;;  %v5746_v40 = vpack.c.bf16 %v4679_v51, %v4679_v51  ;;  %v3990_v34 = vadd.f32 %v3747_v45, %v2836_v31  ;;  %v2838_v60 = vadd.f32 %v2769_v63, %v2601_v38 }
 0x292   : > { %v6502_v47 = vpop.f32.mrb[211].mxu1  ;;  %5618 = vst [vmem:[%s7728_s4 + $0x68] sm:$0xf] %v4905_v29  ;;  %6855 = vrcp.f32 %v4475_v44  ;;  %v4476_v48 = vadd.f32 1.0, %v6846_v39  ;;  %v5525_v28 = vmul.f32 -1.442695, %v7950_v41 }
 0x293   : > { %5622 = vst [vmem:[%s7728_s4 + $0x6c] sm:$0xf] %v5746_v40  ;;  %4059 = vst [vmem:[#allocation2 + $0x118] sm:$0xff] %v3990_v34  ;;  %v7956_v22 = vadd.f32 %v7892_v42, %v3990_v34 }
 0x294   : > { %v6848_v43 = vpop.eup %6847  ;;  %6857 = vrcp.f32 %v4476_v48 }
 0x295   : > { %v4680_v53 = vmul.f32 %v6848_v43, %v7909_v12  ;;  %6859 = vpow2.f32 %v5525_v28  ;;  %v5526_v56 = vmul.f32 -1.442695, %v7956_v22  ;;  %v2606_v4 = vpop.f32.mrb[216].mxu0  ;;  %v3752_v61 = vpop.f32.mrb[212].mxu1  ;;  %v2772_v43 = vld [vmem:[#allocation2 + $0x140] sm:$0xff] }
 0x296   : > { %v6850_v57 = vpop.eup %6849  ;;  %v6367_v62 = vpop.f32.mrb[217].mxu0  ;;  %v3991_v5 = vadd.f32 %v3752_v61, %v2837_v55  ;;  %v2839_v23 = vadd.f32 %v2770_v8, %v2606_v4 }
 0x297   : > { %v6852_v0 = vpop.eup %6851  ;;  %v5747_v54 = vpack.c.bf16 %v4680_v53, %v4680_v53  ;;  %v4681_v3 = vmul.f32 %v6850_v57, %v7915_v20  ;;  %6861 = vpow2.f32 %v5526_v56  ;;  %v6505_v14 = vpop.f32.mrb[213].mxu1  ;;  %v2773_v56 = vld [vmem:[#allocation2 + $0x148] sm:$0xff]  ;;  %v5631_v57 = vld [vmem:[%s7728_s4 + $0x80] sm:$0xf] }
 0x298   : > { %v2609_v12 = vpop.f32.mrb[218].mxu0  ;;  %v4477_v59 = vadd.f32 1.0, %v6852_v0  ;;  %v3755_v6 = vpop.f32.mrb[214].mxu1  ;;  %4060 = vst [vmem:[#allocation2 + $0x120] sm:$0xff] %v3991_v5  ;;  %v7964_v17 = vadd.f32 %v7892_v42, %v3991_v5 }
 0x299   : > { %v6368_v7 = vpop.f32.mrb[219].mxu0  ;;  %v6854_v9 = vpop.eup %6853  ;;  %5623 = vst [vmem:[%s7728_s4 + $0x70] sm:$0xf] %v5747_v54  ;;  %v5748_v10 = vpack.c.bf16 %v4681_v3, %v4681_v3  ;;  %v3992_v13 = vadd.f32 %v3755_v6, %v2838_v60  ;;  %v2840_v31 = vadd.f32 %v2771_v26, %v2609_v12  ;;  %v2775_v26 = vld [vmem:[#allocation2 + $0x158] sm:$0xff] }
 0x29a   : > { %v6506_v16 = vpop.f32.mrb[215].mxu1  ;;  %6863 = vrcp.f32 %v4477_v59  ;;  %v4478_v20 = vadd.f32 1.0, %v6854_v9  ;;  %v5527_v19 = vmul.f32 -1.442695, %v7964_v17 }
 0x29b   : > { %v4921_v21 = vsel %vm7754_vm5, %v5748_v10, %v5624_v58  ;;  %4061 = vst [vmem:[#allocation2 + $0x128] sm:$0xff] %v3992_v13  ;;  %v7970_v18 = vadd.f32 %v7892_v42, %v3992_v13 }
 0x29c   : > { %v6856_v25 = vpop.eup %6855  ;;  %5625 = vst [vmem:[%s7728_s4 + $0x74] sm:$0xf] %v4921_v21  ;;  %6865 = vrcp.f32 %v4478_v20 }
 0x29d   : > { %6867 = vpow2.f32 %v5527_v19  ;;  %v5528_v24 = vmul.f32 -1.442695, %v7970_v18  ;;  %v2614_v27 = vpop.f32.mrb[220].mxu0  ;;  %v3760_v32 = vpop.f32.mrb[216].mxu1  ;;  %v4682_v36 = vmul.f32 %v6856_v25, %v7923_v50  ;;  %v2774_v25 = vld [vmem:[#allocation2 + $0x150] sm:$0xff] }
 0x29e   : > { %v6858_v30 = vpop.eup %6857  ;;  %v6371_v33 = vpop.f32.mrb[221].mxu0  ;;  %v3993_v37 = vadd.f32 %v3760_v32, %v2839_v23  ;;  %v2841_v53 = vadd.f32 %v2772_v43, %v2614_v27 }
 0x29f   : > { %v6860_v35 = vpop.eup %6859  ;;  %v4683_v51 = vmul.f32 %v6858_v30, %v7929_v49  ;;  %6869 = vpow2.f32 %v5528_v24  ;;  %v6509_v46 = vpop.f32.mrb[217].mxu1 }
 0x2a0   : > { %v2617_v38 = vpop.f32.mrb[222].mxu0  ;;  %v4479_v44 = vadd.f32 1.0, %v6860_v35  ;;  %v3763_v45 = vpop.f32.mrb[218].mxu1  ;;  %4062 = vst [vmem:[#allocation2 + $0x130] sm:$0xff] %v3993_v37  ;;  %v7977_v40 = vadd.f32 %v7892_v42, %v3993_v37 }
 0x2a1   : > { %v6372_v1 = vpop.f32.mrb[223].mxu0  ;;  %v6862_v39 = vpop.eup %6861  ;;  %v5816_v29 = vpack.c.bf16 %v4683_v51, %v4682_v36  ;;  %v3994_v34 = vadd.f32 %v3763_v45, %v2840_v31  ;;  %v2842_v60 = vadd.f32 %v2773_v56, %v2617_v38  ;;  %v5638_v38 = vld [vmem:[%s7728_s4 + $0x8c] sm:$0xf] }
 0x2a2   : > { %v6510_v47 = vpop.f32.mrb[219].mxu1  ;;  %6871 = vrcp.f32 %v4479_v44  ;;  %v4480_v50 = vadd.f32 1.0, %v6862_v39  ;;  %v5529_v49 = vmul.f32 -1.442695, %v7977_v40 }
 0x2a3   : > { %5852 = vst [vmem:[%s7728_s4 + $0x78] sm:$0xff] %v5816_v29   ;;  %4063 = vst [vmem:[#allocation2 + $0x138] sm:$0xff] %v3994_v34  ;;  %v7982_v48 = vadd.f32 %v7892_v42, %v3994_v34 }
 0x2a4   : > { %v6864_v28 = vpop.eup %6863  ;;  %6873 = vrcp.f32 %v4480_v50 }
 0x2a5   : > { %v4684_v52 = vmul.f32 %v6864_v28, %v7936_v11  ;;  %6875 = vpow2.f32 %v5529_v49  ;;  %v5530_v55 = vmul.f32 -1.442695, %v7982_v48  ;;  %v2622_v63 = vpop.f32.mrb[224].mxu0  ;;  %v3768_v61 = vpop.f32.mrb[220].mxu1 }
 0x2a6   : > { %v6866_v4 = vpop.eup %6865  ;;  %v6375_v62 = vpop.f32.mrb[225].mxu0  ;;  %v3995_v5 = vadd.f32 %v3768_v61, %v2841_v53  ;;  %v2843_v23 = vadd.f32 %v2774_v25, %v2622_v63  ;;  %v2776_v53 = vld [vmem:[#allocation2 + $0x160] sm:$0xff]  ;;  %v2777_v63 = vld [vmem:[#allocation2 + $0x168] sm:$0xff] }
 0x2a7   : > { %v6868_v0 = vpop.eup %6867  ;;  %v5751_v54 = vpack.c.bf16 %v4684_v52, %v4684_v52  ;;  %v4685_v3 = vmul.f32 %v6866_v4, %v7941_v2  ;;  %6877 = vpow2.f32 %v5530_v55  ;;  %v6513_v11 = vpop.f32.mrb[221].mxu1 }
 0x2a8   : > { %v2625_v14 = vpop.f32.mrb[226].mxu0  ;;  %v4481_v12 = vadd.f32 1.0, %v6868_v0  ;;  %v3771_v58 = vpop.f32.mrb[222].mxu1  ;;  %4064 = vst [vmem:[#allocation2 + $0x140] sm:$0xff] %v3995_v5  ;;  %v7991_v10 = vadd.f32 %v7892_v42, %v3995_v5 }
 0x2a9   : > { %v6376_v59 = vpop.f32.mrb[227].mxu0  ;;  %v6870_v6 = vpop.eup %6869  ;;  %v4938_v7 = vsel %vm7754_vm5, %v5751_v54, %v5631_v57  ;;  %v5752_v9 = vpack.c.bf16 %v4685_v3, %v4685_v3  ;;  %v3996_v13 = vadd.f32 %v3771_v58, %v2842_v60  ;;  %v2844_v31 = vadd.f32 %v2775_v26, %v2625_v14 }
 0x2aa   : > { %v6514_v16 = vpop.f32.mrb[223].mxu1  ;;  %5632 = vst [vmem:[%s7728_s4 + $0x80] sm:$0xf] %v4938_v7  ;;  %6879 = vrcp.f32 %v4481_v12  ;;  %v4482_v2 = vadd.f32 1.0, %v6870_v6  ;;  %v5531_v20 = vmul.f32 -1.442695, %v7991_v10 }
 0x2ab   : > { %5636 = vst [vmem:[%s7728_s4 + $0x84] sm:$0xf] %v5752_v9  ;;  %4065 = vst [vmem:[#allocation2 + $0x148] sm:$0xff] %v3996_v13  ;;  %v7997_v21 = vadd.f32 %v7892_v42, %v3996_v13 }
 0x2ac   : > { %v6872_v19 = vpop.eup %6871  ;;  %6881 = vrcp.f32 %v4482_v2 }
 0x2ad   : > { %v4686_v8 = vmul.f32 %v6872_v19, %v7950_v41  ;;  %6883 = vpow2.f32 %v5531_v20  ;;  %v5532_v24 = vmul.f32 -1.442695, %v7997_v21  ;;  %v2630_v27 = vpop.f32.mrb[228].mxu0  ;;  %v3776_v32 = vpop.f32.mrb[224].mxu1  ;;  %v2778_v19 = vld [vmem:[#allocation2 + $0x170] sm:$0xff] }
 0x2ae   : > { %v6874_v30 = vpop.eup %6873  ;;  %v6379_v33 = vpop.f32.mrb[229].mxu0  ;;  %v3997_v37 = vadd.f32 %v3776_v32, %v2843_v23  ;;  %v2845_v55 = vadd.f32 %v2776_v53, %v2630_v27 }
 0x2af   : > { %v6876_v35 = vpop.eup %6875  ;;  %v5753_v36 = vpack.c.bf16 %v4686_v8, %v4686_v8  ;;  %v4687_v51 = vmul.f32 %v6874_v30, %v7956_v22  ;;  %6885 = vpow2.f32 %v5532_v24  ;;  %v6517_v46 = vpop.f32.mrb[225].mxu1  ;;  %v2779_v24 = vld [vmem:[#allocation2 + $0x178] sm:$0xff] }
 0x2b0   : > { %v2633_v41 = vpop.f32.mrb[230].mxu0  ;;  %v4483_v44 = vadd.f32 1.0, %v6876_v35  ;;  %v3779_v45 = vpop.f32.mrb[226].mxu1  ;;  %4066 = vst [vmem:[#allocation2 + $0x150] sm:$0xff] %v3997_v37  ;;  %v8005_v34 = vadd.f32 %v7892_v42, %v3997_v37  ;;  %v5645_v30 = vld [vmem:[%s7728_s4 + $0x98] sm:$0xf] }
 0x2b1   : > { %v6380_v1 = vpop.f32.mrb[231].mxu0  ;;  %v6878_v39 = vpop.eup %6877  ;;  %5637 = vst [vmem:[%s7728_s4 + $0x88] sm:$0xf] %v5753_v36  ;;  %v5754_v29 = vpack.c.bf16 %v4687_v51, %v4687_v51  ;;  %v3998_v47 = vadd.f32 %v3779_v45, %v2844_v31  ;;  %v2846_v60 = vadd.f32 %v2777_v63, %v2633_v41  ;;  %v2781_v63 = vld [vmem:[#allocation2 + $0x188] sm:$0xff] }
 0x2b2   : > { %v6518_v50 = vpop.f32.mrb[227].mxu1  ;;  %6887 = vrcp.f32 %v4483_v44  ;;  %v4484_v22 = vadd.f32 1.0, %v6878_v39  ;;  %v5533_v28 = vmul.f32 -1.442695, %v8005_v34 }
 0x2b3   : > { %v4954_v49 = vsel %vm7754_vm5, %v5754_v29, %v5638_v38  ;;  %4067 = vst [vmem:[#allocation2 + $0x158] sm:$0xff] %v3998_v47  ;;  %v8011_v43 = vadd.f32 %v7892_v42, %v3998_v47 }
 0x2b4   : > { %v6880_v52 = vpop.eup %6879  ;;  %5639 = vst [vmem:[%s7728_s4 + $0x8c] sm:$0xf] %v4954_v49  ;;  %6889 = vrcp.f32 %v4484_v22 }
 0x2b5   : > { %6891 = vpow2.f32 %v5533_v28  ;;  %v5534_v56 = vmul.f32 -1.442695, %v8011_v43  ;;  %v2638_v4 = vpop.f32.mrb[232].mxu0  ;;  %v3784_v61 = vpop.f32.mrb[228].mxu1  ;;  %v4688_v54 = vmul.f32 %v6880_v52, %v7964_v17  ;;  %v2780_v52 = vld [vmem:[#allocation2 + $0x180] sm:$0xff] }
 0x2b6   : > { %v6882_v57 = vpop.eup %6881  ;;  %v6383_v62 = vpop.f32.mrb[233].mxu0  ;;  %v3999_v5 = vadd.f32 %v3784_v61, %v2845_v55  ;;  %v2847_v8 = vadd.f32 %v2778_v19, %v2638_v4 }
 0x2b7   : > { %v6884_v0 = vpop.eup %6883  ;;  %v4689_v3 = vmul.f32 %v6882_v57, %v7970_v18  ;;  %6893 = vpow2.f32 %v5534_v56  ;;  %v6521_v11 = vpop.f32.mrb[229].mxu1 }
 0x2b8   : > { %v2641_v14 = vpop.f32.mrb[234].mxu0  ;;  %v4485_v12 = vadd.f32 1.0, %v6884_v0  ;;  %v3787_v58 = vpop.f32.mrb[230].mxu1  ;;  %4068 = vst [vmem:[#allocation2 + $0x160] sm:$0xff] %v3999_v5  ;;  %v8018_v9 = vadd.f32 %v7892_v42, %v3999_v5 }
 0x2b9   : > { %v6384_v59 = vpop.f32.mrb[235].mxu0  ;;  %v6886_v6 = vpop.eup %6885  ;;  %v5821_v7 = vpack.c.bf16 %v4689_v3, %v4688_v54  ;;  %v4000_v13 = vadd.f32 %v3787_v58, %v2846_v60  ;;  %v2848_v31 = vadd.f32 %v2779_v24, %v2641_v14  ;;  %v5652_v14 = vld [vmem:[%s7728_s4 + $0xa4] sm:$0xf] }
 0x2ba   : > { %v6522_v16 = vpop.f32.mrb[231].mxu1  ;;  %6895 = vrcp.f32 %v4485_v12  ;;  %v4486_v17 = vadd.f32 1.0, %v6886_v6  ;;  %v5535_v18 = vmul.f32 -1.442695, %v8018_v9 }
 0x2bb   : > { %5853 = vst [vmem:[%s7728_s4 + $0x90] sm:$0xff] %v5821_v7   ;;  %4069 = vst [vmem:[#allocation2 + $0x168] sm:$0xff] %v4000_v13  ;;  %v8023_v2 = vadd.f32 %v7892_v42, %v4000_v13 }
 0x2bc   : > { %v6888_v20 = vpop.eup %6887  ;;  %6897 = vrcp.f32 %v4486_v17 }
 0x2bd   : > { %v4690_v25 = vmul.f32 %v6888_v20, %v7977_v40  ;;  %6899 = vpow2.f32 %v5535_v18  ;;  %v5536_v23 = vmul.f32 -1.442695, %v8023_v2  ;;  %v2646_v26 = vpop.f32.mrb[236].mxu0  ;;  %v3792_v32 = vpop.f32.mrb[232].mxu1 }
 0x2be   : > { %v6890_v27 = vpop.eup %6889  ;;  %v6387_v33 = vpop.f32.mrb[237].mxu0  ;;  %v4001_v37 = vadd.f32 %v3792_v32, %v2847_v8  ;;  %v2849_v55 = vadd.f32 %v2780_v52, %v2646_v26  ;;  %v2782_v8 = vld [vmem:[#allocation2 + $0x190] sm:$0xff]  ;;  %v2783_v26 = vld [vmem:[#allocation2 + $0x198] sm:$0xff] }
 0x2bf   : > { %v6892_v35 = vpop.eup %6891  ;;  %v5757_v36 = vpack.c.bf16 %v4690_v25, %v4690_v25  ;;  %v4691_v51 = vmul.f32 %v6890_v27, %v7982_v48  ;;  %6901 = vpow2.f32 %v5536_v23  ;;  %v6525_v40 = vpop.f32.mrb[233].mxu1 }
 0x2c0   : > { %v2649_v46 = vpop.f32.mrb[238].mxu0  ;;  %v4487_v41 = vadd.f32 1.0, %v6892_v35  ;;  %v3795_v38 = vpop.f32.mrb[234].mxu1  ;;  %4070 = vst [vmem:[#allocation2 + $0x170] sm:$0xff] %v4001_v37  ;;  %v8032_v29 = vadd.f32 %v7892_v42, %v4001_v37 }
 0x2c1   : > { %v6388_v44 = vpop.f32.mrb[239].mxu0  ;;  %v6894_v45 = vpop.eup %6893  ;;  %v4971_v1 = vsel %vm7754_vm5, %v5757_v36, %v5645_v30  ;;  %v5758_v39 = vpack.c.bf16 %v4691_v51, %v4691_v51  ;;  %v4002_v47 = vadd.f32 %v3795_v38, %v2848_v31  ;;  %v2850_v60 = vadd.f32 %v2781_v63, %v2649_v46 }
 0x2c2   : > { %v6526_v50 = vpop.f32.mrb[235].mxu1  ;;  %5646 = vst [vmem:[%s7728_s4 + $0x98] sm:$0xf] %v4971_v1  ;;  %6903 = vrcp.f32 %v4487_v41  ;;  %v4488_v48 = vadd.f32 1.0, %v6894_v45  ;;  %v5537_v22 = vmul.f32 -1.442695, %v8032_v29 }
 0x2c3   : > { %5650 = vst [vmem:[%s7728_s4 + $0x9c] sm:$0xf] %v5758_v39  ;;  %4071 = vst [vmem:[#allocation2 + $0x178] sm:$0xff] %v4002_v47  ;;  %v8038_v49 = vadd.f32 %v7892_v42, %v4002_v47 }
 0x2c4   : > { %v6896_v28 = vpop.eup %6895  ;;  %6905 = vrcp.f32 %v4488_v48 }
 0x2c5   : > { %v4692_v53 = vmul.f32 %v6896_v28, %v7991_v10  ;;  %6907 = vpow2.f32 %v5537_v22  ;;  %v5538_v56 = vmul.f32 -1.442695, %v8038_v49  ;;  %v2654_v4 = vpop.f32.mrb[240].mxu0  ;;  %v3800_v61 = vpop.f32.mrb[236].mxu1  ;;  %v2784_v28 = vld [vmem:[#allocation2 + $0x1a0] sm:$0xff] }
 0x2c6   : > { %v6898_v57 = vpop.eup %6897  ;;  %v6391_v62 = vpop.f32.mrb[241].mxu0  ;;  %v4003_v5 = vadd.f32 %v3800_v61, %v2849_v55  ;;  %v2851_v23 = vadd.f32 %v2782_v8, %v2654_v4 }
 0x2c7   : > { %v6900_v0 = vpop.eup %6899  ;;  %v5759_v54 = vpack.c.bf16 %v4692_v53, %v4692_v53  ;;  %v4693_v3 = vmul.f32 %v6898_v57, %v7997_v21  ;;  %6909 = vpow2.f32 %v5538_v56  ;;  %v6529_v11 = vpop.f32.mrb[237].mxu1  ;;  %v2785_v56 = vld [vmem:[#allocation2 + $0x1a8] sm:$0xff]  ;;  %v5659_v57 = vld [vmem:[%s7728_s4 + $0xb0] sm:$0xf] }
 0x2c8   : > { %v2657_v10 = vpop.f32.mrb[242].mxu0  ;;  %v4489_v12 = vadd.f32 1.0, %v6900_v0  ;;  %v3803_v58 = vpop.f32.mrb[238].mxu1  ;;  %4072 = vst [vmem:[#allocation2 + $0x180] sm:$0xff] %v4003_v5  ;;  %v8046_v13 = vadd.f32 %v7892_v42, %v4003_v5 }
 0x2c9   : > { %v6392_v59 = vpop.f32.mrb[243].mxu0  ;;  %v6902_v6 = vpop.eup %6901  ;;  %5651 = vst [vmem:[%s7728_s4 + $0xa0] sm:$0xf] %v5759_v54  ;;  %v5760_v7 = vpack.c.bf16 %v4693_v3, %v4693_v3  ;;  %v4004_v16 = vadd.f32 %v3803_v58, %v2850_v60  ;;  %v2852_v31 = vadd.f32 %v2783_v26, %v2657_v10  ;;  %v2787_v26 = vld [vmem:[#allocation2 + $0x1b8] sm:$0xff] }
 0x2ca   : > { %v6530_v17 = vpop.f32.mrb[239].mxu1  ;;  %6911 = vrcp.f32 %v4489_v12  ;;  %v4490_v21 = vadd.f32 1.0, %v6902_v6  ;;  %v5539_v20 = vmul.f32 -1.442695, %v8046_v13 }
 0x2cb   : > { %v4987_v18 = vsel %vm7754_vm5, %v5760_v7, %v5652_v14  ;;  %4073 = vst [vmem:[#allocation2 + $0x188] sm:$0xff] %v4004_v16  ;;  %v8052_v19 = vadd.f32 %v7892_v42, %v4004_v16 }
 0x2cc   : > { %v6904_v25 = vpop.eup %6903  ;;  %5653 = vst [vmem:[%s7728_s4 + $0xa4] sm:$0xf] %v4987_v18  ;;  %6913 = vrcp.f32 %v4490_v21 }
 0x2cd   : > { %6915 = vpow2.f32 %v5539_v20  ;;  %v5540_v24 = vmul.f32 -1.442695, %v8052_v19  ;;  %v2662_v27 = vpop.f32.mrb[244].mxu0  ;;  %v3808_v32 = vpop.f32.mrb[240].mxu1  ;;  %v4694_v36 = vmul.f32 %v6904_v25, %v8005_v34  ;;  %v2786_v25 = vld [vmem:[#allocation2 + $0x1b0] sm:$0xff] }
 0x2ce   : > { %v6906_v30 = vpop.eup %6905  ;;  %v6395_v33 = vpop.f32.mrb[245].mxu0  ;;  %v4005_v37 = vadd.f32 %v3808_v32, %v2851_v23  ;;  %v2853_v53 = vadd.f32 %v2784_v28, %v2662_v27 }
 0x2cf   : > { %v6908_v35 = vpop.eup %6907  ;;  %v4695_v51 = vmul.f32 %v6906_v30, %v8011_v43  ;;  %6917 = vpow2.f32 %v5540_v24  ;;  %v6533_v40 = vpop.f32.mrb[241].mxu1 }
 0x2d0   : > { %v2665_v46 = vpop.f32.mrb[246].mxu0  ;;  %v4491_v41 = vadd.f32 1.0, %v6908_v35  ;;  %v3811_v38 = vpop.f32.mrb[242].mxu1  ;;  %4074 = vst [vmem:[#allocation2 + $0x190] sm:$0xff] %v4005_v37  ;;  %v8059_v39 = vadd.f32 %v7892_v42, %v4005_v37  ;;  %v5666_v40 = vld [vmem:[%s7728_s4 + $0xbc] sm:$0xf] }
 0x2d1   : > { %v6396_v44 = vpop.f32.mrb[247].mxu0  ;;  %v6910_v45 = vpop.eup %6909  ;;  %v5826_v1 = vpack.c.bf16 %v4695_v51, %v4694_v36  ;;  %v4006_v47 = vadd.f32 %v3811_v38, %v2852_v31  ;;  %v2854_v60 = vadd.f32 %v2785_v56, %v2665_v46 }
 0x2d2   : > { %v6534_v50 = vpop.f32.mrb[243].mxu1  ;;  %6919 = vrcp.f32 %v4491_v41  ;;  %v4492_v34 = vadd.f32 1.0, %v6910_v45  ;;  %v5541_v43 = vmul.f32 -1.442695, %v8059_v39 }
 0x2d3   : > { %5854 = vst [vmem:[%s7728_s4 + $0xa8] sm:$0xff] %v5826_v1   ;;  %4075 = vst [vmem:[#allocation2 + $0x198] sm:$0xff] %v4006_v47  ;;  %v8064_v48 = vadd.f32 %v7892_v42, %v4006_v47  ;;  %v8089_v1 = vld [vmem:[%s8210_s2] ss:$0 sm:$0xff] }
 0x2d4   : > { %v6912_v22 = vpop.eup %6911  ;;  %6921 = vrcp.f32 %v4492_v34 }
 0x2d5   : > { %v4696_v52 = vmul.f32 %v6912_v22, %v8018_v9  ;;  %6923 = vpow2.f32 %v5541_v43  ;;  %v5542_v55 = vmul.f32 -1.442695, %v8064_v48  ;;  %v2670_v63 = vpop.f32.mrb[248].mxu0  ;;  %v3816_v61 = vpop.f32.mrb[244].mxu1 }
 0x2d6   : > { %v6914_v4 = vpop.eup %6913  ;;  %v6399_v62 = vpop.f32.mrb[249].mxu0  ;;  %v4007_v5 = vadd.f32 %v3816_v61, %v2853_v53  ;;  %v2855_v23 = vadd.f32 %v2786_v25, %v2670_v63  ;;  %v2788_v53 = vld [vmem:[#allocation2 + $0x1c0] sm:$0xff]  ;;  %v2789_v63 = vld [vmem:[#allocation2 + $0x1c8] sm:$0xff] }
 0x2d7   : > { %v6916_v0 = vpop.eup %6915  ;;  %v5763_v54 = vpack.c.bf16 %v4696_v52, %v4696_v52  ;;  %v4697_v3 = vmul.f32 %v6914_v4, %v8023_v2  ;;  %6925 = vpow2.f32 %v5542_v55  ;;  %v6537_v9 = vpop.f32.mrb[245].mxu1 }
 0x2d8   : > { %v2673_v11 = vpop.f32.mrb[250].mxu0  ;;  %v4493_v10 = vadd.f32 1.0, %v6916_v0  ;;  %v3819_v14 = vpop.f32.mrb[246].mxu1  ;;  %4076 = vst [vmem:[#allocation2 + $0x1a0] sm:$0xff] %v4007_v5  ;;  %v8073_v7 = vadd.f32 %v7892_v42, %v4007_v5 }
 0x2d9   : > { %v6400_v12 = vpop.f32.mrb[251].mxu0  ;;  %v6918_v58 = vpop.eup %6917  ;;  %v5004_v59 = vsel %vm7754_vm5, %v5763_v54, %v5659_v57  ;;  %v5764_v6 = vpack.c.bf16 %v4697_v3, %v4697_v3  ;;  %v4008_v16 = vadd.f32 %v3819_v14, %v2854_v60  ;;  %v2856_v31 = vadd.f32 %v2787_v26, %v2673_v11 }
 0x2da   : > { %v6538_v17 = vpop.f32.mrb[247].mxu1  ;;  %5660 = vst [vmem:[%s7728_s4 + $0xb0] sm:$0xf] %v5004_v59  ;;  %6927 = vrcp.f32 %v4493_v10  ;;  %v4494_v2 = vadd.f32 1.0, %v6918_v58  ;;  %v5543_v21 = vmul.f32 -1.442695, %v8073_v7 }
 0x2db   : > { %5664 = vst [vmem:[%s7728_s4 + $0xb4] sm:$0xf] %v5764_v6  ;;  %4077 = vst [vmem:[#allocation2 + $0x1a8] sm:$0xff] %v4008_v16  ;;  %v8079_v18 = vadd.f32 %v7892_v42, %v4008_v16 }
 0x2dc   : > { %v6920_v20 = vpop.eup %6919  ;;  %6929 = vrcp.f32 %v4494_v2 }
 0x2dd   : > { %v4698_v8 = vmul.f32 %v6920_v20, %v8032_v29  ;;  %6931 = vpow2.f32 %v5543_v21  ;;  %v5544_v24 = vmul.f32 -1.442695, %v8079_v18  ;;  %v2678_v27 = vpop.f32.mrb[252].mxu0  ;;  %v3824_v32 = vpop.f32.mrb[248].mxu1  ;;  %v2790_v20 = vld [vmem:[#allocation2 + $0x1d0] sm:$0xff] }
 0x2de   : > { %v6922_v30 = vpop.eup %6921  ;;  %v6403_v33 = vpop.f32.mrb[253].mxu0  ;;  %v4009_v51 = vadd.f32 %v3824_v32, %v2855_v23  ;;  %v2857_v55 = vadd.f32 %v2788_v53, %v2678_v27 }
 0x2df   : > { %v6924_v35 = vpop.eup %6923  ;;  %v5765_v42 = vpack.c.bf16 %v4698_v8, %v4698_v8  ;;  %v4699_v36 = vmul.f32 %v6922_v30, %v8038_v49  ;;  %6933 = vpow2.f32 %v5544_v24  ;;  %v6541_v37 = vpop.f32.mrb[249].mxu1  ;;  %v2791_v24 = vld [vmem:[#allocation2 + $0x1d8] sm:$0xff]  ;;  %v5673_v30 = vld [vmem:[%s7728_s4 + $0xc8] sm:$0xf] }
 0x2e0   : > { %v2681_v29 = vpop.f32.mrb[254].mxu0  ;;  %v4495_v46 = vadd.f32 1.0, %v6924_v35  ;;  %v3827_v41 = vpop.f32.mrb[250].mxu1  ;;  %4078 = vst [vmem:[#allocation2 + $0x1b0] sm:$0xff] %v4009_v51  ;;  %v8092_v49 = vadd.f32 %v8089_v1, %v4009_v51 }
 0x2e1   : > { %v6404_v38 = vpop.f32.mrb[255].mxu0  ;;  %v6926_v44 = vpop.eup %6925  ;;  %5665 = vst [vmem:[%s7728_s4 + $0xb8] sm:$0xf] %v5765_v42  ;;  %v5766_v45 = vpack.c.bf16 %v4699_v36, %v4699_v36  ;;  %v4010_v47 = vadd.f32 %v3827_v41, %v2856_v31  ;;  %v2858_v60 = vadd.f32 %v2789_v63, %v2681_v29  ;;  %v2793_v63 = vld [vmem:[#allocation2 + $0x1e8] sm:$0xff] }
 0x2e2   : > { %v6542_v50 = vpop.f32.mrb[251].mxu1  ;;  %6935 = vrcp.f32 %v4495_v46  ;;  %v4496_v34 = vadd.f32 1.0, %v6926_v44  ;;  %v5545_v22 = vmul.f32 -1.442695, %v8092_v49 }
 0x2e3   : > { %v5020_v43 = vsel %vm7754_vm5, %v5766_v45, %v5666_v40  ;;  %4079 = vst [vmem:[#allocation2 + $0x1b8] sm:$0xff] %v4010_v47  ;;  %v8098_v28 = vadd.f32 %v8089_v1, %v4010_v47 }
 0x2e4   : > { %v6928_v52 = vpop.eup %6927  ;;  %5667 = vst [vmem:[%s7728_s4 + $0xbc] sm:$0xf] %v5020_v43  ;;  %6937 = vrcp.f32 %v4496_v34 }
 0x2e5   : > { %6939 = vpow2.f32 %v5545_v22  ;;  %v5546_v56 = vmul.f32 -1.442695, %v8098_v28  ;;  %v2686_v4 = vpop.f32.mrb[0].mxu0  ;;  %v3832_v61 = vpop.f32.mrb[252].mxu1  ;;  %v4700_v54 = vmul.f32 %v6928_v52, %v8046_v13  ;;  %v2792_v52 = vld [vmem:[#allocation2 + $0x1e0] sm:$0xff] }
 0x2e6   : > { %v6930_v57 = vpop.eup %6929  ;;  %v6407_v62 = vpop.f32.mrb[1].mxu0  ;;  %v4011_v5 = vadd.f32 %v3832_v61, %v2857_v55  ;;  %v2859_v8 = vadd.f32 %v2790_v20, %v2686_v4 }
 0x2e7   : > { %v6932_v0 = vpop.eup %6931  ;;  %v4701_v3 = vmul.f32 %v6930_v57, %v8052_v19  ;;  %6941 = vpow2.f32 %v5546_v56  ;;  %v6545_v9 = vpop.f32.mrb[253].mxu1 }
 0x2e8   : > { %v2689_v11 = vpop.f32.mrb[2].mxu0  ;;  %v4497_v10 = vadd.f32 1.0, %v6932_v0  ;;  %v3835_v14 = vpop.f32.mrb[254].mxu1  ;;  %4080 = vst [vmem:[#allocation2 + $0x1c0] sm:$0xff] %v4011_v5  ;;  %v8105_v6 = vadd.f32 %v8089_v1, %v4011_v5 }
 0x2e9   : > { %v6408_v12 = vpop.f32.mrb[3].mxu0  ;;  %v6934_v58 = vpop.eup %6933  ;;  %v5831_v59 = vpack.c.bf16 %v4701_v3, %v4700_v54  ;;  %v4012_v16 = vadd.f32 %v3835_v14, %v2858_v60  ;;  %v2860_v31 = vadd.f32 %v2791_v24, %v2689_v11  ;;  %v5680_v11 = vld [vmem:[%s7728_s4 + $0xd4] sm:$0xf] }
 0x2ea   : > { %v6546_v17 = vpop.f32.mrb[255].mxu1  ;;  %6943 = vrcp.f32 %v4497_v10  ;;  %v4498_v13 = vadd.f32 1.0, %v6934_v58  ;;  %v5547_v19 = vmul.f32 -1.442695, %v8105_v6 }
 0x2eb   : > { %5855 = vst [vmem:[%s7728_s4 + $0xc0] sm:$0xff] %v5831_v59   ;;  %4081 = vst [vmem:[#allocation2 + $0x1c8] sm:$0xff] %v4012_v16  ;;  %v8110_v2 = vadd.f32 %v8089_v1, %v4012_v16 }
 0x2ec   : > { %v6936_v21 = vpop.eup %6935  ;;  %6945 = vrcp.f32 %v4498_v13 }
 0x2ed   : > { %v4702_v25 = vmul.f32 %v6936_v21, %v8059_v39  ;;  %6947 = vpow2.f32 %v5547_v19  ;;  %v5548_v23 = vmul.f32 -1.442695, %v8110_v2  ;;  %v2694_v26 = vpop.f32.mrb[4].mxu0  ;;  %v3840_v32 = vpop.f32.mrb[0].mxu1 }
 0x2ee   : > { %v6938_v27 = vpop.eup %6937  ;;  %v6411_v33 = vpop.f32.mrb[5].mxu0  ;;  %v4013_v51 = vadd.f32 %v3840_v32, %v2859_v8  ;;  %v2861_v55 = vadd.f32 %v2792_v52, %v2694_v26  ;;  %v2794_v8 = vld [vmem:[#allocation2 + $0x1f0] sm:$0xff]  ;;  %v2795_v26 = vld [vmem:[#allocation2 + $0x1f8] sm:$0xff] }
 0x2ef   : > { %v6940_v35 = vpop.eup %6939  ;;  %v5769_v42 = vpack.c.bf16 %v4702_v25, %v4702_v25  ;;  %v4703_v36 = vmul.f32 %v6938_v27, %v8064_v48  ;;  %6949 = vpow2.f32 %v5548_v23  ;;  %v6549_v39 = vpop.f32.mrb[1].mxu1 }
 0x2f0   : > { %v2697_v37 = vpop.f32.mrb[6].mxu0  ;;  %v4499_v29 = vadd.f32 1.0, %v6940_v35  ;;  %v3843_v40 = vpop.f32.mrb[2].mxu1  ;;  %4082 = vst [vmem:[#allocation2 + $0x1d0] sm:$0xff] %v4013_v51  ;;  %v8119_v45 = vadd.f32 %v8089_v1, %v4013_v51 }
 0x2f1   : > { %v6412_v46 = vpop.f32.mrb[7].mxu0  ;;  %v6942_v41 = vpop.eup %6941  ;;  %v5037_v38 = vsel %vm7754_vm5, %v5769_v42, %v5673_v30  ;;  %v5770_v44 = vpack.c.bf16 %v4703_v36, %v4703_v36  ;;  %v4014_v47 = vadd.f32 %v3843_v40, %v2860_v31  ;;  %v2862_v60 = vadd.f32 %v2793_v63, %v2697_v37 }
 0x2f2   : > { %v6550_v50 = vpop.f32.mrb[3].mxu1  ;;  %5674 = vst [vmem:[%s7728_s4 + $0xc8] sm:$0xf] %v5037_v38  ;;  %6951 = vrcp.f32 %v4499_v29  ;;  %v4500_v48 = vadd.f32 1.0, %v6942_v41  ;;  %v5549_v34 = vmul.f32 -1.442695, %v8119_v45 }
 0x2f3   : > { %5678 = vst [vmem:[%s7728_s4 + $0xcc] sm:$0xf] %v5770_v44  ;;  %4083 = vst [vmem:[#allocation2 + $0x1d8] sm:$0xff] %v4014_v47  ;;  %v8125_v43 = vadd.f32 %v8089_v1, %v4014_v47 }
 0x2f4   : > { %v6944_v22 = vpop.eup %6943  ;;  %6953 = vrcp.f32 %v4500_v48 }
 0x2f5   : > { %v4704_v53 = vmul.f32 %v6944_v22, %v8073_v7  ;;  %6955 = vpow2.f32 %v5549_v34  ;;  %v5550_v56 = vmul.f32 -1.442695, %v8125_v43  ;;  %v2702_v4 = vpop.f32.mrb[8].mxu0  ;;  %v3848_v61 = vpop.f32.mrb[4].mxu1  ;;  %v2796_v22 = vld [vmem:[#allocation2 + $0x200] sm:$0xff] }
 0x2f6   : > { %v6946_v57 = vpop.eup %6945  ;;  %v6415_v62 = vpop.f32.mrb[9].mxu0  ;;  %v4015_v5 = vadd.f32 %v3848_v61, %v2861_v55  ;;  %v2863_v23 = vadd.f32 %v2794_v8, %v2702_v4 }
 0x2f7   : > { %v6948_v0 = vpop.eup %6947  ;;  %v5771_v54 = vpack.c.bf16 %v4704_v53, %v4704_v53  ;;  %v4705_v3 = vmul.f32 %v6946_v57, %v8079_v18  ;;  %6957 = vpow2.f32 %v5550_v56  ;;  %v6553_v9 = vpop.f32.mrb[5].mxu1  ;;  %v2797_v56 = vld [vmem:[#allocation2 + $0x208] sm:$0xff]  ;;  %v5687_v57 = vld [vmem:[%s7728_s4 + $0xe0] sm:$0xf] }
 0x2f8   : > { %v2705_v7 = vpop.f32.mrb[10].mxu0  ;;  %v4501_v10 = vadd.f32 1.0, %v6948_v0  ;;  %v3851_v14 = vpop.f32.mrb[6].mxu1  ;;  %4084 = vst [vmem:[#allocation2 + $0x1e0] sm:$0xff] %v4015_v5  ;;  %v8133_v16 = vadd.f32 %v8089_v1, %v4015_v5 }
 0x2f9   : > { %v6416_v12 = vpop.f32.mrb[11].mxu0  ;;  %v6950_v58 = vpop.eup %6949  ;;  %5679 = vst [vmem:[%s7728_s4 + $0xd0] sm:$0xf] %v5771_v54  ;;  %v5772_v59 = vpack.c.bf16 %v4705_v3, %v4705_v3  ;;  %v4016_v17 = vadd.f32 %v3851_v14, %v2862_v60  ;;  %v2864_v31 = vadd.f32 %v2795_v26, %v2705_v7  ;;  %v2799_v26 = vld [vmem:[#allocation2 + $0x218] sm:$0xff] }
 0x2fa   : > { %v6554_v13 = vpop.f32.mrb[7].mxu1  ;;  %6959 = vrcp.f32 %v4501_v10  ;;  %v4502_v18 = vadd.f32 1.0, %v6950_v58  ;;  %v5551_v21 = vmul.f32 -1.442695, %v8133_v16 }
 0x2fb   : > { %v5053_v19 = vsel %vm7754_vm5, %v5772_v59, %v5680_v11  ;;  %4085 = vst [vmem:[#allocation2 + $0x1e8] sm:$0xff] %v4016_v17  ;;  %v8139_v20 = vadd.f32 %v8089_v1, %v4016_v17 }
 0x2fc   : > { %v6952_v25 = vpop.eup %6951  ;;  %5681 = vst [vmem:[%s7728_s4 + $0xd4] sm:$0xf] %v5053_v19  ;;  %6961 = vrcp.f32 %v4502_v18 }
 0x2fd   : > { %6963 = vpow2.f32 %v5551_v21  ;;  %v5552_v24 = vmul.f32 -1.442695, %v8139_v20  ;;  %v2710_v27 = vpop.f32.mrb[12].mxu0  ;;  %v3856_v32 = vpop.f32.mrb[8].mxu1  ;;  %v4706_v42 = vmul.f32 %v6952_v25, %v8092_v49  ;;  %v2798_v25 = vld [vmem:[#allocation2 + $0x210] sm:$0xff] }
 0x2fe   : > { %v6954_v30 = vpop.eup %6953  ;;  %v6419_v33 = vpop.f32.mrb[13].mxu0  ;;  %v4017_v51 = vadd.f32 %v3856_v32, %v2863_v23  ;;  %v2865_v53 = vadd.f32 %v2796_v22, %v2710_v27 }
 0x2ff   : > { %v6956_v35 = vpop.eup %6955  ;;  %v4707_v36 = vmul.f32 %v6954_v30, %v8098_v28  ;;  %6965 = vpow2.f32 %v5552_v24  ;;  %v6557_v39 = vpop.f32.mrb[9].mxu1  ;;  %v2800_v30 = vld [vmem:[#allocation2 + $0x220] sm:$0x7f] }
 0x300   : > { %v2713_v37 = vpop.f32.mrb[14].mxu0  ;;  %v4503_v29 = vadd.f32 1.0, %v6956_v35  ;;  %v3859_v40 = vpop.f32.mrb[10].mxu1  ;;  %4086 = vst [vmem:[#allocation2 + $0x1f0] sm:$0xff] %v4017_v51  ;;  %v8146_v44 = vadd.f32 %v8089_v1, %v4017_v51 }
 0x301   : > { %v6420_v46 = vpop.f32.mrb[15].mxu0  ;;  %v6958_v41 = vpop.eup %6957  ;;  %v5836_v38 = vpack.c.bf16 %v4707_v36, %v4706_v42  ;;  %v4018_v47 = vadd.f32 %v3859_v40, %v2864_v31  ;;  %v2866_v60 = vadd.f32 %v2797_v56, %v2713_v37  ;;  %v5694_v40 = vld [vmem:[%s7728_s4 + $0xec] sm:$0xf] }
 0x302   : > { %v6558_v50 = vpop.f32.mrb[11].mxu1  ;;  %6967 = vrcp.f32 %v4503_v29  ;;  %v4504_v49 = vadd.f32 1.0, %v6958_v41  ;;  %v5553_v28 = vmul.f32 -1.442695, %v8146_v44 }
 0x303   : > { %5856 = vst [vmem:[%s7728_s4 + $0xd8] sm:$0xff] %v5836_v38   ;;  %4087 = vst [vmem:[#allocation2 + $0x1f8] sm:$0xff] %v4018_v47  ;;  %v8151_v48 = vadd.f32 %v8089_v1, %v4018_v47 }
 0x304   : > { %v6960_v34 = vpop.eup %6959  ;;  %6969 = vrcp.f32 %v4504_v49 }
 0x305   : > { %v4708_v52 = vmul.f32 %v6960_v34, %v8105_v6  ;;  %6971 = vpow2.f32 %v5553_v28  ;;  %v5554_v55 = vmul.f32 -1.442695, %v8151_v48  ;;  %v2718_v63 = vpop.f32.mrb[16].mxu0  ;;  %v3864_v61 = vpop.f32.mrb[12].mxu1 }
 0x306   : > { %v6962_v4 = vpop.eup %6961  ;;  %v6423_v62 = vpop.f32.mrb[17].mxu0  ;;  %v4019_v5 = vadd.f32 %v3864_v61, %v2865_v53  ;;  %v2867_v23 = vadd.f32 %v2798_v25, %v2718_v63 }
 0x307   : > { %v6964_v0 = vpop.eup %6963  ;;  %v5775_v54 = vpack.c.bf16 %v4708_v52, %v4708_v52  ;;  %v4709_v3 = vmul.f32 %v6962_v4, %v8110_v2  ;;  %6973 = vpow2.f32 %v5554_v55  ;;  %v6561_v6 = vpop.f32.mrb[13].mxu1 }
 0x308   : > { %v2721_v9 = vpop.f32.mrb[18].mxu0  ;;  %v4505_v7 = vadd.f32 1.0, %v6964_v0  ;;  %v3867_v11 = vpop.f32.mrb[14].mxu1  ;;  %4088 = vst [vmem:[#allocation2 + $0x200] sm:$0xff] %v4019_v5  ;;  %v8160_v59 = vadd.f32 %v8089_v1, %v4019_v5 }
 0x309   : > { %v6424_v10 = vpop.f32.mrb[19].mxu0  ;;  %v6966_v14 = vpop.eup %6965  ;;  %v5070_v12 = vsel %vm7754_vm5, %v5775_v54, %v5687_v57  ;;  %v5776_v58 = vpack.c.bf16 %v4709_v3, %v4709_v3  ;;  %v4020_v17 = vadd.f32 %v3867_v11, %v2866_v60  ;;  %v2868_v32 = vadd.f32 %v2799_v26, %v2721_v9 }
 0x30a   : > { %v6562_v13 = vpop.f32.mrb[15].mxu1  ;;  %5688 = vst [vmem:[%s7728_s4 + $0xe0] sm:$0xf] %v5070_v12  ;;  %6975 = vrcp.f32 %v4505_v7  ;;  %v4506_v2 = vadd.f32 1.0, %v6966_v14  ;;  %v5555_v18 = vmul.f32 -1.442695, %v8160_v59 }
 0x30b   : > { %5692 = vst [vmem:[%s7728_s4 + $0xe4] sm:$0xf] %v5776_v58  ;;  %4089 = vst [vmem:[#allocation2 + $0x208] sm:$0xff] %v4020_v17  ;;  %v8166_v19 = vadd.f32 %v8089_v1, %v4020_v17  ;;  %v5701_v14 = vld [vmem:[%s7728_s4 + $0xf8] sm:$0xf] }
 0x30c   : > { %v6968_v21 = vpop.eup %6967  ;;  %6977 = vrcp.f32 %v4506_v2 }
 0x30d   : > { %v4710_v8 = vmul.f32 %v6968_v21, %v8119_v45  ;;  %6979 = vpow2.f32 %v5555_v18  ;;  %v5556_v24 = vmul.f32 -1.442695, %v8166_v19  ;;  %v2726_v27 = vpop.f32.mrb[20].mxu0  ;;  %v3872_v33 = vpop.f32.mrb[16].mxu1 }
 0x30e   : > { %v6970_v31 = vpop.eup %6969  ;;  %v2869_v35 = vadd.f32 %v2800_v30, %v2726_v27  ;;  %v6427_v42 = vpop.f32.mrb[21].mxu0  ;;  %v4021_v45 = vadd.f32 %v3872_v33, %v2867_v23 }
 0x30f   : > { %v6972_v36 = vpop.eup %6971  ;;  %v5777_v51 = vpack.c.bf16 %v4710_v8, %v4710_v8  ;;  %v4711_v39 = vmul.f32 %v6970_v31, %v8125_v43  ;;  %6981 = vpow2.f32 %v5556_v24  ;;  %v6565_v37 = vpop.f32.mrb[17].mxu1  ;;  %v5708_v31 = vld [vmem:[%s7728_s4 + $0x104] sm:$0xf] }
 0x310   : > { %v2729_v29 = vpop.f32.mrb[22].mxu0  ;;  %v4507_v46 = vadd.f32 1.0, %v6972_v36  ;;  %2938 = vst [vmem:[#allocation2 + $0x220] sm:$0x7f] %v2869_v35  ;;  %v3875_v41 = vpop.f32.mrb[18].mxu1  ;;  %4090 = vst [vmem:[#allocation2 + $0x210] sm:$0xff] %v4021_v45  ;;  %v8174_v49 = vadd.f32 %v8089_v1, %v4021_v45 }
 0x311   : > { %v6428_v38 = vpop.f32.mrb[23].mxu0  ;;  %v6974_v47 = vpop.eup %6973  ;;  %5693 = vst [vmem:[%s7728_s4 + $0xe8] sm:$0xf] %v5777_v51  ;;  %v5778_v50 = vpack.c.bf16 %v4711_v39, %v4711_v39  ;;  %v4022_v28 = vadd.f32 %v3875_v41, %v2868_v32  ;;  %v5715_v37 = vld [vmem:[%s7728_s4 + $0x110] sm:$0xf] }
 0x312   : > { %v6566_v34 = vpop.f32.mrb[19].mxu1  ;;  %6983 = vrcp.f32 %v4507_v46  ;;  %v4508_v43 = vadd.f32 1.0, %v6974_v47  ;;  %v5557_v52 = vmul.f32 -1.442695, %v8174_v49 }
 0x313   : > { %v5086_v22 = vsel %vm7754_vm5, %v5778_v50, %v5694_v40  ;;  %4091 = vst [vmem:[#allocation2 + $0x218] sm:$0xff] %v4022_v28  ;;  %v4236_v53 = vadd.f32 %v8089_v1, %v4022_v28 }
 0x314   : > { %v6976_v55 = vpop.eup %6975  ;;  %5695 = vst [vmem:[%s7728_s4 + $0xec] sm:$0xf] %v5086_v22  ;;  %6985 = vrcp.f32 %v4508_v43 }
 0x315   : > { %6987 = vpow2.f32 %v5557_v52  ;;  %v5558_v56 = vmul.f32 -1.442695, %v4236_v53  ;;  %v3880_v4 = vpop.f32.mrb[20].mxu1  ;;  %v4712_v60 = vmul.f32 %v6976_v55, %v8133_v16 }
 0x316   : > { %v6978_v63 = vpop.eup %6977  ;;  %v6569_v0 = vpop.f32.mrb[21].mxu1 }
 0x317   : > { %v6980_v57 = vpop.eup %6979  ;;  %v4713_v61 = vmul.f32 %v6978_v63, %v8139_v20  ;;  %6989 = vpow2.f32 %v5558_v56  ;;  %v3954_v62 = vld [vmem:[#allocation2 + $0x220] sm:$0x7f]  ;;  %v3883_v5 = vpop.f32.mrb[22].mxu1 }
 0x318   : > { %v4509_v54 = vadd.f32 1.0, %v6980_v57  ;;  %v4023_v3 = vadd.f32 %v3954_v62, %v3880_v4  ;;  %v6570_v7 = vpop.f32.mrb[23].mxu1 }
 0x319   : > { %v6982_v6 = vpop.eup %6981  ;;  %v5841_v9 = vpack.c.bf16 %v4713_v61, %v4712_v60 }
 0x31a   : > { %6991 = vrcp.f32 %v4509_v54  ;;  %v4510_v11 = vadd.f32 1.0, %v6982_v6  ;;  %4092 = vst [vmem:[#allocation2 + $0x220] sm:$0x7f] %v4023_v3 }
 0x31b   : > { %5857 = vst [vmem:[%s7728_s4 + $0xf0] sm:$0xff] %v5841_v9  }
 0x31c   : > { %v6984_v10 = vpop.eup %6983  ;;  %6993 = vrcp.f32 %v4510_v11 }
 0x31d   : > { %v4714_v16 = vmul.f32 %v6984_v10, %v8146_v44 }
 0x31e   : > { %v6986_v20 = vpop.eup %6985 }
 0x31f   : > { %v6988_v12 = vpop.eup %6987  ;;  %v5781_v58 = vpack.c.bf16 %v4714_v16, %v4714_v16  ;;  %v4715_v17 = vmul.f32 %v6986_v20, %v8151_v48 }
 0x320   : > { %v4511_v13 = vadd.f32 1.0, %v6988_v12 }
 0x321   : > { %v6990_v2 = vpop.eup %6989  ;;  %v5103_v18 = vsel %vm7754_vm5, %v5781_v58, %v5701_v14  ;;  %v5782_v21 = vpack.c.bf16 %v4715_v17, %v4715_v17  ;;  %v4161_v25 = vld [vmem:[#allocation2 + $0x220] sm:$0x7f] }
 0x322   : > { %5702 = vst [vmem:[%s7728_s4 + $0xf8] sm:$0xf] %v5103_v18  ;;  %6995 = vrcp.f32 %v4511_v13  ;;  %v4512_v8 = vadd.f32 1.0, %v6990_v2  ;;  %v4237_v44 = vadd.f32 %v8089_v1, %v4161_v25 }
 0x323   : > { %5706 = vst [vmem:[%s7728_s4 + $0xfc] sm:$0xf] %v5782_v21 }
 0x324   : > { %v6992_v23 = vpop.eup %6991  ;;  %6997 = vrcp.f32 %v4512_v8  ;;  %v5559_v24 = vmul.f32 -1.442695, %v4237_v44 }
 0x325   : > { %v4716_v48 = vmul.f32 %v6992_v23, %v8160_v59 }
 0x326   : > { %v6994_v26 = vpop.eup %6993  ;;  %6999 = vpow2.f32 %v5559_v24 }
 0x327   : > { %v5783_v27 = vpack.c.bf16 %v4716_v48, %v4716_v48  ;;  %v4717_v30 = vmul.f32 %v6994_v26, %v8166_v19 }
 0x329   : > { %5707 = vst [vmem:[%s7728_s4 + $0x100] sm:$0xf] %v5783_v27  ;;  %v5784_v32 = vpack.c.bf16 %v4717_v30, %v4717_v30 }
 0x32b   : > { %v5119_v33 = vsel %vm7754_vm5, %v5784_v32, %v5708_v31 }
 0x32c   : > { %v6996_v1 = vpop.eup %6995  ;;  %5709 = vst [vmem:[%s7728_s4 + $0x104] sm:$0xf] %v5119_v33 }
 0x32d   : > { %v4718_v42 = vmul.f32 %v6996_v1, %v8174_v49 }
 0x32e   : > { %v6998_v35 = vpop.eup %6997 }
 0x32f   : > { %v4719_v59 = vmul.f32 %v6998_v35, %v4236_v53 }
 0x330   : > { %v7000_v36 = vpop.eup %6999 }
 0x331   : > { %v5846_v51 = vpack.c.bf16 %v4719_v59, %v4718_v42  ;;  %v4513_v39 = vadd.f32 1.0, %v7000_v36 }
 0x333   : > { %5858 = vst [vmem:[%s7728_s4 + $0x108] sm:$0xff] %v5846_v51   ;;  %7001 = vrcp.f32 %v4513_v39 }
 0x33d   : > { %v7002_v19 = vpop.eup %7001 }
 0x33e   : > { %v4720_v45 = vmul.f32 %v7002_v19, %v4237_v44 }
 0x340   : > { %v5787_v29 = vpack.c.bf16 %v4720_v45, %v4720_v45 }
 0x342   : > { %v5136_v40 = vsel %vm7754_vm5, %v5787_v29, %v5715_v37 }
 0x343   : > { %5716 = vst [vmem:[%s7728_s4 + $0x110] sm:$0xf] %v5136_v40 }
 0x344 PF: > { %s13_s12 = sadd.s32 1, %s7011_s12  }
 0x345   : > { %p10_p4 = scmp.ge.s32.totalorder %s13_s12, 4  }
 0x347   :  { %12 = sbr.rel (!%p10_p4) target bundleno = 1 (0x1), region = 87 }

</bundles_post_ra>
